<compile_context>
chip_gen: v7x
topology: tpu7x:2x2x1
jax: 0.10.0
libtpu: 0.0.40
codegen_flags: <defaults>
</compile_context>

<pallas_src>
import jax
import jax.numpy as jnp
from jax.experimental import pallas as pl
from jax.experimental.pallas import tpu as pltpu

# Small, module-consistent sizes (PyTorch defaults are 512 / 128 / 256).
FRAME_LEN = 64
ENCODER_SIZE = 32
HIDDEN_SIZE = 32
EPS = 1e-7

_F, _E, _H = FRAME_LEN, ENCODER_SIZE, HIDDEN_SIZE
GATE = 4 * _H                       # 128  (one full vreg of gates)
B_TILE = 8                          # streams per grid step (one sublane tile)

# Row offsets inside the packed weight slab (all multiples of 8).
OFF_WIH1 = 0                        # [E , 4H]
OFF_WHH1 = OFF_WIH1 + _E            # [H , 4H]
OFF_WIH2 = OFF_WHH1 + _H            # [H , 4H]
OFF_WHH2 = OFF_WIH2 + _H            # [H , 4H]
OFF_WENC = OFF_WHH2 + _H            # [F , E ]  (lane-padded)
OFF_WD = OFF_WENC + _F              # [H , E ]  (lane-padded)
OFF_WDEC = OFF_WD + _H              # [E , 128] (cols F..127 zero -> lane-dense decode)
W_ROWS = OFF_WDEC + _E              # 256
W_COLS = max(GATE, _E, _F)          # 128

# Rows inside the packed bias table.
ROW_B1, ROW_B2, ROW_GAMMA, ROW_BETA, ROW_BD = 0, 1, 2, 3, 4
B_ROWS = 8


def _cell_from_gates(g, c, H):
    """LSTM nonlinearity from a [B,4H] pre-activation gate slab (gate order i,f,g,o)."""
    s = jax.nn.sigmoid(g)                      # one EUP pass over the full gate vreg
    i = s[:, 0:H]
    f = s[:, H:2 * H]
    o = s[:, 3 * H:4 * H]
    gg = jnp.tanh(g[:, 2 * H:3 * H])
    c_new = f * c + i * gg
    h_new = o * jnp.tanh(c_new)
    return h_new, c_new


def dtln_p2_kernel(y_ref, st_ref, w_ref, b_ref,          # inputs
                   dec_ref, ost_ref,                      # outputs
                   pre1_s, h2all_s):                      # VMEM scratch
    F, E, H = FRAME_LEN, ENCODER_SIZE, HIDDEN_SIZE
    B = st_ref.shape[0]                 # streams handled this grid step
    T = y_ref.shape[0] // B             # frames per stream

    # ---------------- hoisted, frame-parallel prologue ----------------
    y = y_ref[...]                                                   # [T*B, F]
    w_enc = w_ref[OFF_WENC:OFF_WENC + F, 0:E]                        # [F, E]
    enc = jnp.dot(y, w_enc, preferred_element_type=jnp.float32)      # [T*B, E]

    # Instant layer norm (per frame == per row for the streaming module).
    gamma = b_ref[ROW_GAMMA:ROW_GAMMA + 1, 0:E]
    beta = b_ref[ROW_BETA:ROW_BETA + 1, 0:E]
    mean = jnp.mean(enc, axis=-1, keepdims=True)
    sub = enc - mean
    var = jnp.mean(sub * sub, axis=-1, keepdims=True)
    norm = sub * jax.lax.rsqrt(var + EPS) * gamma + beta             # [T*B, E]

    # LSTM1 input projection for all frames/streams at once (+ combined bias).
    w_ih1 = w_ref[OFF_WIH1:OFF_WIH1 + E, :]                          # [E, 4H]
    b1 = b_ref[ROW_B1:ROW_B1 + 1, :]
    pre1_s[...] = jnp.dot(norm, w_ih1,
                          preferred_element_type=jnp.float32) + b1   # [T*B, 4H]

    # ---------------- recurrent section ----------------
    w_hh1 = w_ref[OFF_WHH1:OFF_WHH1 + H, :]                          # [H, 4H]
    w_ih2 = w_ref[OFF_WIH2:OFF_WIH2 + H, :]                          # [H, 4H]
    w_hh2 = w_ref[OFF_WHH2:OFF_WHH2 + H, :]                          # [H, 4H]
    b2 = b_ref[ROW_B2:ROW_B2 + 1, :]

    st = st_ref[...]                                                 # [B, 4H]
    h1_0 = st[:, 0:H]
    c1_0 = st[:, H:2 * H]
    h2_0 = st[:, 2 * H:3 * H]
    c2_0 = st[:, 3 * H:4 * H]

    def step(t, carry):
        h1, c1, h2, c2 = carry
        row = t * B
        # LSTM2 recurrent contribution: depends only on the previous step's h2,
        # so it overlaps LSTM1's sigmoid/tanh work (off the h1n critical path).
        hh2 = jnp.dot(h2, w_hh2, preferred_element_type=jnp.float32)          # [B, 4H]
        # LSTM cell 1: hoisted input projection + recurrent matmul.
        g1 = pre1_s[pl.ds(row, B), :] + jnp.dot(
            h1, w_hh1, preferred_element_type=jnp.float32)                    # [B, 4H]
        h1n, c1n = _cell_from_gates(g1, c1, H)
        # LSTM cell 2: small [B,H]@[H,4H] on the critical chain, no concat.
        g2 = jnp.dot(h1n, w_ih2,
                     preferred_element_type=jnp.float32) + hh2 + b2           # [B, 4H]
        h2n, c2n = _cell_from_gates(g2, c2, H)
        h2all_s[pl.ds(row, B), :] = h2n
        return h1n, c1n, h2n, c2n

    h1, c1, h2, c2 = jax.lax.fori_loop(
        0, T, step, (h1_0, c1_0, h2_0, c2_0), unroll=True)

    # ---------------- hoisted, frame-parallel epilogue ----------------
    w_d = w_ref[OFF_WD:OFF_WD + H, 0:E]                              # [H, E]
    b_d = b_ref[ROW_BD:ROW_BD + 1, 0:E]
    mask = jax.nn.sigmoid(
        jnp.dot(h2all_s[...], w_d, preferred_element_type=jnp.float32) + b_d)
    est = mask * enc                                                 # [T*B, E]
    w_dec = w_ref[OFF_WDEC:OFF_WDEC + E, :]                          # [E, 128] (zero-padded)
    dec_ref[...] = jnp.dot(est, w_dec, preferred_element_type=jnp.float32)    # lane-dense

    # Single lane-dense store of the final states (h1|c1|h2|c2) per stream row.
    ost_ref[...] = jnp.concatenate([h1, c1, h2, c2], axis=-1)        # [B, 4H]


def pack_params(p):
    """Pack per-tensor parameters into one weight slab + one bias table."""
    F, E, H = FRAME_LEN, ENCODER_SIZE, HIDDEN_SIZE
    w = jnp.zeros((W_ROWS, W_COLS), jnp.float32)
    w = w.at[OFF_WIH1:OFF_WIH1 + E, :].set(p["w_ih1"])
    w = w.at[OFF_WHH1:OFF_WHH1 + H, :].set(p["w_hh1"])
    w = w.at[OFF_WIH2:OFF_WIH2 + H, :].set(p["w_ih2"])
    w = w.at[OFF_WHH2:OFF_WHH2 + H, :].set(p["w_hh2"])
    w = w.at[OFF_WENC:OFF_WENC + F, 0:E].set(p["w_enc"])
    w = w.at[OFF_WD:OFF_WD + H, 0:E].set(p["w_d"])
    w = w.at[OFF_WDEC:OFF_WDEC + E, 0:F].set(p["w_dec"])   # cols F..127 stay zero

    b = jnp.zeros((B_ROWS, W_COLS), jnp.float32)
    b = b.at[ROW_B1, :].set(p["b1"][0])
    b = b.at[ROW_B2, :].set(p["b2"][0])
    b = b.at[ROW_GAMMA, 0:E].set(p["gamma"][0])
    b = b.at[ROW_BETA, 0:E].set(p["beta"][0])
    b = b.at[ROW_BD, 0:E].set(p["b_d"][0])
    return w, b


def dtln_p2_forward(y_frames, in_states, w_packed, b_packed):
    """Run T sequential frames of the stateful module for B independent streams.

    y_frames : [B, T, frame_len]   (B streams, T frames each)
    in_states: [B, 4, 1, hidden]   (per stream: h1, c1, h2, c2)
    Returns  : decoded [B, T, frame_len], out_states [B, 4, 1, hidden]
    """
    F, H = FRAME_LEN, HIDDEN_SIZE
    B, T = y_frames.shape[0], y_frames.shape[1]
    assert B % B_TILE == 0
    G = B // B_TILE                 # stream groups -> parallel grid axis (2 TCs on v7x)
    TB = T * B_TILE

    # Within each group, rows are ordered (t, b) so the recurrence can slice
    # a contiguous [B_TILE, 4H] gate slab per timestep.
    y = (y_frames.reshape(G, B_TILE, T, F)
                 .transpose(0, 2, 1, 3)
                 .reshape(G, TB, F).astype(jnp.float32))
    st = in_states.reshape(G, B_TILE, 4 * H).astype(jnp.float32)

    dec, ost = pl.pallas_call(
        dtln_p2_kernel,
        grid=(G,),
        out_shape=(
            jax.ShapeDtypeStruct((G, TB, 128), jnp.float32),        # lane-dense decode
            jax.ShapeDtypeStruct((G, B_TILE, 4 * H), jnp.float32),  # packed states
        ),
        in_specs=[
            pl.BlockSpec((None, TB, F), lambda g: (g, 0, 0)),
            pl.BlockSpec((None, B_TILE, 4 * H), lambda g: (g, 0, 0)),
            pl.BlockSpec((W_ROWS, W_COLS), lambda g: (0, 0)),       # resident weights
            pl.BlockSpec((B_ROWS, W_COLS), lambda g: (0, 0)),       # resident biases
        ],
        out_specs=(
            pl.BlockSpec((None, TB, 128), lambda g: (g, 0, 0)),
            pl.BlockSpec((None, B_TILE, 4 * H), lambda g: (g, 0, 0)),
        ),
        scratch_shapes=[
            pltpu.VMEM((TB, 4 * H), jnp.float32),   # pre-computed LSTM1 gates
            pltpu.VMEM((TB, H), jnp.float32),       # h2 outputs for all frames
        ],
        input_output_aliases={1: 1},                # in_states -> out_states
        compiler_params=pltpu.CompilerParams(dimension_semantics=("parallel",)),
    )(y, st, w_packed, b_packed)

    decoded = (dec[:, :, :F].reshape(G, T, B_TILE, F)
                            .transpose(0, 2, 1, 3)
                            .reshape(B, T, F))
    out_states = ost.reshape(B, 4, 1, H)
    return decoded, out_states


def _reference_forward_stream(y_frames, in_states, p):
    """Pure-JAX reference: apply the PyTorch module frame by frame, per stream."""
    F, E, H = FRAME_LEN, ENCODER_SIZE, HIDDEN_SIZE
    B, T, _ = y_frames.shape
    s = in_states.reshape(B, 4, H)
    h1, c1, h2, c2 = s[:, 0], s[:, 1], s[:, 2], s[:, 3]

    def cell(x, h, c, w_ih, w_hh, b):
        g = x @ w_ih + h @ w_hh + b
        i = jax.nn.sigmoid(g[:, :H])
        f = jax.nn.sigmoid(g[:, H:2 * H])
        gg = jnp.tanh(g[:, 2 * H:3 * H])
        o = jax.nn.sigmoid(g[:, 3 * H:])
        cn = f * c + i * gg
        return o * jnp.tanh(cn), cn

    outs = []
    for t in range(T):
        y = y_frames[:, t, :]                                       # [B, F]
        enc = y @ p["w_enc"]                                        # [B, E]
        mean = jnp.mean(enc, axis=-1, keepdims=True)
        sub = enc - mean
        var = jnp.mean(sub * sub, axis=-1, keepdims=True)
        norm = sub / jnp.sqrt(var + EPS) * p["gamma"] + p["beta"]
        h1, c1 = cell(norm, h1, c1, p["w_ih1"], p["w_hh1"], p["b1"])
        h2, c2 = cell(h1, h2, c2, p["w_ih2"], p["w_hh2"], p["b2"])
        mask = jax.nn.sigmoid(h2 @ p["w_d"] + p["b_d"])
        outs.append((mask * enc) @ p["w_dec"])                      # [B, F]
    decoded = jnp.stack(outs, axis=1)                               # [B, T, F]
    out_states = jnp.stack([h1, c1, h2, c2], axis=1).reshape(B, 4, 1, H)
    return decoded, out_states


def _init_params(key):
    F, E, H = FRAME_LEN, ENCODER_SIZE, HIDDEN_SIZE
    ks = jax.random.split(key, 12)
    scale = 0.1
    return {
        # encoder_conv1.weight [E, F, 1] -> stored transposed [F, E]
        "w_enc": scale * jax.random.normal(ks[0], (F, E), jnp.float32),
        # norm params (perturbed from ones/zeros to exercise the path)
        "gamma": 1.0 + scale * jax.random.normal(ks[10], (1, E), jnp.float32),
        "beta": scale * jax.random.normal(ks[11], (1, E), jnp.float32),
        # rnn1: weight_ih [4H,E] -> [E,4H]; weight_hh [4H,H] -> [H,4H]; b = b_ih+b_hh
        "w_ih1": scale * jax.random.normal(ks[1], (E, 4 * H), jnp.float32),
        "w_hh1": scale * jax.random.normal(ks[2], (H, 4 * H), jnp.float32),
        "b1": scale * jax.random.normal(ks[3], (1, 4 * H), jnp.float32),
        # rnn2
        "w_ih2": scale * jax.random.normal(ks[4], (H, 4 * H), jnp.float32),
        "w_hh2": scale * jax.random.normal(ks[5], (H, 4 * H), jnp.float32),
        "b2": scale * jax.random.normal(ks[6], (1, 4 * H), jnp.float32),
        # dense: weight [E, H] -> [H, E]
        "w_d": scale * jax.random.normal(ks[7], (H, E), jnp.float32),
        "b_d": scale * jax.random.normal(ks[8], (1, E), jnp.float32),
        # decoder_conv1.weight [F, E, 1] -> [E, F]
        "w_dec": scale * jax.random.normal(ks[9], (E, F), jnp.float32),
    }


if __name__ == "__main__":
    # TODO(synk): Dropout(p=0.25) from SeperationBlock_Stateful is identity in
    # eval/inference mode and is intentionally omitted.
    key = jax.random.PRNGKey(0)
    k_param, k_y, k_s = jax.random.split(key, 3)

    params = _init_params(k_param)
    w_packed, b_packed = pack_params(params)

    B = 16  # independent streams (2 groups of 8 -> both v7x TensorCores busy)
    T = 16  # frames per stream processed in one kernel call
    y_frames = jax.random.normal(k_y, (B, T, FRAME_LEN), jnp.float32)
    in_states = jax.random.normal(k_s, (B, 4, 1, HIDDEN_SIZE), jnp.float32)

    ref_dec, ref_states = _reference_forward_stream(y_frames, in_states, params)

    decoded, out_states = dtln_p2_forward(y_frames, in_states, w_packed, b_packed)
    decoded = jax.block_until_ready(decoded)
    out_states = jax.block_until_ready(out_states)

    assert decoded.shape == (B, T, FRAME_LEN)
    assert out_states.shape == (B, 4, 1, HIDDEN_SIZE)
    assert jnp.allclose(decoded, ref_dec, atol=5e-5, rtol=5e-5)
    assert jnp.allclose(out_states, ref_states, atol=5e-5, rtol=5e-5)

    print("KERNEL_OK")
</pallas_src>

<mosaic_0001>
module attributes {stable_mosaic.version = 11 : i64} {
  func.func @dtln_p2_kernel(%arg0: i32, %arg1: memref<1x128x64xf32, #tpu.memory_space<vmem>>, %arg2: memref<1x8x128xf32, #tpu.memory_space<vmem>>, %arg3: memref<256x128xf32, #tpu.memory_space<vmem>>, %arg4: memref<8x128xf32, #tpu.memory_space<vmem>>, %arg5: memref<1x128x128xf32, #tpu.memory_space<vmem>>, %arg6: memref<1x8x128xf32, #tpu.memory_space<vmem>>, %arg7: memref<128x128xf32, #tpu.memory_space<vmem>>, %arg8: memref<128x32xf32, #tpu.memory_space<vmem>>) attributes {dimension_semantics = [#tpu.dimension_semantics<parallel>], iteration_bounds = array<i64: 2>, scalar_prefetch = 0 : i64, scratch_operands = 2 : i64, tpu.core_type = #tpu.core_type<tc>, window_params = [{transform_indices = @transform_0, window_bounds = array<i64: 1, 128, 64>}, {transform_indices = @transform_1, window_bounds = array<i64: 1, 8, 128>}, {pipeline_mode = #tpu.pipeline_mode<synchronous>, transform_indices = @transform_2, window_bounds = array<i64: 256, 128>}, {pipeline_mode = #tpu.pipeline_mode<synchronous>, transform_indices = @transform_3, window_bounds = array<i64: 8, 128>}, {transform_indices = @transform_4, window_bounds = array<i64: 1, 128, 128>}, {transform_indices = @transform_5, window_bounds = array<i64: 1, 8, 128>}]} {
    %c0 = arith.constant 0 : index
    %c0_0 = arith.constant 0 : index
    %c0_1 = arith.constant 0 : index
    %0 = vector.load %arg1[%c0, %c0_0, %c0_1] : memref<1x128x64xf32, #tpu.memory_space<vmem>>, vector<1x128x64xf32>
    %1 = vector.shape_cast %0 : vector<1x128x64xf32> to vector<128x64xf32>
    %c128 = arith.constant 128 : index
    %c0_2 = arith.constant 0 : index
    %2 = vector.load %arg3[%c128, %c0_2] : memref<256x128xf32, #tpu.memory_space<vmem>>, vector<64x32xf32>
    %cst = arith.constant dense<0.000000e+00> : vector<128x32xf32>
    %3 = tpu.matmul %1, %2, %cst {dimension_numbers = #tpu.dot_dimension_numbers<[1], [0], [0], [1], [0, 0, 1, 1], [], []>} : vector<128x64xf32>, vector<64x32xf32>, vector<128x32xf32> -> vector<128x32xf32>
    %c2 = arith.constant 2 : index
    %c0_3 = arith.constant 0 : index
    %4 = vector.load %arg4[%c2, %c0_3] : memref<8x128xf32, #tpu.memory_space<vmem>>, vector<1x32xf32>
    %c3 = arith.constant 3 : index
    %c0_4 = arith.constant 0 : index
    %5 = vector.load %arg4[%c3, %c0_4] : memref<8x128xf32, #tpu.memory_space<vmem>>, vector<1x32xf32>
    %cst_5 = arith.constant dense<0.000000e+00> : vector<128xf32>
    %6 = vector.multi_reduction <add>, %3, %cst_5 [1] : vector<128x32xf32> to vector<128xf32>
    %7 = vector.shape_cast %6 : vector<128xf32> to vector<128x1xf32>
    %cst_6 = arith.constant 3.200000e+01 : f32
    %8 = vector.broadcast %cst_6 : f32 to vector<128x1xf32>
    %9 = arith.divf %7, %8 : vector<128x1xf32>
    %10 = vector.broadcast %9 : vector<128x1xf32> to vector<128x32xf32>
    %11 = arith.subf %3, %10 : vector<128x32xf32>
    %12 = arith.mulf %11, %11 : vector<128x32xf32>
    %cst_7 = arith.constant dense<0.000000e+00> : vector<128xf32>
    %13 = vector.multi_reduction <add>, %12, %cst_7 [1] : vector<128x32xf32> to vector<128xf32>
    %14 = vector.shape_cast %13 : vector<128xf32> to vector<128x1xf32>
    %cst_8 = arith.constant 3.200000e+01 : f32
    %15 = vector.broadcast %cst_8 : f32 to vector<128x1xf32>
    %16 = arith.divf %14, %15 : vector<128x1xf32>
    %cst_9 = arith.constant 1.000000e-07 : f32
    %17 = vector.broadcast %cst_9 : f32 to vector<128x1xf32>
    %18 = arith.addf %16, %17 : vector<128x1xf32>
    %19 = math.rsqrt %18 : vector<128x1xf32>
    %20 = vector.broadcast %19 : vector<128x1xf32> to vector<128x32xf32>
    %21 = arith.mulf %11, %20 : vector<128x32xf32>
    %22 = vector.broadcast %4 : vector<1x32xf32> to vector<128x32xf32>
    %23 = arith.mulf %21, %22 : vector<128x32xf32>
    %24 = vector.broadcast %5 : vector<1x32xf32> to vector<128x32xf32>
    %25 = arith.addf %23, %24 : vector<128x32xf32>
    %c0_10 = arith.constant 0 : index
    %c0_11 = arith.constant 0 : index
    %26 = vector.load %arg3[%c0_10, %c0_11] : memref<256x128xf32, #tpu.memory_space<vmem>>, vector<32x128xf32>
    %c0_12 = arith.constant 0 : index
    %c0_13 = arith.constant 0 : index
    %27 = vector.load %arg4[%c0_12, %c0_13] : memref<8x128xf32, #tpu.memory_space<vmem>>, vector<1x128xf32>
    %cst_14 = arith.constant dense<0.000000e+00> : vector<128x128xf32>
    %28 = tpu.matmul %25, %26, %cst_14 {dimension_numbers = #tpu.dot_dimension_numbers<[1], [0], [0], [1], [0, 0, 1, 1], [], []>} : vector<128x32xf32>, vector<32x128xf32>, vector<128x128xf32> -> vector<128x128xf32>
    %29 = vector.broadcast %27 : vector<1x128xf32> to vector<128x128xf32>
    %30 = arith.addf %28, %29 : vector<128x128xf32>
    %c0_15 = arith.constant 0 : index
    %c0_16 = arith.constant 0 : index
    %31 = vector.load %arg7[%c0_15, %c0_16] : memref<128x128xf32, #tpu.memory_space<vmem>>, vector<128x128xf32>
    tpu.vector_store %arg7[%c0_15, %c0_16], %30 {strides = array<i32>} : memref<128x128xf32, #tpu.memory_space<vmem>>, vector<128x128xf32>,
    %c32 = arith.constant 32 : index
    %c0_17 = arith.constant 0 : index
    %32 = vector.load %arg3[%c32, %c0_17] : memref<256x128xf32, #tpu.memory_space<vmem>>, vector<32x128xf32>
    %c64 = arith.constant 64 : index
    %c0_18 = arith.constant 0 : index
    %33 = vector.load %arg3[%c64, %c0_18] : memref<256x128xf32, #tpu.memory_space<vmem>>, vector<32x128xf32>
    %c96 = arith.constant 96 : index
    %c0_19 = arith.constant 0 : index
    %34 = vector.load %arg3[%c96, %c0_19] : memref<256x128xf32, #tpu.memory_space<vmem>>, vector<32x128xf32>
    %c1 = arith.constant 1 : index
    %c0_20 = arith.constant 0 : index
    %35 = vector.load %arg4[%c1, %c0_20] : memref<8x128xf32, #tpu.memory_space<vmem>>, vector<1x128xf32>
    %c0_21 = arith.constant 0 : index
    %c0_22 = arith.constant 0 : index
    %c0_23 = arith.constant 0 : index
    %36 = vector.load %arg2[%c0_21, %c0_22, %c0_23] : memref<1x8x128xf32, #tpu.memory_space<vmem>>, vector<1x8x128xf32>
    %37 = vector.shape_cast %36 : vector<1x8x128xf32> to vector<8x128xf32>
    %38 = vector.extract_strided_slice %37 {offsets = [0, 0], sizes = [8, 32], strides = [1, 1]} : vector<8x128xf32> to vector<8x32xf32>
    %39 = vector.extract_strided_slice %37 {offsets = [0, 32], sizes = [8, 32], strides = [1, 1]} : vector<8x128xf32> to vector<8x32xf32>
    %40 = vector.extract_strided_slice %37 {offsets = [0, 64], sizes = [8, 32], strides = [1, 1]} : vector<8x128xf32> to vector<8x32xf32>
    %41 = vector.extract_strided_slice %37 {offsets = [0, 96], sizes = [8, 32], strides = [1, 1]} : vector<8x128xf32> to vector<8x32xf32>
    %c0_i32 = arith.constant 0 : i32
    %c8_i32 = arith.constant 8 : i32
    %42 = arith.muli %c0_i32, %c8_i32 : i32
    %cst_24 = arith.constant dense<0.000000e+00> : vector<8x128xf32>
    %43 = tpu.matmul %40, %34, %cst_24 {dimension_numbers = #tpu.dot_dimension_numbers<[1], [0], [0], [1], [0, 0, 1, 1], [], []>} : vector<8x32xf32>, vector<32x128xf32>, vector<8x128xf32> -> vector<8x128xf32>
    %44 = arith.index_cast %42 : i32 to index
    %c0_25 = arith.constant 0 : index
    %45 = vector.load %arg7[%44, %c0_25] : memref<128x128xf32, #tpu.memory_space<vmem>>, vector<8x128xf32>
    %cst_26 = arith.constant dense<0.000000e+00> : vector<8x128xf32>
    %46 = tpu.matmul %38, %32, %cst_26 {dimension_numbers = #tpu.dot_dimension_numbers<[1], [0], [0], [1], [0, 0, 1, 1], [], []>} : vector<8x32xf32>, vector<32x128xf32>, vector<8x128xf32> -> vector<8x128xf32>
    %47 = arith.addf %45, %46 : vector<8x128xf32>
    %48 = arith.negf %47 : vector<8x128xf32>
    %49 = math.exp %48 : vector<8x128xf32>
    %cst_27 = arith.constant 1.000000e+00 : f32
    %50 = vector.broadcast %cst_27 : f32 to vector<8x128xf32>
    %51 = arith.addf %50, %49 : vector<8x128xf32>
    %52 = arith.divf %50, %51 : vector<8x128xf32>
    %53 = vector.extract_strided_slice %52 {offsets = [0, 0], sizes = [8, 32], strides = [1, 1]} : vector<8x128xf32> to vector<8x32xf32>
    %54 = vector.extract_strided_slice %52 {offsets = [0, 32], sizes = [8, 32], strides = [1, 1]} : vector<8x128xf32> to vector<8x32xf32>
    %55 = vector.extract_strided_slice %52 {offsets = [0, 96], sizes = [8, 32], strides = [1, 1]} : vector<8x128xf32> to vector<8x32xf32>
    %56 = vector.extract_strided_slice %47 {offsets = [0, 64], sizes = [8, 32], strides = [1, 1]} : vector<8x128xf32> to vector<8x32xf32>
    %57 = math.tanh %56 : vector<8x32xf32>
    %58 = arith.mulf %54, %39 : vector<8x32xf32>
    %59 = arith.mulf %53, %57 : vector<8x32xf32>
    %60 = arith.addf %58, %59 : vector<8x32xf32>
    %61 = math.tanh %60 : vector<8x32xf32>
    %62 = arith.mulf %55, %61 : vector<8x32xf32>
    %cst_28 = arith.constant dense<0.000000e+00> : vector<8x128xf32>
    %63 = tpu.matmul %62, %33, %cst_28 {dimension_numbers = #tpu.dot_dimension_numbers<[1], [0], [0], [1], [0, 0, 1, 1], [], []>} : vector<8x32xf32>, vector<32x128xf32>, vector<8x128xf32> -> vector<8x128xf32>
    %64 = arith.addf %63, %43 : vector<8x128xf32>
    %65 = vector.broadcast %35 : vector<1x128xf32> to vector<8x128xf32>
    %66 = arith.addf %64, %65 : vector<8x128xf32>
    %67 = arith.negf %66 : vector<8x128xf32>
    %68 = math.exp %67 : vector<8x128xf32>
    %cst_29 = arith.constant 1.000000e+00 : f32
    %69 = vector.broadcast %cst_29 : f32 to vector<8x128xf32>
    %70 = arith.addf %69, %68 : vector<8x128xf32>
    %71 = arith.divf %69, %70 : vector<8x128xf32>
    %72 = vector.extract_strided_slice %71 {offsets = [0, 0], sizes = [8, 32], strides = [1, 1]} : vector<8x128xf32> to vector<8x32xf32>
    %73 = vector.extract_strided_slice %71 {offsets = [0, 32], sizes = [8, 32], strides = [1, 1]} : vector<8x128xf32> to vector<8x32xf32>
    %74 = vector.extract_strided_slice %71 {offsets = [0, 96], sizes = [8, 32], strides = [1, 1]} : vector<8x128xf32> to vector<8x32xf32>
    %75 = vector.extract_strided_slice %66 {offsets = [0, 64], sizes = [8, 32], strides = [1, 1]} : vector<8x128xf32> to vector<8x32xf32>
    %76 = math.tanh %75 : vector<8x32xf32>
    %77 = arith.mulf %73, %41 : vector<8x32xf32>
    %78 = arith.mulf %72, %76 : vector<8x32xf32>
    %79 = arith.addf %77, %78 : vector<8x32xf32>
    %80 = math.tanh %79 : vector<8x32xf32>
    %81 = arith.mulf %74, %80 : vector<8x32xf32>
    %82 = arith.index_cast %42 : i32 to index
    %c0_30 = arith.constant 0 : index
    %83 = vector.load %arg8[%82, %c0_30] : memref<128x32xf32, #tpu.memory_space<vmem>>, vector<8x32xf32>
    tpu.vector_store %arg8[%82, %c0_30], %81 {strides = array<i32>} : memref<128x32xf32, #tpu.memory_space<vmem>>, vector<8x32xf32>,
    %c1_i32 = arith.constant 1 : i32
    %c8_i32_31 = arith.constant 8 : i32
    %84 = arith.muli %c1_i32, %c8_i32_31 : i32
    %cst_32 = arith.constant dense<0.000000e+00> : vector<8x128xf32>
    %85 = tpu.matmul %81, %34, %cst_32 {dimension_numbers = #tpu.dot_dimension_numbers<[1], [0], [0], [1], [0, 0, 1, 1], [], []>} : vector<8x32xf32>, vector<32x128xf32>, vector<8x128xf32> -> vector<8x128xf32>
    %86 = arith.index_cast %84 : i32 to index
    %c0_33 = arith.constant 0 : index
    %87 = vector.load %arg7[%86, %c0_33] : memref<128x128xf32, #tpu.memory_space<vmem>>, vector<8x128xf32>
    %cst_34 = arith.constant dense<0.000000e+00> : vector<8x128xf32>
    %88 = tpu.matmul %62, %32, %cst_34 {dimension_numbers = #tpu.dot_dimension_numbers<[1], [0], [0], [1], [0, 0, 1, 1], [], []>} : vector<8x32xf32>, vector<32x128xf32>, vector<8x128xf32> -> vector<8x128xf32>
    %89 = arith.addf %87, %88 : vector<8x128xf32>
    %90 = arith.negf %89 : vector<8x128xf32>
    %91 = math.exp %90 : vector<8x128xf32>
    %cst_35 = arith.constant 1.000000e+00 : f32
    %92 = vector.broadcast %cst_35 : f32 to vector<8x128xf32>
    %93 = arith.addf %92, %91 : vector<8x128xf32>
    %94 = arith.divf %92, %93 : vector<8x128xf32>
    %95 = vector.extract_strided_slice %94 {offsets = [0, 0], sizes = [8, 32], strides = [1, 1]} : vector<8x128xf32> to vector<8x32xf32>
    %96 = vector.extract_strided_slice %94 {offsets = [0, 32], sizes = [8, 32], strides = [1, 1]} : vector<8x128xf32> to vector<8x32xf32>
    %97 = vector.extract_strided_slice %94 {offsets = [0, 96], sizes = [8, 32], strides = [1, 1]} : vector<8x128xf32> to vector<8x32xf32>
    %98 = vector.extract_strided_slice %89 {offsets = [0, 64], sizes = [8, 32], strides = [1, 1]} : vector<8x128xf32> to vector<8x32xf32>
    %99 = math.tanh %98 : vector<8x32xf32>
    %100 = arith.mulf %96, %60 : vector<8x32xf32>
    %101 = arith.mulf %95, %99 : vector<8x32xf32>
    %102 = arith.addf %100, %101 : vector<8x32xf32>
    %103 = math.tanh %102 : vector<8x32xf32>
    %104 = arith.mulf %97, %103 : vector<8x32xf32>
    %cst_36 = arith.constant dense<0.000000e+00> : vector<8x128xf32>
    %105 = tpu.matmul %104, %33, %cst_36 {dimension_numbers = #tpu.dot_dimension_numbers<[1], [0], [0], [1], [0, 0, 1, 1], [], []>} : vector<8x32xf32>, vector<32x128xf32>, vector<8x128xf32> -> vector<8x128xf32>
    %106 = arith.addf %105, %85 : vector<8x128xf32>
    %107 = vector.broadcast %35 : vector<1x128xf32> to vector<8x128xf32>
    %108 = arith.addf %106, %107 : vector<8x128xf32>
    %109 = arith.negf %108 : vector<8x128xf32>
    %110 = math.exp %109 : vector<8x128xf32>
    %cst_37 = arith.constant 1.000000e+00 : f32
    %111 = vector.broadcast %cst_37 : f32 to vector<8x128xf32>
    %112 = arith.addf %111, %110 : vector<8x128xf32>
    %113 = arith.divf %111, %112 : vector<8x128xf32>
    %114 = vector.extract_strided_slice %113 {offsets = [0, 0], sizes = [8, 32], strides = [1, 1]} : vector<8x128xf32> to vector<8x32xf32>
    %115 = vector.extract_strided_slice %113 {offsets = [0, 32], sizes = [8, 32], strides = [1, 1]} : vector<8x128xf32> to vector<8x32xf32>
    %116 = vector.extract_strided_slice %113 {offsets = [0, 96], sizes = [8, 32], strides = [1, 1]} : vector<8x128xf32> to vector<8x32xf32>
    %117 = vector.extract_strided_slice %108 {offsets = [0, 64], sizes = [8, 32], strides = [1, 1]} : vector<8x128xf32> to vector<8x32xf32>
    %118 = math.tanh %117 : vector<8x32xf32>
    %119 = arith.mulf %115, %79 : vector<8x32xf32>
    %120 = arith.mulf %114, %118 : vector<8x32xf32>
    %121 = arith.addf %119, %120 : vector<8x32xf32>
    %122 = math.tanh %121 : vector<8x32xf32>
    %123 = arith.mulf %116, %122 : vector<8x32xf32>
    %124 = arith.index_cast %84 : i32 to index
    %c0_38 = arith.constant 0 : index
    %125 = vector.load %arg8[%124, %c0_38] : memref<128x32xf32, #tpu.memory_space<vmem>>, vector<8x32xf32>
    tpu.vector_store %arg8[%124, %c0_38], %123 {strides = array<i32>} : memref<128x32xf32, #tpu.memory_space<vmem>>, vector<8x32xf32>,
    %c2_i32 = arith.constant 2 : i32
    %c8_i32_39 = arith.constant 8 : i32
    %126 = arith.muli %c2_i32, %c8_i32_39 : i32
    %cst_40 = arith.constant dense<0.000000e+00> : vector<8x128xf32>
    %127 = tpu.matmul %123, %34, %cst_40 {dimension_numbers = #tpu.dot_dimension_numbers<[1], [0], [0], [1], [0, 0, 1, 1], [], []>} : vector<8x32xf32>, vector<32x128xf32>, vector<8x128xf32> -> vector<8x128xf32>
    %128 = arith.index_cast %126 : i32 to index
    %c0_41 = arith.constant 0 : index
    %129 = vector.load %arg7[%128, %c0_41] : memref<128x128xf32, #tpu.memory_space<vmem>>, vector<8x128xf32>
    %cst_42 = arith.constant dense<0.000000e+00> : vector<8x128xf32>
    %130 = tpu.matmul %104, %32, %cst_42 {dimension_numbers = #tpu.dot_dimension_numbers<[1], [0], [0], [1], [0, 0, 1, 1], [], []>} : vector<8x32xf32>, vector<32x128xf32>, vector<8x128xf32> -> vector<8x128xf32>
    %131 = arith.addf %129, %130 : vector<8x128xf32>
    %132 = arith.negf %131 : vector<8x128xf32>
    %133 = math.exp %132 : vector<8x128xf32>
    %cst_43 = arith.constant 1.000000e+00 : f32
    %134 = vector.broadcast %cst_43 : f32 to vector<8x128xf32>
    %135 = arith.addf %134, %133 : vector<8x128xf32>
    %136 = arith.divf %134, %135 : vector<8x128xf32>
    %137 = vector.extract_strided_slice %136 {offsets = [0, 0], sizes = [8, 32], strides = [1, 1]} : vector<8x128xf32> to vector<8x32xf32>
    %138 = vector.extract_strided_slice %136 {offsets = [0, 32], sizes = [8, 32], strides = [1, 1]} : vector<8x128xf32> to vector<8x32xf32>
    %139 = vector.extract_strided_slice %136 {offsets = [0, 96], sizes = [8, 32], strides = [1, 1]} : vector<8x128xf32> to vector<8x32xf32>
    %140 = vector.extract_strided_slice %131 {offsets = [0, 64], sizes = [8, 32], strides = [1, 1]} : vector<8x128xf32> to vector<8x32xf32>
    %141 = math.tanh %140 : vector<8x32xf32>
    %142 = arith.mulf %138, %102 : vector<8x32xf32>
    %143 = arith.mulf %137, %141 : vector<8x32xf32>
    %144 = arith.addf %142, %143 : vector<8x32xf32>
    %145 = math.tanh %144 : vector<8x32xf32>
    %146 = arith.mulf %139, %145 : vector<8x32xf32>
    %cst_44 = arith.constant dense<0.000000e+00> : vector<8x128xf32>
    %147 = tpu.matmul %146, %33, %cst_44 {dimension_numbers = #tpu.dot_dimension_numbers<[1], [0], [0], [1], [0, 0, 1, 1], [], []>} : vector<8x32xf32>, vector<32x128xf32>, vector<8x128xf32> -> vector<8x128xf32>
    %148 = arith.addf %147, %127 : vector<8x128xf32>
    %149 = vector.broadcast %35 : vector<1x128xf32> to vector<8x128xf32>
    %150 = arith.addf %148, %149 : vector<8x128xf32>
    %151 = arith.negf %150 : vector<8x128xf32>
    %152 = math.exp %151 : vector<8x128xf32>
    %cst_45 = arith.constant 1.000000e+00 : f32
    %153 = vector.broadcast %cst_45 : f32 to vector<8x128xf32>
    %154 = arith.addf %153, %152 : vector<8x128xf32>
    %155 = arith.divf %153, %154 : vector<8x128xf32>
    %156 = vector.extract_strided_slice %155 {offsets = [0, 0], sizes = [8, 32], strides = [1, 1]} : vector<8x128xf32> to vector<8x32xf32>
    %157 = vector.extract_strided_slice %155 {offsets = [0, 32], sizes = [8, 32], strides = [1, 1]} : vector<8x128xf32> to vector<8x32xf32>
    %158 = vector.extract_strided_slice %155 {offsets = [0, 96], sizes = [8, 32], strides = [1, 1]} : vector<8x128xf32> to vector<8x32xf32>
    %159 = vector.extract_strided_slice %150 {offsets = [0, 64], sizes = [8, 32], strides = [1, 1]} : vector<8x128xf32> to vector<8x32xf32>
    %160 = math.tanh %159 : vector<8x32xf32>
    %161 = arith.mulf %157, %121 : vector<8x32xf32>
    %162 = arith.mulf %156, %160 : vector<8x32xf32>
    %163 = arith.addf %161, %162 : vector<8x32xf32>
    %164 = math.tanh %163 : vector<8x32xf32>
    %165 = arith.mulf %158, %164 : vector<8x32xf32>
    %166 = arith.index_cast %126 : i32 to index
    %c0_46 = arith.constant 0 : index
    %167 = vector.load %arg8[%166, %c0_46] : memref<128x32xf32, #tpu.memory_space<vmem>>, vector<8x32xf32>
    tpu.vector_store %arg8[%166, %c0_46], %165 {strides = array<i32>} : memref<128x32xf32, #tpu.memory_space<vmem>>, vector<8x32xf32>,
    %c3_i32 = arith.constant 3 : i32
    %c8_i32_47 = arith.constant 8 : i32
    %168 = arith.muli %c3_i32, %c8_i32_47 : i32
    %cst_48 = arith.constant dense<0.000000e+00> : vector<8x128xf32>
    %169 = tpu.matmul %165, %34, %cst_48 {dimension_numbers = #tpu.dot_dimension_numbers<[1], [0], [0], [1], [0, 0, 1, 1], [], []>} : vector<8x32xf32>, vector<32x128xf32>, vector<8x128xf32> -> vector<8x128xf32>
    %170 = arith.index_cast %168 : i32 to index
    %c0_49 = arith.constant 0 : index
    %171 = vector.load %arg7[%170, %c0_49] : memref<128x128xf32, #tpu.memory_space<vmem>>, vector<8x128xf32>
    %cst_50 = arith.constant dense<0.000000e+00> : vector<8x128xf32>
    %172 = tpu.matmul %146, %32, %cst_50 {dimension_numbers = #tpu.dot_dimension_numbers<[1], [0], [0], [1], [0, 0, 1, 1], [], []>} : vector<8x32xf32>, vector<32x128xf32>, vector<8x128xf32> -> vector<8x128xf32>
    %173 = arith.addf %171, %172 : vector<8x128xf32>
    %174 = arith.negf %173 : vector<8x128xf32>
    %175 = math.exp %174 : vector<8x128xf32>
    %cst_51 = arith.constant 1.000000e+00 : f32
    %176 = vector.broadcast %cst_51 : f32 to vector<8x128xf32>
    %177 = arith.addf %176, %175 : vector<8x128xf32>
    %178 = arith.divf %176, %177 : vector<8x128xf32>
    %179 = vector.extract_strided_slice %178 {offsets = [0, 0], sizes = [8, 32], strides = [1, 1]} : vector<8x128xf32> to vector<8x32xf32>
    %180 = vector.extract_strided_slice %178 {offsets = [0, 32], sizes = [8, 32], strides = [1, 1]} : vector<8x128xf32> to vector<8x32xf32>
    %181 = vector.extract_strided_slice %178 {offsets = [0, 96], sizes = [8, 32], strides = [1, 1]} : vector<8x128xf32> to vector<8x32xf32>
    %182 = vector.extract_strided_slice %173 {offsets = [0, 64], sizes = [8, 32], strides = [1, 1]} : vector<8x128xf32> to vector<8x32xf32>
    %183 = math.tanh %182 : vector<8x32xf32>
    %184 = arith.mulf %180, %144 : vector<8x32xf32>
    %185 = arith.mulf %179, %183 : vector<8x32xf32>
    %186 = arith.addf %184, %185 : vector<8x32xf32>
    %187 = math.tanh %186 : vector<8x32xf32>
    %188 = arith.mulf %181, %187 : vector<8x32xf32>
    %cst_52 = arith.constant dense<0.000000e+00> : vector<8x128xf32>
    %189 = tpu.matmul %188, %33, %cst_52 {dimension_numbers = #tpu.dot_dimension_numbers<[1], [0], [0], [1], [0, 0, 1, 1], [], []>} : vector<8x32xf32>, vector<32x128xf32>, vector<8x128xf32> -> vector<8x128xf32>
    %190 = arith.addf %189, %169 : vector<8x128xf32>
    %191 = vector.broadcast %35 : vector<1x128xf32> to vector<8x128xf32>
    %192 = arith.addf %190, %191 : vector<8x128xf32>
    %193 = arith.negf %192 : vector<8x128xf32>
    %194 = math.exp %193 : vector<8x128xf32>
    %cst_53 = arith.constant 1.000000e+00 : f32
    %195 = vector.broadcast %cst_53 : f32 to vector<8x128xf32>
    %196 = arith.addf %195, %194 : vector<8x128xf32>
    %197 = arith.divf %195, %196 : vector<8x128xf32>
    %198 = vector.extract_strided_slice %197 {offsets = [0, 0], sizes = [8, 32], strides = [1, 1]} : vector<8x128xf32> to vector<8x32xf32>
    %199 = vector.extract_strided_slice %197 {offsets = [0, 32], sizes = [8, 32], strides = [1, 1]} : vector<8x128xf32> to vector<8x32xf32>
    %200 = vector.extract_strided_slice %197 {offsets = [0, 96], sizes = [8, 32], strides = [1, 1]} : vector<8x128xf32> to vector<8x32xf32>
    %201 = vector.extract_strided_slice %192 {offsets = [0, 64], sizes = [8, 32], strides = [1, 1]} : vector<8x128xf32> to vector<8x32xf32>
    %202 = math.tanh %201 : vector<8x32xf32>
    %203 = arith.mulf %199, %163 : vector<8x32xf32>
    %204 = arith.mulf %198, %202 : vector<8x32xf32>
    %205 = arith.addf %203, %204 : vector<8x32xf32>
    %206 = math.tanh %205 : vector<8x32xf32>
    %207 = arith.mulf %200, %206 : vector<8x32xf32>
    %208 = arith.index_cast %168 : i32 to index
    %c0_54 = arith.constant 0 : index
    %209 = vector.load %arg8[%208, %c0_54] : memref<128x32xf32, #tpu.memory_space<vmem>>, vector<8x32xf32>
    tpu.vector_store %arg8[%208, %c0_54], %207 {strides = array<i32>} : memref<128x32xf32, #tpu.memory_space<vmem>>, vector<8x32xf32>,
    %c4_i32 = arith.constant 4 : i32
    %c8_i32_55 = arith.constant 8 : i32
    %210 = arith.muli %c4_i32, %c8_i32_55 : i32
    %cst_56 = arith.constant dense<0.000000e+00> : vector<8x128xf32>
    %211 = tpu.matmul %207, %34, %cst_56 {dimension_numbers = #tpu.dot_dimension_numbers<[1], [0], [0], [1], [0, 0, 1, 1], [], []>} : vector<8x32xf32>, vector<32x128xf32>, vector<8x128xf32> -> vector<8x128xf32>
    %212 = arith.index_cast %210 : i32 to index
    %c0_57 = arith.constant 0 : index
    %213 = vector.load %arg7[%212, %c0_57] : memref<128x128xf32, #tpu.memory_space<vmem>>, vector<8x128xf32>
    %cst_58 = arith.constant dense<0.000000e+00> : vector<8x128xf32>
    %214 = tpu.matmul %188, %32, %cst_58 {dimension_numbers = #tpu.dot_dimension_numbers<[1], [0], [0], [1], [0, 0, 1, 1], [], []>} : vector<8x32xf32>, vector<32x128xf32>, vector<8x128xf32> -> vector<8x128xf32>
    %215 = arith.addf %213, %214 : vector<8x128xf32>
    %216 = arith.negf %215 : vector<8x128xf32>
    %217 = math.exp %216 : vector<8x128xf32>
    %cst_59 = arith.constant 1.000000e+00 : f32
    %218 = vector.broadcast %cst_59 : f32 to vector<8x128xf32>
    %219 = arith.addf %218, %217 : vector<8x128xf32>
    %220 = arith.divf %218, %219 : vector<8x128xf32>
    %221 = vector.extract_strided_slice %220 {offsets = [0, 0], sizes = [8, 32], strides = [1, 1]} : vector<8x128xf32> to vector<8x32xf32>
    %222 = vector.extract_strided_slice %220 {offsets = [0, 32], sizes = [8, 32], strides = [1, 1]} : vector<8x128xf32> to vector<8x32xf32>
    %223 = vector.extract_strided_slice %220 {offsets = [0, 96], sizes = [8, 32], strides = [1, 1]} : vector<8x128xf32> to vector<8x32xf32>
    %224 = vector.extract_strided_slice %215 {offsets = [0, 64], sizes = [8, 32], strides = [1, 1]} : vector<8x128xf32> to vector<8x32xf32>
    %225 = math.tanh %224 : vector<8x32xf32>
    %226 = arith.mulf %222, %186 : vector<8x32xf32>
    %227 = arith.mulf %221, %225 : vector<8x32xf32>
    %228 = arith.addf %226, %227 : vector<8x32xf32>
    %229 = math.tanh %228 : vector<8x32xf32>
    %230 = arith.mulf %223, %229 : vector<8x32xf32>
    %cst_60 = arith.constant dense<0.000000e+00> : vector<8x128xf32>
    %231 = tpu.matmul %230, %33, %cst_60 {dimension_numbers = #tpu.dot_dimension_numbers<[1], [0], [0], [1], [0, 0, 1, 1], [], []>} : vector<8x32xf32>, vector<32x128xf32>, vector<8x128xf32> -> vector<8x128xf32>
    %232 = arith.addf %231, %211 : vector<8x128xf32>
    %233 = vector.broadcast %35 : vector<1x128xf32> to vector<8x128xf32>
    %234 = arith.addf %232, %233 : vector<8x128xf32>
    %235 = arith.negf %234 : vector<8x128xf32>
    %236 = math.exp %235 : vector<8x128xf32>
    %cst_61 = arith.constant 1.000000e+00 : f32
    %237 = vector.broadcast %cst_61 : f32 to vector<8x128xf32>
    %238 = arith.addf %237, %236 : vector<8x128xf32>
    %239 = arith.divf %237, %238 : vector<8x128xf32>
    %240 = vector.extract_strided_slice %239 {offsets = [0, 0], sizes = [8, 32], strides = [1, 1]} : vector<8x128xf32> to vector<8x32xf32>
    %241 = vector.extract_strided_slice %239 {offsets = [0, 32], sizes = [8, 32], strides = [1, 1]} : vector<8x128xf32> to vector<8x32xf32>
    %242 = vector.extract_strided_slice %239 {offsets = [0, 96], sizes = [8, 32], strides = [1, 1]} : vector<8x128xf32> to vector<8x32xf32>
    %243 = vector.extract_strided_slice %234 {offsets = [0, 64], sizes = [8, 32], strides = [1, 1]} : vector<8x128xf32> to vector<8x32xf32>
    %244 = math.tanh %243 : vector<8x32xf32>
    %245 = arith.mulf %241, %205 : vector<8x32xf32>
    %246 = arith.mulf %240, %244 : vector<8x32xf32>
    %247 = arith.addf %245, %246 : vector<8x32xf32>
    %248 = math.tanh %247 : vector<8x32xf32>
    %249 = arith.mulf %242, %248 : vector<8x32xf32>
    %250 = arith.index_cast %210 : i32 to index
    %c0_62 = arith.constant 0 : index
    %251 = vector.load %arg8[%250, %c0_62] : memref<128x32xf32, #tpu.memory_space<vmem>>, vector<8x32xf32>
    tpu.vector_store %arg8[%250, %c0_62], %249 {strides = array<i32>} : memref<128x32xf32, #tpu.memory_space<vmem>>, vector<8x32xf32>,
    %c5_i32 = arith.constant 5 : i32
    %c8_i32_63 = arith.constant 8 : i32
    %252 = arith.muli %c5_i32, %c8_i32_63 : i32
    %cst_64 = arith.constant dense<0.000000e+00> : vector<8x128xf32>
    %253 = tpu.matmul %249, %34, %cst_64 {dimension_numbers = #tpu.dot_dimension_numbers<[1], [0], [0], [1], [0, 0, 1, 1], [], []>} : vector<8x32xf32>, vector<32x128xf32>, vector<8x128xf32> -> vector<8x128xf32>
    %254 = arith.index_cast %252 : i32 to index
    %c0_65 = arith.constant 0 : index
    %255 = vector.load %arg7[%254, %c0_65] : memref<128x128xf32, #tpu.memory_space<vmem>>, vector<8x128xf32>
    %cst_66 = arith.constant dense<0.000000e+00> : vector<8x128xf32>
    %256 = tpu.matmul %230, %32, %cst_66 {dimension_numbers = #tpu.dot_dimension_numbers<[1], [0], [0], [1], [0, 0, 1, 1], [], []>} : vector<8x32xf32>, vector<32x128xf32>, vector<8x128xf32> -> vector<8x128xf32>
    %257 = arith.addf %255, %256 : vector<8x128xf32>
    %258 = arith.negf %257 : vector<8x128xf32>
    %259 = math.exp %258 : vector<8x128xf32>
    %cst_67 = arith.constant 1.000000e+00 : f32
    %260 = vector.broadcast %cst_67 : f32 to vector<8x128xf32>
    %261 = arith.addf %260, %259 : vector<8x128xf32>
    %262 = arith.divf %260, %261 : vector<8x128xf32>
    %263 = vector.extract_strided_slice %262 {offsets = [0, 0], sizes = [8, 32], strides = [1, 1]} : vector<8x128xf32> to vector<8x32xf32>
    %264 = vector.extract_strided_slice %262 {offsets = [0, 32], sizes = [8, 32], strides = [1, 1]} : vector<8x128xf32> to vector<8x32xf32>
    %265 = vector.extract_strided_slice %262 {offsets = [0, 96], sizes = [8, 32], strides = [1, 1]} : vector<8x128xf32> to vector<8x32xf32>
    %266 = vector.extract_strided_slice %257 {offsets = [0, 64], sizes = [8, 32], strides = [1, 1]} : vector<8x128xf32> to vector<8x32xf32>
    %267 = math.tanh %266 : vector<8x32xf32>
    %268 = arith.mulf %264, %228 : vector<8x32xf32>
    %269 = arith.mulf %263, %267 : vector<8x32xf32>
    %270 = arith.addf %268, %269 : vector<8x32xf32>
    %271 = math.tanh %270 : vector<8x32xf32>
    %272 = arith.mulf %265, %271 : vector<8x32xf32>
    %cst_68 = arith.constant dense<0.000000e+00> : vector<8x128xf32>
    %273 = tpu.matmul %272, %33, %cst_68 {dimension_numbers = #tpu.dot_dimension_numbers<[1], [0], [0], [1], [0, 0, 1, 1], [], []>} : vector<8x32xf32>, vector<32x128xf32>, vector<8x128xf32> -> vector<8x128xf32>
    %274 = arith.addf %273, %253 : vector<8x128xf32>
    %275 = vector.broadcast %35 : vector<1x128xf32> to vector<8x128xf32>
    %276 = arith.addf %274, %275 : vector<8x128xf32>
    %277 = arith.negf %276 : vector<8x128xf32>
    %278 = math.exp %277 : vector<8x128xf32>
    %cst_69 = arith.constant 1.000000e+00 : f32
    %279 = vector.broadcast %cst_69 : f32 to vector<8x128xf32>
    %280 = arith.addf %279, %278 : vector<8x128xf32>
    %281 = arith.divf %279, %280 : vector<8x128xf32>
    %282 = vector.extract_strided_slice %281 {offsets = [0, 0], sizes = [8, 32], strides = [1, 1]} : vector<8x128xf32> to vector<8x32xf32>
    %283 = vector.extract_strided_slice %281 {offsets = [0, 32], sizes = [8, 32], strides = [1, 1]} : vector<8x128xf32> to vector<8x32xf32>
    %284 = vector.extract_strided_slice %281 {offsets = [0, 96], sizes = [8, 32], strides = [1, 1]} : vector<8x128xf32> to vector<8x32xf32>
    %285 = vector.extract_strided_slice %276 {offsets = [0, 64], sizes = [8, 32], strides = [1, 1]} : vector<8x128xf32> to vector<8x32xf32>
    %286 = math.tanh %285 : vector<8x32xf32>
    %287 = arith.mulf %283, %247 : vector<8x32xf32>
    %288 = arith.mulf %282, %286 : vector<8x32xf32>
    %289 = arith.addf %287, %288 : vector<8x32xf32>
    %290 = math.tanh %289 : vector<8x32xf32>
    %291 = arith.mulf %284, %290 : vector<8x32xf32>
    %292 = arith.index_cast %252 : i32 to index
    %c0_70 = arith.constant 0 : index
    %293 = vector.load %arg8[%292, %c0_70] : memref<128x32xf32, #tpu.memory_space<vmem>>, vector<8x32xf32>
    tpu.vector_store %arg8[%292, %c0_70], %291 {strides = array<i32>} : memref<128x32xf32, #tpu.memory_space<vmem>>, vector<8x32xf32>,
    %c6_i32 = arith.constant 6 : i32
    %c8_i32_71 = arith.constant 8 : i32
    %294 = arith.muli %c6_i32, %c8_i32_71 : i32
    %cst_72 = arith.constant dense<0.000000e+00> : vector<8x128xf32>
    %295 = tpu.matmul %291, %34, %cst_72 {dimension_numbers = #tpu.dot_dimension_numbers<[1], [0], [0], [1], [0, 0, 1, 1], [], []>} : vector<8x32xf32>, vector<32x128xf32>, vector<8x128xf32> -> vector<8x128xf32>
    %296 = arith.index_cast %294 : i32 to index
    %c0_73 = arith.constant 0 : index
    %297 = vector.load %arg7[%296, %c0_73] : memref<128x128xf32, #tpu.memory_space<vmem>>, vector<8x128xf32>
    %cst_74 = arith.constant dense<0.000000e+00> : vector<8x128xf32>
    %298 = tpu.matmul %272, %32, %cst_74 {dimension_numbers = #tpu.dot_dimension_numbers<[1], [0], [0], [1], [0, 0, 1, 1], [], []>} : vector<8x32xf32>, vector<32x128xf32>, vector<8x128xf32> -> vector<8x128xf32>
    %299 = arith.addf %297, %298 : vector<8x128xf32>
    %300 = arith.negf %299 : vector<8x128xf32>
    %301 = math.exp %300 : vector<8x128xf32>
    %cst_75 = arith.constant 1.000000e+00 : f32
    %302 = vector.broadcast %cst_75 : f32 to vector<8x128xf32>
    %303 = arith.addf %302, %301 : vector<8x128xf32>
    %304 = arith.divf %302, %303 : vector<8x128xf32>
    %305 = vector.extract_strided_slice %304 {offsets = [0, 0], sizes = [8, 32], strides = [1, 1]} : vector<8x128xf32> to vector<8x32xf32>
    %306 = vector.extract_strided_slice %304 {offsets = [0, 32], sizes = [8, 32], strides = [1, 1]} : vector<8x128xf32> to vector<8x32xf32>
    %307 = vector.extract_strided_slice %304 {offsets = [0, 96], sizes = [8, 32], strides = [1, 1]} : vector<8x128xf32> to vector<8x32xf32>
    %308 = vector.extract_strided_slice %299 {offsets = [0, 64], sizes = [8, 32], strides = [1, 1]} : vector<8x128xf32> to vector<8x32xf32>
    %309 = math.tanh %308 : vector<8x32xf32>
    %310 = arith.mulf %306, %270 : vector<8x32xf32>
    %311 = arith.mulf %305, %309 : vector<8x32xf32>
    %312 = arith.addf %310, %311 : vector<8x32xf32>
    %313 = math.tanh %312 : vector<8x32xf32>
    %314 = arith.mulf %307, %313 : vector<8x32xf32>
    %cst_76 = arith.constant dense<0.000000e+00> : vector<8x128xf32>
    %315 = tpu.matmul %314, %33, %cst_76 {dimension_numbers = #tpu.dot_dimension_numbers<[1], [0], [0], [1], [0, 0, 1, 1], [], []>} : vector<8x32xf32>, vector<32x128xf32>, vector<8x128xf32> -> vector<8x128xf32>
    %316 = arith.addf %315, %295 : vector<8x128xf32>
    %317 = vector.broadcast %35 : vector<1x128xf32> to vector<8x128xf32>
    %318 = arith.addf %316, %317 : vector<8x128xf32>
    %319 = arith.negf %318 : vector<8x128xf32>
    %320 = math.exp %319 : vector<8x128xf32>
    %cst_77 = arith.constant 1.000000e+00 : f32
    %321 = vector.broadcast %cst_77 : f32 to vector<8x128xf32>
    %322 = arith.addf %321, %320 : vector<8x128xf32>
    %323 = arith.divf %321, %322 : vector<8x128xf32>
    %324 = vector.extract_strided_slice %323 {offsets = [0, 0], sizes = [8, 32], strides = [1, 1]} : vector<8x128xf32> to vector<8x32xf32>
    %325 = vector.extract_strided_slice %323 {offsets = [0, 32], sizes = [8, 32], strides = [1, 1]} : vector<8x128xf32> to vector<8x32xf32>
    %326 = vector.extract_strided_slice %323 {offsets = [0, 96], sizes = [8, 32], strides = [1, 1]} : vector<8x128xf32> to vector<8x32xf32>
    %327 = vector.extract_strided_slice %318 {offsets = [0, 64], sizes = [8, 32], strides = [1, 1]} : vector<8x128xf32> to vector<8x32xf32>
    %328 = math.tanh %327 : vector<8x32xf32>
    %329 = arith.mulf %325, %289 : vector<8x32xf32>
    %330 = arith.mulf %324, %328 : vector<8x32xf32>
    %331 = arith.addf %329, %330 : vector<8x32xf32>
    %332 = math.tanh %331 : vector<8x32xf32>
    %333 = arith.mulf %326, %332 : vector<8x32xf32>
    %334 = arith.index_cast %294 : i32 to index
    %c0_78 = arith.constant 0 : index
    %335 = vector.load %arg8[%334, %c0_78] : memref<128x32xf32, #tpu.memory_space<vmem>>, vector<8x32xf32>
    tpu.vector_store %arg8[%334, %c0_78], %333 {strides = array<i32>} : memref<128x32xf32, #tpu.memory_space<vmem>>, vector<8x32xf32>,
    %c7_i32 = arith.constant 7 : i32
    %c8_i32_79 = arith.constant 8 : i32
    %336 = arith.muli %c7_i32, %c8_i32_79 : i32
    %cst_80 = arith.constant dense<0.000000e+00> : vector<8x128xf32>
    %337 = tpu.matmul %333, %34, %cst_80 {dimension_numbers = #tpu.dot_dimension_numbers<[1], [0], [0], [1], [0, 0, 1, 1], [], []>} : vector<8x32xf32>, vector<32x128xf32>, vector<8x128xf32> -> vector<8x128xf32>
    %338 = arith.index_cast %336 : i32 to index
    %c0_81 = arith.constant 0 : index
    %339 = vector.load %arg7[%338, %c0_81] : memref<128x128xf32, #tpu.memory_space<vmem>>, vector<8x128xf32>
    %cst_82 = arith.constant dense<0.000000e+00> : vector<8x128xf32>
    %340 = tpu.matmul %314, %32, %cst_82 {dimension_numbers = #tpu.dot_dimension_numbers<[1], [0], [0], [1], [0, 0, 1, 1], [], []>} : vector<8x32xf32>, vector<32x128xf32>, vector<8x128xf32> -> vector<8x128xf32>
    %341 = arith.addf %339, %340 : vector<8x128xf32>
    %342 = arith.negf %341 : vector<8x128xf32>
    %343 = math.exp %342 : vector<8x128xf32>
    %cst_83 = arith.constant 1.000000e+00 : f32
    %344 = vector.broadcast %cst_83 : f32 to vector<8x128xf32>
    %345 = arith.addf %344, %343 : vector<8x128xf32>
    %346 = arith.divf %344, %345 : vector<8x128xf32>
    %347 = vector.extract_strided_slice %346 {offsets = [0, 0], sizes = [8, 32], strides = [1, 1]} : vector<8x128xf32> to vector<8x32xf32>
    %348 = vector.extract_strided_slice %346 {offsets = [0, 32], sizes = [8, 32], strides = [1, 1]} : vector<8x128xf32> to vector<8x32xf32>
    %349 = vector.extract_strided_slice %346 {offsets = [0, 96], sizes = [8, 32], strides = [1, 1]} : vector<8x128xf32> to vector<8x32xf32>
    %350 = vector.extract_strided_slice %341 {offsets = [0, 64], sizes = [8, 32], strides = [1, 1]} : vector<8x128xf32> to vector<8x32xf32>
    %351 = math.tanh %350 : vector<8x32xf32>
    %352 = arith.mulf %348, %312 : vector<8x32xf32>
    %353 = arith.mulf %347, %351 : vector<8x32xf32>
    %354 = arith.addf %352, %353 : vector<8x32xf32>
    %355 = math.tanh %354 : vector<8x32xf32>
    %356 = arith.mulf %349, %355 : vector<8x32xf32>
    %cst_84 = arith.constant dense<0.000000e+00> : vector<8x128xf32>
    %357 = tpu.matmul %356, %33, %cst_84 {dimension_numbers = #tpu.dot_dimension_numbers<[1], [0], [0], [1], [0, 0, 1, 1], [], []>} : vector<8x32xf32>, vector<32x128xf32>, vector<8x128xf32> -> vector<8x128xf32>
    %358 = arith.addf %357, %337 : vector<8x128xf32>
    %359 = vector.broadcast %35 : vector<1x128xf32> to vector<8x128xf32>
    %360 = arith.addf %358, %359 : vector<8x128xf32>
    %361 = arith.negf %360 : vector<8x128xf32>
    %362 = math.exp %361 : vector<8x128xf32>
    %cst_85 = arith.constant 1.000000e+00 : f32
    %363 = vector.broadcast %cst_85 : f32 to vector<8x128xf32>
    %364 = arith.addf %363, %362 : vector<8x128xf32>
    %365 = arith.divf %363, %364 : vector<8x128xf32>
    %366 = vector.extract_strided_slice %365 {offsets = [0, 0], sizes = [8, 32], strides = [1, 1]} : vector<8x128xf32> to vector<8x32xf32>
    %367 = vector.extract_strided_slice %365 {offsets = [0, 32], sizes = [8, 32], strides = [1, 1]} : vector<8x128xf32> to vector<8x32xf32>
    %368 = vector.extract_strided_slice %365 {offsets = [0, 96], sizes = [8, 32], strides = [1, 1]} : vector<8x128xf32> to vector<8x32xf32>
    %369 = vector.extract_strided_slice %360 {offsets = [0, 64], sizes = [8, 32], strides = [1, 1]} : vector<8x128xf32> to vector<8x32xf32>
    %370 = math.tanh %369 : vector<8x32xf32>
    %371 = arith.mulf %367, %331 : vector<8x32xf32>
    %372 = arith.mulf %366, %370 : vector<8x32xf32>
    %373 = arith.addf %371, %372 : vector<8x32xf32>
    %374 = math.tanh %373 : vector<8x32xf32>
    %375 = arith.mulf %368, %374 : vector<8x32xf32>
    %376 = arith.index_cast %336 : i32 to index
    %c0_86 = arith.constant 0 : index
    %377 = vector.load %arg8[%376, %c0_86] : memref<128x32xf32, #tpu.memory_space<vmem>>, vector<8x32xf32>
    tpu.vector_store %arg8[%376, %c0_86], %375 {strides = array<i32>} : memref<128x32xf32, #tpu.memory_space<vmem>>, vector<8x32xf32>,
    %c8_i32_87 = arith.constant 8 : i32
    %c8_i32_88 = arith.constant 8 : i32
    %378 = arith.muli %c8_i32_87, %c8_i32_88 : i32
    %cst_89 = arith.constant dense<0.000000e+00> : vector<8x128xf32>
    %379 = tpu.matmul %375, %34, %cst_89 {dimension_numbers = #tpu.dot_dimension_numbers<[1], [0], [0], [1], [0, 0, 1, 1], [], []>} : vector<8x32xf32>, vector<32x128xf32>, vector<8x128xf32> -> vector<8x128xf32>
    %380 = arith.index_cast %378 : i32 to index
    %c0_90 = arith.constant 0 : index
    %381 = vector.load %arg7[%380, %c0_90] : memref<128x128xf32, #tpu.memory_space<vmem>>, vector<8x128xf32>
    %cst_91 = arith.constant dense<0.000000e+00> : vector<8x128xf32>
    %382 = tpu.matmul %356, %32, %cst_91 {dimension_numbers = #tpu.dot_dimension_numbers<[1], [0], [0], [1], [0, 0, 1, 1], [], []>} : vector<8x32xf32>, vector<32x128xf32>, vector<8x128xf32> -> vector<8x128xf32>
    %383 = arith.addf %381, %382 : vector<8x128xf32>
    %384 = arith.negf %383 : vector<8x128xf32>
    %385 = math.exp %384 : vector<8x128xf32>
    %cst_92 = arith.constant 1.000000e+00 : f32
    %386 = vector.broadcast %cst_92 : f32 to vector<8x128xf32>
    %387 = arith.addf %386, %385 : vector<8x128xf32>
    %388 = arith.divf %386, %387 : vector<8x128xf32>
    %389 = vector.extract_strided_slice %388 {offsets = [0, 0], sizes = [8, 32], strides = [1, 1]} : vector<8x128xf32> to vector<8x32xf32>
    %390 = vector.extract_strided_slice %388 {offsets = [0, 32], sizes = [8, 32], strides = [1, 1]} : vector<8x128xf32> to vector<8x32xf32>
    %391 = vector.extract_strided_slice %388 {offsets = [0, 96], sizes = [8, 32], strides = [1, 1]} : vector<8x128xf32> to vector<8x32xf32>
    %392 = vector.extract_strided_slice %383 {offsets = [0, 64], sizes = [8, 32], strides = [1, 1]} : vector<8x128xf32> to vector<8x32xf32>
    %393 = math.tanh %392 : vector<8x32xf32>
    %394 = arith.mulf %390, %354 : vector<8x32xf32>
    %395 = arith.mulf %389, %393 : vector<8x32xf32>
    %396 = arith.addf %394, %395 : vector<8x32xf32>
    %397 = math.tanh %396 : vector<8x32xf32>
    %398 = arith.mulf %391, %397 : vector<8x32xf32>
    %cst_93 = arith.constant dense<0.000000e+00> : vector<8x128xf32>
    %399 = tpu.matmul %398, %33, %cst_93 {dimension_numbers = #tpu.dot_dimension_numbers<[1], [0], [0], [1], [0, 0, 1, 1], [], []>} : vector<8x32xf32>, vector<32x128xf32>, vector<8x128xf32> -> vector<8x128xf32>
    %400 = arith.addf %399, %379 : vector<8x128xf32>
    %401 = vector.broadcast %35 : vector<1x128xf32> to vector<8x128xf32>
    %402 = arith.addf %400, %401 : vector<8x128xf32>
    %403 = arith.negf %402 : vector<8x128xf32>
    %404 = math.exp %403 : vector<8x128xf32>
    %cst_94 = arith.constant 1.000000e+00 : f32
    %405 = vector.broadcast %cst_94 : f32 to vector<8x128xf32>
    %406 = arith.addf %405, %404 : vector<8x128xf32>
    %407 = arith.divf %405, %406 : vector<8x128xf32>
    %408 = vector.extract_strided_slice %407 {offsets = [0, 0], sizes = [8, 32], strides = [1, 1]} : vector<8x128xf32> to vector<8x32xf32>
    %409 = vector.extract_strided_slice %407 {offsets = [0, 32], sizes = [8, 32], strides = [1, 1]} : vector<8x128xf32> to vector<8x32xf32>
    %410 = vector.extract_strided_slice %407 {offsets = [0, 96], sizes = [8, 32], strides = [1, 1]} : vector<8x128xf32> to vector<8x32xf32>
    %411 = vector.extract_strided_slice %402 {offsets = [0, 64], sizes = [8, 32], strides = [1, 1]} : vector<8x128xf32> to vector<8x32xf32>
    %412 = math.tanh %411 : vector<8x32xf32>
    %413 = arith.mulf %409, %373 : vector<8x32xf32>
    %414 = arith.mulf %408, %412 : vector<8x32xf32>
    %415 = arith.addf %413, %414 : vector<8x32xf32>
    %416 = math.tanh %415 : vector<8x32xf32>
    %417 = arith.mulf %410, %416 : vector<8x32xf32>
    %418 = arith.index_cast %378 : i32 to index
    %c0_95 = arith.constant 0 : index
    %419 = vector.load %arg8[%418, %c0_95] : memref<128x32xf32, #tpu.memory_space<vmem>>, vector<8x32xf32>
    tpu.vector_store %arg8[%418, %c0_95], %417 {strides = array<i32>} : memref<128x32xf32, #tpu.memory_space<vmem>>, vector<8x32xf32>,
    %c9_i32 = arith.constant 9 : i32
    %c8_i32_96 = arith.constant 8 : i32
    %420 = arith.muli %c9_i32, %c8_i32_96 : i32
    %cst_97 = arith.constant dense<0.000000e+00> : vector<8x128xf32>
    %421 = tpu.matmul %417, %34, %cst_97 {dimension_numbers = #tpu.dot_dimension_numbers<[1], [0], [0], [1], [0, 0, 1, 1], [], []>} : vector<8x32xf32>, vector<32x128xf32>, vector<8x128xf32> -> vector<8x128xf32>
    %422 = arith.index_cast %420 : i32 to index
    %c0_98 = arith.constant 0 : index
    %423 = vector.load %arg7[%422, %c0_98] : memref<128x128xf32, #tpu.memory_space<vmem>>, vector<8x128xf32>
    %cst_99 = arith.constant dense<0.000000e+00> : vector<8x128xf32>
    %424 = tpu.matmul %398, %32, %cst_99 {dimension_numbers = #tpu.dot_dimension_numbers<[1], [0], [0], [1], [0, 0, 1, 1], [], []>} : vector<8x32xf32>, vector<32x128xf32>, vector<8x128xf32> -> vector<8x128xf32>
    %425 = arith.addf %423, %424 : vector<8x128xf32>
    %426 = arith.negf %425 : vector<8x128xf32>
    %427 = math.exp %426 : vector<8x128xf32>
    %cst_100 = arith.constant 1.000000e+00 : f32
    %428 = vector.broadcast %cst_100 : f32 to vector<8x128xf32>
    %429 = arith.addf %428, %427 : vector<8x128xf32>
    %430 = arith.divf %428, %429 : vector<8x128xf32>
    %431 = vector.extract_strided_slice %430 {offsets = [0, 0], sizes = [8, 32], strides = [1, 1]} : vector<8x128xf32> to vector<8x32xf32>
    %432 = vector.extract_strided_slice %430 {offsets = [0, 32], sizes = [8, 32], strides = [1, 1]} : vector<8x128xf32> to vector<8x32xf32>
    %433 = vector.extract_strided_slice %430 {offsets = [0, 96], sizes = [8, 32], strides = [1, 1]} : vector<8x128xf32> to vector<8x32xf32>
    %434 = vector.extract_strided_slice %425 {offsets = [0, 64], sizes = [8, 32], strides = [1, 1]} : vector<8x128xf32> to vector<8x32xf32>
    %435 = math.tanh %434 : vector<8x32xf32>
    %436 = arith.mulf %432, %396 : vector<8x32xf32>
    %437 = arith.mulf %431, %435 : vector<8x32xf32>
    %438 = arith.addf %436, %437 : vector<8x32xf32>
    %439 = math.tanh %438 : vector<8x32xf32>
    %440 = arith.mulf %433, %439 : vector<8x32xf32>
    %cst_101 = arith.constant dense<0.000000e+00> : vector<8x128xf32>
    %441 = tpu.matmul %440, %33, %cst_101 {dimension_numbers = #tpu.dot_dimension_numbers<[1], [0], [0], [1], [0, 0, 1, 1], [], []>} : vector<8x32xf32>, vector<32x128xf32>, vector<8x128xf32> -> vector<8x128xf32>
    %442 = arith.addf %441, %421 : vector<8x128xf32>
    %443 = vector.broadcast %35 : vector<1x128xf32> to vector<8x128xf32>
    %444 = arith.addf %442, %443 : vector<8x128xf32>
    %445 = arith.negf %444 : vector<8x128xf32>
    %446 = math.exp %445 : vector<8x128xf32>
    %cst_102 = arith.constant 1.000000e+00 : f32
    %447 = vector.broadcast %cst_102 : f32 to vector<8x128xf32>
    %448 = arith.addf %447, %446 : vector<8x128xf32>
    %449 = arith.divf %447, %448 : vector<8x128xf32>
    %450 = vector.extract_strided_slice %449 {offsets = [0, 0], sizes = [8, 32], strides = [1, 1]} : vector<8x128xf32> to vector<8x32xf32>
    %451 = vector.extract_strided_slice %449 {offsets = [0, 32], sizes = [8, 32], strides = [1, 1]} : vector<8x128xf32> to vector<8x32xf32>
    %452 = vector.extract_strided_slice %449 {offsets = [0, 96], sizes = [8, 32], strides = [1, 1]} : vector<8x128xf32> to vector<8x32xf32>
    %453 = vector.extract_strided_slice %444 {offsets = [0, 64], sizes = [8, 32], strides = [1, 1]} : vector<8x128xf32> to vector<8x32xf32>
    %454 = math.tanh %453 : vector<8x32xf32>
    %455 = arith.mulf %451, %415 : vector<8x32xf32>
    %456 = arith.mulf %450, %454 : vector<8x32xf32>
    %457 = arith.addf %455, %456 : vector<8x32xf32>
    %458 = math.tanh %457 : vector<8x32xf32>
    %459 = arith.mulf %452, %458 : vector<8x32xf32>
    %460 = arith.index_cast %420 : i32 to index
    %c0_103 = arith.constant 0 : index
    %461 = vector.load %arg8[%460, %c0_103] : memref<128x32xf32, #tpu.memory_space<vmem>>, vector<8x32xf32>
    tpu.vector_store %arg8[%460, %c0_103], %459 {strides = array<i32>} : memref<128x32xf32, #tpu.memory_space<vmem>>, vector<8x32xf32>,
    %c10_i32 = arith.constant 10 : i32
    %c8_i32_104 = arith.constant 8 : i32
    %462 = arith.muli %c10_i32, %c8_i32_104 : i32
    %cst_105 = arith.constant dense<0.000000e+00> : vector<8x128xf32>
    %463 = tpu.matmul %459, %34, %cst_105 {dimension_numbers = #tpu.dot_dimension_numbers<[1], [0], [0], [1], [0, 0, 1, 1], [], []>} : vector<8x32xf32>, vector<32x128xf32>, vector<8x128xf32> -> vector<8x128xf32>
    %464 = arith.index_cast %462 : i32 to index
    %c0_106 = arith.constant 0 : index
    %465 = vector.load %arg7[%464, %c0_106] : memref<128x128xf32, #tpu.memory_space<vmem>>, vector<8x128xf32>
    %cst_107 = arith.constant dense<0.000000e+00> : vector<8x128xf32>
    %466 = tpu.matmul %440, %32, %cst_107 {dimension_numbers = #tpu.dot_dimension_numbers<[1], [0], [0], [1], [0, 0, 1, 1], [], []>} : vector<8x32xf32>, vector<32x128xf32>, vector<8x128xf32> -> vector<8x128xf32>
    %467 = arith.addf %465, %466 : vector<8x128xf32>
    %468 = arith.negf %467 : vector<8x128xf32>
    %469 = math.exp %468 : vector<8x128xf32>
    %cst_108 = arith.constant 1.000000e+00 : f32
    %470 = vector.broadcast %cst_108 : f32 to vector<8x128xf32>
    %471 = arith.addf %470, %469 : vector<8x128xf32>
    %472 = arith.divf %470, %471 : vector<8x128xf32>
    %473 = vector.extract_strided_slice %472 {offsets = [0, 0], sizes = [8, 32], strides = [1, 1]} : vector<8x128xf32> to vector<8x32xf32>
    %474 = vector.extract_strided_slice %472 {offsets = [0, 32], sizes = [8, 32], strides = [1, 1]} : vector<8x128xf32> to vector<8x32xf32>
    %475 = vector.extract_strided_slice %472 {offsets = [0, 96], sizes = [8, 32], strides = [1, 1]} : vector<8x128xf32> to vector<8x32xf32>
    %476 = vector.extract_strided_slice %467 {offsets = [0, 64], sizes = [8, 32], strides = [1, 1]} : vector<8x128xf32> to vector<8x32xf32>
    %477 = math.tanh %476 : vector<8x32xf32>
    %478 = arith.mulf %474, %438 : vector<8x32xf32>
    %479 = arith.mulf %473, %477 : vector<8x32xf32>
    %480 = arith.addf %478, %479 : vector<8x32xf32>
    %481 = math.tanh %480 : vector<8x32xf32>
    %482 = arith.mulf %475, %481 : vector<8x32xf32>
    %cst_109 = arith.constant dense<0.000000e+00> : vector<8x128xf32>
    %483 = tpu.matmul %482, %33, %cst_109 {dimension_numbers = #tpu.dot_dimension_numbers<[1], [0], [0], [1], [0, 0, 1, 1], [], []>} : vector<8x32xf32>, vector<32x128xf32>, vector<8x128xf32> -> vector<8x128xf32>
    %484 = arith.addf %483, %463 : vector<8x128xf32>
    %485 = vector.broadcast %35 : vector<1x128xf32> to vector<8x128xf32>
    %486 = arith.addf %484, %485 : vector<8x128xf32>
    %487 = arith.negf %486 : vector<8x128xf32>
    %488 = math.exp %487 : vector<8x128xf32>
    %cst_110 = arith.constant 1.000000e+00 : f32
    %489 = vector.broadcast %cst_110 : f32 to vector<8x128xf32>
    %490 = arith.addf %489, %488 : vector<8x128xf32>
    %491 = arith.divf %489, %490 : vector<8x128xf32>
    %492 = vector.extract_strided_slice %491 {offsets = [0, 0], sizes = [8, 32], strides = [1, 1]} : vector<8x128xf32> to vector<8x32xf32>
    %493 = vector.extract_strided_slice %491 {offsets = [0, 32], sizes = [8, 32], strides = [1, 1]} : vector<8x128xf32> to vector<8x32xf32>
    %494 = vector.extract_strided_slice %491 {offsets = [0, 96], sizes = [8, 32], strides = [1, 1]} : vector<8x128xf32> to vector<8x32xf32>
    %495 = vector.extract_strided_slice %486 {offsets = [0, 64], sizes = [8, 32], strides = [1, 1]} : vector<8x128xf32> to vector<8x32xf32>
    %496 = math.tanh %495 : vector<8x32xf32>
    %497 = arith.mulf %493, %457 : vector<8x32xf32>
    %498 = arith.mulf %492, %496 : vector<8x32xf32>
    %499 = arith.addf %497, %498 : vector<8x32xf32>
    %500 = math.tanh %499 : vector<8x32xf32>
    %501 = arith.mulf %494, %500 : vector<8x32xf32>
    %502 = arith.index_cast %462 : i32 to index
    %c0_111 = arith.constant 0 : index
    %503 = vector.load %arg8[%502, %c0_111] : memref<128x32xf32, #tpu.memory_space<vmem>>, vector<8x32xf32>
    tpu.vector_store %arg8[%502, %c0_111], %501 {strides = array<i32>} : memref<128x32xf32, #tpu.memory_space<vmem>>, vector<8x32xf32>,
    %c11_i32 = arith.constant 11 : i32
    %c8_i32_112 = arith.constant 8 : i32
    %504 = arith.muli %c11_i32, %c8_i32_112 : i32
    %cst_113 = arith.constant dense<0.000000e+00> : vector<8x128xf32>
    %505 = tpu.matmul %501, %34, %cst_113 {dimension_numbers = #tpu.dot_dimension_numbers<[1], [0], [0], [1], [0, 0, 1, 1], [], []>} : vector<8x32xf32>, vector<32x128xf32>, vector<8x128xf32> -> vector<8x128xf32>
    %506 = arith.index_cast %504 : i32 to index
    %c0_114 = arith.constant 0 : index
    %507 = vector.load %arg7[%506, %c0_114] : memref<128x128xf32, #tpu.memory_space<vmem>>, vector<8x128xf32>
    %cst_115 = arith.constant dense<0.000000e+00> : vector<8x128xf32>
    %508 = tpu.matmul %482, %32, %cst_115 {dimension_numbers = #tpu.dot_dimension_numbers<[1], [0], [0], [1], [0, 0, 1, 1], [], []>} : vector<8x32xf32>, vector<32x128xf32>, vector<8x128xf32> -> vector<8x128xf32>
    %509 = arith.addf %507, %508 : vector<8x128xf32>
    %510 = arith.negf %509 : vector<8x128xf32>
    %511 = math.exp %510 : vector<8x128xf32>
    %cst_116 = arith.constant 1.000000e+00 : f32
    %512 = vector.broadcast %cst_116 : f32 to vector<8x128xf32>
    %513 = arith.addf %512, %511 : vector<8x128xf32>
    %514 = arith.divf %512, %513 : vector<8x128xf32>
    %515 = vector.extract_strided_slice %514 {offsets = [0, 0], sizes = [8, 32], strides = [1, 1]} : vector<8x128xf32> to vector<8x32xf32>
    %516 = vector.extract_strided_slice %514 {offsets = [0, 32], sizes = [8, 32], strides = [1, 1]} : vector<8x128xf32> to vector<8x32xf32>
    %517 = vector.extract_strided_slice %514 {offsets = [0, 96], sizes = [8, 32], strides = [1, 1]} : vector<8x128xf32> to vector<8x32xf32>
    %518 = vector.extract_strided_slice %509 {offsets = [0, 64], sizes = [8, 32], strides = [1, 1]} : vector<8x128xf32> to vector<8x32xf32>
    %519 = math.tanh %518 : vector<8x32xf32>
    %520 = arith.mulf %516, %480 : vector<8x32xf32>
    %521 = arith.mulf %515, %519 : vector<8x32xf32>
    %522 = arith.addf %520, %521 : vector<8x32xf32>
    %523 = math.tanh %522 : vector<8x32xf32>
    %524 = arith.mulf %517, %523 : vector<8x32xf32>
    %cst_117 = arith.constant dense<0.000000e+00> : vector<8x128xf32>
    %525 = tpu.matmul %524, %33, %cst_117 {dimension_numbers = #tpu.dot_dimension_numbers<[1], [0], [0], [1], [0, 0, 1, 1], [], []>} : vector<8x32xf32>, vector<32x128xf32>, vector<8x128xf32> -> vector<8x128xf32>
    %526 = arith.addf %525, %505 : vector<8x128xf32>
    %527 = vector.broadcast %35 : vector<1x128xf32> to vector<8x128xf32>
    %528 = arith.addf %526, %527 : vector<8x128xf32>
    %529 = arith.negf %528 : vector<8x128xf32>
    %530 = math.exp %529 : vector<8x128xf32>
    %cst_118 = arith.constant 1.000000e+00 : f32
    %531 = vector.broadcast %cst_118 : f32 to vector<8x128xf32>
    %532 = arith.addf %531, %530 : vector<8x128xf32>
    %533 = arith.divf %531, %532 : vector<8x128xf32>
    %534 = vector.extract_strided_slice %533 {offsets = [0, 0], sizes = [8, 32], strides = [1, 1]} : vector<8x128xf32> to vector<8x32xf32>
    %535 = vector.extract_strided_slice %533 {offsets = [0, 32], sizes = [8, 32], strides = [1, 1]} : vector<8x128xf32> to vector<8x32xf32>
    %536 = vector.extract_strided_slice %533 {offsets = [0, 96], sizes = [8, 32], strides = [1, 1]} : vector<8x128xf32> to vector<8x32xf32>
    %537 = vector.extract_strided_slice %528 {offsets = [0, 64], sizes = [8, 32], strides = [1, 1]} : vector<8x128xf32> to vector<8x32xf32>
    %538 = math.tanh %537 : vector<8x32xf32>
    %539 = arith.mulf %535, %499 : vector<8x32xf32>
    %540 = arith.mulf %534, %538 : vector<8x32xf32>
    %541 = arith.addf %539, %540 : vector<8x32xf32>
    %542 = math.tanh %541 : vector<8x32xf32>
    %543 = arith.mulf %536, %542 : vector<8x32xf32>
    %544 = arith.index_cast %504 : i32 to index
    %c0_119 = arith.constant 0 : index
    %545 = vector.load %arg8[%544, %c0_119] : memref<128x32xf32, #tpu.memory_space<vmem>>, vector<8x32xf32>
    tpu.vector_store %arg8[%544, %c0_119], %543 {strides = array<i32>} : memref<128x32xf32, #tpu.memory_space<vmem>>, vector<8x32xf32>,
    %c12_i32 = arith.constant 12 : i32
    %c8_i32_120 = arith.constant 8 : i32
    %546 = arith.muli %c12_i32, %c8_i32_120 : i32
    %cst_121 = arith.constant dense<0.000000e+00> : vector<8x128xf32>
    %547 = tpu.matmul %543, %34, %cst_121 {dimension_numbers = #tpu.dot_dimension_numbers<[1], [0], [0], [1], [0, 0, 1, 1], [], []>} : vector<8x32xf32>, vector<32x128xf32>, vector<8x128xf32> -> vector<8x128xf32>
    %548 = arith.index_cast %546 : i32 to index
    %c0_122 = arith.constant 0 : index
    %549 = vector.load %arg7[%548, %c0_122] : memref<128x128xf32, #tpu.memory_space<vmem>>, vector<8x128xf32>
    %cst_123 = arith.constant dense<0.000000e+00> : vector<8x128xf32>
    %550 = tpu.matmul %524, %32, %cst_123 {dimension_numbers = #tpu.dot_dimension_numbers<[1], [0], [0], [1], [0, 0, 1, 1], [], []>} : vector<8x32xf32>, vector<32x128xf32>, vector<8x128xf32> -> vector<8x128xf32>
    %551 = arith.addf %549, %550 : vector<8x128xf32>
    %552 = arith.negf %551 : vector<8x128xf32>
    %553 = math.exp %552 : vector<8x128xf32>
    %cst_124 = arith.constant 1.000000e+00 : f32
    %554 = vector.broadcast %cst_124 : f32 to vector<8x128xf32>
    %555 = arith.addf %554, %553 : vector<8x128xf32>
    %556 = arith.divf %554, %555 : vector<8x128xf32>
    %557 = vector.extract_strided_slice %556 {offsets = [0, 0], sizes = [8, 32], strides = [1, 1]} : vector<8x128xf32> to vector<8x32xf32>
    %558 = vector.extract_strided_slice %556 {offsets = [0, 32], sizes = [8, 32], strides = [1, 1]} : vector<8x128xf32> to vector<8x32xf32>
    %559 = vector.extract_strided_slice %556 {offsets = [0, 96], sizes = [8, 32], strides = [1, 1]} : vector<8x128xf32> to vector<8x32xf32>
    %560 = vector.extract_strided_slice %551 {offsets = [0, 64], sizes = [8, 32], strides = [1, 1]} : vector<8x128xf32> to vector<8x32xf32>
    %561 = math.tanh %560 : vector<8x32xf32>
    %562 = arith.mulf %558, %522 : vector<8x32xf32>
    %563 = arith.mulf %557, %561 : vector<8x32xf32>
    %564 = arith.addf %562, %563 : vector<8x32xf32>
    %565 = math.tanh %564 : vector<8x32xf32>
    %566 = arith.mulf %559, %565 : vector<8x32xf32>
    %cst_125 = arith.constant dense<0.000000e+00> : vector<8x128xf32>
    %567 = tpu.matmul %566, %33, %cst_125 {dimension_numbers = #tpu.dot_dimension_numbers<[1], [0], [0], [1], [0, 0, 1, 1], [], []>} : vector<8x32xf32>, vector<32x128xf32>, vector<8x128xf32> -> vector<8x128xf32>
    %568 = arith.addf %567, %547 : vector<8x128xf32>
    %569 = vector.broadcast %35 : vector<1x128xf32> to vector<8x128xf32>
    %570 = arith.addf %568, %569 : vector<8x128xf32>
    %571 = arith.negf %570 : vector<8x128xf32>
    %572 = math.exp %571 : vector<8x128xf32>
    %cst_126 = arith.constant 1.000000e+00 : f32
    %573 = vector.broadcast %cst_126 : f32 to vector<8x128xf32>
    %574 = arith.addf %573, %572 : vector<8x128xf32>
    %575 = arith.divf %573, %574 : vector<8x128xf32>
    %576 = vector.extract_strided_slice %575 {offsets = [0, 0], sizes = [8, 32], strides = [1, 1]} : vector<8x128xf32> to vector<8x32xf32>
    %577 = vector.extract_strided_slice %575 {offsets = [0, 32], sizes = [8, 32], strides = [1, 1]} : vector<8x128xf32> to vector<8x32xf32>
    %578 = vector.extract_strided_slice %575 {offsets = [0, 96], sizes = [8, 32], strides = [1, 1]} : vector<8x128xf32> to vector<8x32xf32>
    %579 = vector.extract_strided_slice %570 {offsets = [0, 64], sizes = [8, 32], strides = [1, 1]} : vector<8x128xf32> to vector<8x32xf32>
    %580 = math.tanh %579 : vector<8x32xf32>
    %581 = arith.mulf %577, %541 : vector<8x32xf32>
    %582 = arith.mulf %576, %580 : vector<8x32xf32>
    %583 = arith.addf %581, %582 : vector<8x32xf32>
    %584 = math.tanh %583 : vector<8x32xf32>
    %585 = arith.mulf %578, %584 : vector<8x32xf32>
    %586 = arith.index_cast %546 : i32 to index
    %c0_127 = arith.constant 0 : index
    %587 = vector.load %arg8[%586, %c0_127] : memref<128x32xf32, #tpu.memory_space<vmem>>, vector<8x32xf32>
    tpu.vector_store %arg8[%586, %c0_127], %585 {strides = array<i32>} : memref<128x32xf32, #tpu.memory_space<vmem>>, vector<8x32xf32>,
    %c13_i32 = arith.constant 13 : i32
    %c8_i32_128 = arith.constant 8 : i32
    %588 = arith.muli %c13_i32, %c8_i32_128 : i32
    %cst_129 = arith.constant dense<0.000000e+00> : vector<8x128xf32>
    %589 = tpu.matmul %585, %34, %cst_129 {dimension_numbers = #tpu.dot_dimension_numbers<[1], [0], [0], [1], [0, 0, 1, 1], [], []>} : vector<8x32xf32>, vector<32x128xf32>, vector<8x128xf32> -> vector<8x128xf32>
    %590 = arith.index_cast %588 : i32 to index
    %c0_130 = arith.constant 0 : index
    %591 = vector.load %arg7[%590, %c0_130] : memref<128x128xf32, #tpu.memory_space<vmem>>, vector<8x128xf32>
    %cst_131 = arith.constant dense<0.000000e+00> : vector<8x128xf32>
    %592 = tpu.matmul %566, %32, %cst_131 {dimension_numbers = #tpu.dot_dimension_numbers<[1], [0], [0], [1], [0, 0, 1, 1], [], []>} : vector<8x32xf32>, vector<32x128xf32>, vector<8x128xf32> -> vector<8x128xf32>
    %593 = arith.addf %591, %592 : vector<8x128xf32>
    %594 = arith.negf %593 : vector<8x128xf32>
    %595 = math.exp %594 : vector<8x128xf32>
    %cst_132 = arith.constant 1.000000e+00 : f32
    %596 = vector.broadcast %cst_132 : f32 to vector<8x128xf32>
    %597 = arith.addf %596, %595 : vector<8x128xf32>
    %598 = arith.divf %596, %597 : vector<8x128xf32>
    %599 = vector.extract_strided_slice %598 {offsets = [0, 0], sizes = [8, 32], strides = [1, 1]} : vector<8x128xf32> to vector<8x32xf32>
    %600 = vector.extract_strided_slice %598 {offsets = [0, 32], sizes = [8, 32], strides = [1, 1]} : vector<8x128xf32> to vector<8x32xf32>
    %601 = vector.extract_strided_slice %598 {offsets = [0, 96], sizes = [8, 32], strides = [1, 1]} : vector<8x128xf32> to vector<8x32xf32>
    %602 = vector.extract_strided_slice %593 {offsets = [0, 64], sizes = [8, 32], strides = [1, 1]} : vector<8x128xf32> to vector<8x32xf32>
    %603 = math.tanh %602 : vector<8x32xf32>
    %604 = arith.mulf %600, %564 : vector<8x32xf32>
    %605 = arith.mulf %599, %603 : vector<8x32xf32>
    %606 = arith.addf %604, %605 : vector<8x32xf32>
    %607 = math.tanh %606 : vector<8x32xf32>
    %608 = arith.mulf %601, %607 : vector<8x32xf32>
    %cst_133 = arith.constant dense<0.000000e+00> : vector<8x128xf32>
    %609 = tpu.matmul %608, %33, %cst_133 {dimension_numbers = #tpu.dot_dimension_numbers<[1], [0], [0], [1], [0, 0, 1, 1], [], []>} : vector<8x32xf32>, vector<32x128xf32>, vector<8x128xf32> -> vector<8x128xf32>
    %610 = arith.addf %609, %589 : vector<8x128xf32>
    %611 = vector.broadcast %35 : vector<1x128xf32> to vector<8x128xf32>
    %612 = arith.addf %610, %611 : vector<8x128xf32>
    %613 = arith.negf %612 : vector<8x128xf32>
    %614 = math.exp %613 : vector<8x128xf32>
    %cst_134 = arith.constant 1.000000e+00 : f32
    %615 = vector.broadcast %cst_134 : f32 to vector<8x128xf32>
    %616 = arith.addf %615, %614 : vector<8x128xf32>
    %617 = arith.divf %615, %616 : vector<8x128xf32>
    %618 = vector.extract_strided_slice %617 {offsets = [0, 0], sizes = [8, 32], strides = [1, 1]} : vector<8x128xf32> to vector<8x32xf32>
    %619 = vector.extract_strided_slice %617 {offsets = [0, 32], sizes = [8, 32], strides = [1, 1]} : vector<8x128xf32> to vector<8x32xf32>
    %620 = vector.extract_strided_slice %617 {offsets = [0, 96], sizes = [8, 32], strides = [1, 1]} : vector<8x128xf32> to vector<8x32xf32>
    %621 = vector.extract_strided_slice %612 {offsets = [0, 64], sizes = [8, 32], strides = [1, 1]} : vector<8x128xf32> to vector<8x32xf32>
    %622 = math.tanh %621 : vector<8x32xf32>
    %623 = arith.mulf %619, %583 : vector<8x32xf32>
    %624 = arith.mulf %618, %622 : vector<8x32xf32>
    %625 = arith.addf %623, %624 : vector<8x32xf32>
    %626 = math.tanh %625 : vector<8x32xf32>
    %627 = arith.mulf %620, %626 : vector<8x32xf32>
    %628 = arith.index_cast %588 : i32 to index
    %c0_135 = arith.constant 0 : index
    %629 = vector.load %arg8[%628, %c0_135] : memref<128x32xf32, #tpu.memory_space<vmem>>, vector<8x32xf32>
    tpu.vector_store %arg8[%628, %c0_135], %627 {strides = array<i32>} : memref<128x32xf32, #tpu.memory_space<vmem>>, vector<8x32xf32>,
    %c14_i32 = arith.constant 14 : i32
    %c8_i32_136 = arith.constant 8 : i32
    %630 = arith.muli %c14_i32, %c8_i32_136 : i32
    %cst_137 = arith.constant dense<0.000000e+00> : vector<8x128xf32>
    %631 = tpu.matmul %627, %34, %cst_137 {dimension_numbers = #tpu.dot_dimension_numbers<[1], [0], [0], [1], [0, 0, 1, 1], [], []>} : vector<8x32xf32>, vector<32x128xf32>, vector<8x128xf32> -> vector<8x128xf32>
    %632 = arith.index_cast %630 : i32 to index
    %c0_138 = arith.constant 0 : index
    %633 = vector.load %arg7[%632, %c0_138] : memref<128x128xf32, #tpu.memory_space<vmem>>, vector<8x128xf32>
    %cst_139 = arith.constant dense<0.000000e+00> : vector<8x128xf32>
    %634 = tpu.matmul %608, %32, %cst_139 {dimension_numbers = #tpu.dot_dimension_numbers<[1], [0], [0], [1], [0, 0, 1, 1], [], []>} : vector<8x32xf32>, vector<32x128xf32>, vector<8x128xf32> -> vector<8x128xf32>
    %635 = arith.addf %633, %634 : vector<8x128xf32>
    %636 = arith.negf %635 : vector<8x128xf32>
    %637 = math.exp %636 : vector<8x128xf32>
    %cst_140 = arith.constant 1.000000e+00 : f32
    %638 = vector.broadcast %cst_140 : f32 to vector<8x128xf32>
    %639 = arith.addf %638, %637 : vector<8x128xf32>
    %640 = arith.divf %638, %639 : vector<8x128xf32>
    %641 = vector.extract_strided_slice %640 {offsets = [0, 0], sizes = [8, 32], strides = [1, 1]} : vector<8x128xf32> to vector<8x32xf32>
    %642 = vector.extract_strided_slice %640 {offsets = [0, 32], sizes = [8, 32], strides = [1, 1]} : vector<8x128xf32> to vector<8x32xf32>
    %643 = vector.extract_strided_slice %640 {offsets = [0, 96], sizes = [8, 32], strides = [1, 1]} : vector<8x128xf32> to vector<8x32xf32>
    %644 = vector.extract_strided_slice %635 {offsets = [0, 64], sizes = [8, 32], strides = [1, 1]} : vector<8x128xf32> to vector<8x32xf32>
    %645 = math.tanh %644 : vector<8x32xf32>
    %646 = arith.mulf %642, %606 : vector<8x32xf32>
    %647 = arith.mulf %641, %645 : vector<8x32xf32>
    %648 = arith.addf %646, %647 : vector<8x32xf32>
    %649 = math.tanh %648 : vector<8x32xf32>
    %650 = arith.mulf %643, %649 : vector<8x32xf32>
    %cst_141 = arith.constant dense<0.000000e+00> : vector<8x128xf32>
    %651 = tpu.matmul %650, %33, %cst_141 {dimension_numbers = #tpu.dot_dimension_numbers<[1], [0], [0], [1], [0, 0, 1, 1], [], []>} : vector<8x32xf32>, vector<32x128xf32>, vector<8x128xf32> -> vector<8x128xf32>
    %652 = arith.addf %651, %631 : vector<8x128xf32>
    %653 = vector.broadcast %35 : vector<1x128xf32> to vector<8x128xf32>
    %654 = arith.addf %652, %653 : vector<8x128xf32>
    %655 = arith.negf %654 : vector<8x128xf32>
    %656 = math.exp %655 : vector<8x128xf32>
    %cst_142 = arith.constant 1.000000e+00 : f32
    %657 = vector.broadcast %cst_142 : f32 to vector<8x128xf32>
    %658 = arith.addf %657, %656 : vector<8x128xf32>
    %659 = arith.divf %657, %658 : vector<8x128xf32>
    %660 = vector.extract_strided_slice %659 {offsets = [0, 0], sizes = [8, 32], strides = [1, 1]} : vector<8x128xf32> to vector<8x32xf32>
    %661 = vector.extract_strided_slice %659 {offsets = [0, 32], sizes = [8, 32], strides = [1, 1]} : vector<8x128xf32> to vector<8x32xf32>
    %662 = vector.extract_strided_slice %659 {offsets = [0, 96], sizes = [8, 32], strides = [1, 1]} : vector<8x128xf32> to vector<8x32xf32>
    %663 = vector.extract_strided_slice %654 {offsets = [0, 64], sizes = [8, 32], strides = [1, 1]} : vector<8x128xf32> to vector<8x32xf32>
    %664 = math.tanh %663 : vector<8x32xf32>
    %665 = arith.mulf %661, %625 : vector<8x32xf32>
    %666 = arith.mulf %660, %664 : vector<8x32xf32>
    %667 = arith.addf %665, %666 : vector<8x32xf32>
    %668 = math.tanh %667 : vector<8x32xf32>
    %669 = arith.mulf %662, %668 : vector<8x32xf32>
    %670 = arith.index_cast %630 : i32 to index
    %c0_143 = arith.constant 0 : index
    %671 = vector.load %arg8[%670, %c0_143] : memref<128x32xf32, #tpu.memory_space<vmem>>, vector<8x32xf32>
    tpu.vector_store %arg8[%670, %c0_143], %669 {strides = array<i32>} : memref<128x32xf32, #tpu.memory_space<vmem>>, vector<8x32xf32>,
    %c15_i32 = arith.constant 15 : i32
    %c8_i32_144 = arith.constant 8 : i32
    %672 = arith.muli %c15_i32, %c8_i32_144 : i32
    %cst_145 = arith.constant dense<0.000000e+00> : vector<8x128xf32>
    %673 = tpu.matmul %669, %34, %cst_145 {dimension_numbers = #tpu.dot_dimension_numbers<[1], [0], [0], [1], [0, 0, 1, 1], [], []>} : vector<8x32xf32>, vector<32x128xf32>, vector<8x128xf32> -> vector<8x128xf32>
    %674 = arith.index_cast %672 : i32 to index
    %c0_146 = arith.constant 0 : index
    %675 = vector.load %arg7[%674, %c0_146] : memref<128x128xf32, #tpu.memory_space<vmem>>, vector<8x128xf32>
    %cst_147 = arith.constant dense<0.000000e+00> : vector<8x128xf32>
    %676 = tpu.matmul %650, %32, %cst_147 {dimension_numbers = #tpu.dot_dimension_numbers<[1], [0], [0], [1], [0, 0, 1, 1], [], []>} : vector<8x32xf32>, vector<32x128xf32>, vector<8x128xf32> -> vector<8x128xf32>
    %677 = arith.addf %675, %676 : vector<8x128xf32>
    %678 = arith.negf %677 : vector<8x128xf32>
    %679 = math.exp %678 : vector<8x128xf32>
    %cst_148 = arith.constant 1.000000e+00 : f32
    %680 = vector.broadcast %cst_148 : f32 to vector<8x128xf32>
    %681 = arith.addf %680, %679 : vector<8x128xf32>
    %682 = arith.divf %680, %681 : vector<8x128xf32>
    %683 = vector.extract_strided_slice %682 {offsets = [0, 0], sizes = [8, 32], strides = [1, 1]} : vector<8x128xf32> to vector<8x32xf32>
    %684 = vector.extract_strided_slice %682 {offsets = [0, 32], sizes = [8, 32], strides = [1, 1]} : vector<8x128xf32> to vector<8x32xf32>
    %685 = vector.extract_strided_slice %682 {offsets = [0, 96], sizes = [8, 32], strides = [1, 1]} : vector<8x128xf32> to vector<8x32xf32>
    %686 = vector.extract_strided_slice %677 {offsets = [0, 64], sizes = [8, 32], strides = [1, 1]} : vector<8x128xf32> to vector<8x32xf32>
    %687 = math.tanh %686 : vector<8x32xf32>
    %688 = arith.mulf %684, %648 : vector<8x32xf32>
    %689 = arith.mulf %683, %687 : vector<8x32xf32>
    %690 = arith.addf %688, %689 : vector<8x32xf32>
    %691 = math.tanh %690 : vector<8x32xf32>
    %692 = arith.mulf %685, %691 : vector<8x32xf32>
    %cst_149 = arith.constant dense<0.000000e+00> : vector<8x128xf32>
    %693 = tpu.matmul %692, %33, %cst_149 {dimension_numbers = #tpu.dot_dimension_numbers<[1], [0], [0], [1], [0, 0, 1, 1], [], []>} : vector<8x32xf32>, vector<32x128xf32>, vector<8x128xf32> -> vector<8x128xf32>
    %694 = arith.addf %693, %673 : vector<8x128xf32>
    %695 = vector.broadcast %35 : vector<1x128xf32> to vector<8x128xf32>
    %696 = arith.addf %694, %695 : vector<8x128xf32>
    %697 = arith.negf %696 : vector<8x128xf32>
    %698 = math.exp %697 : vector<8x128xf32>
    %cst_150 = arith.constant 1.000000e+00 : f32
    %699 = vector.broadcast %cst_150 : f32 to vector<8x128xf32>
    %700 = arith.addf %699, %698 : vector<8x128xf32>
    %701 = arith.divf %699, %700 : vector<8x128xf32>
    %702 = vector.extract_strided_slice %701 {offsets = [0, 0], sizes = [8, 32], strides = [1, 1]} : vector<8x128xf32> to vector<8x32xf32>
    %703 = vector.extract_strided_slice %701 {offsets = [0, 32], sizes = [8, 32], strides = [1, 1]} : vector<8x128xf32> to vector<8x32xf32>
    %704 = vector.extract_strided_slice %701 {offsets = [0, 96], sizes = [8, 32], strides = [1, 1]} : vector<8x128xf32> to vector<8x32xf32>
    %705 = vector.extract_strided_slice %696 {offsets = [0, 64], sizes = [8, 32], strides = [1, 1]} : vector<8x128xf32> to vector<8x32xf32>
    %706 = math.tanh %705 : vector<8x32xf32>
    %707 = arith.mulf %703, %667 : vector<8x32xf32>
    %708 = arith.mulf %702, %706 : vector<8x32xf32>
    %709 = arith.addf %707, %708 : vector<8x32xf32>
    %710 = math.tanh %709 : vector<8x32xf32>
    %711 = arith.mulf %704, %710 : vector<8x32xf32>
    %712 = arith.index_cast %672 : i32 to index
    %c0_151 = arith.constant 0 : index
    %713 = vector.load %arg8[%712, %c0_151] : memref<128x32xf32, #tpu.memory_space<vmem>>, vector<8x32xf32>
    tpu.vector_store %arg8[%712, %c0_151], %711 {strides = array<i32>} : memref<128x32xf32, #tpu.memory_space<vmem>>, vector<8x32xf32>,
    %c16_i32 = arith.constant 16 : i32
    %c192 = arith.constant 192 : index
    %c0_152 = arith.constant 0 : index
    %714 = vector.load %arg3[%c192, %c0_152] : memref<256x128xf32, #tpu.memory_space<vmem>>, vector<32x32xf32>
    %c4 = arith.constant 4 : index
    %c0_153 = arith.constant 0 : index
    %715 = vector.load %arg4[%c4, %c0_153] : memref<8x128xf32, #tpu.memory_space<vmem>>, vector<1x32xf32>
    %c0_154 = arith.constant 0 : index
    %c0_155 = arith.constant 0 : index
    %716 = vector.load %arg8[%c0_154, %c0_155] : memref<128x32xf32, #tpu.memory_space<vmem>>, vector<128x32xf32>
    %cst_156 = arith.constant dense<0.000000e+00> : vector<128x32xf32>
    %717 = tpu.matmul %716, %714, %cst_156 {dimension_numbers = #tpu.dot_dimension_numbers<[1], [0], [0], [1], [0, 0, 1, 1], [], []>} : vector<128x32xf32>, vector<32x32xf32>, vector<128x32xf32> -> vector<128x32xf32>
    %718 = vector.broadcast %715 : vector<1x32xf32> to vector<128x32xf32>
    %719 = arith.addf %717, %718 : vector<128x32xf32>
    %720 = arith.negf %719 : vector<128x32xf32>
    %721 = math.exp %720 : vector<128x32xf32>
    %cst_157 = arith.constant 1.000000e+00 : f32
    %722 = vector.broadcast %cst_157 : f32 to vector<128x32xf32>
    %723 = arith.addf %722, %721 : vector<128x32xf32>
    %724 = arith.divf %722, %723 : vector<128x32xf32>
    %725 = arith.mulf %724, %3 : vector<128x32xf32>
    %c224 = arith.constant 224 : index
    %c0_158 = arith.constant 0 : index
    %726 = vector.load %arg3[%c224, %c0_158] : memref<256x128xf32, #tpu.memory_space<vmem>>, vector<32x128xf32>
    %cst_159 = arith.constant dense<0.000000e+00> : vector<128x128xf32>
    %727 = tpu.matmul %725, %726, %cst_159 {dimension_numbers = #tpu.dot_dimension_numbers<[1], [0], [0], [1], [0, 0, 1, 1], [], []>} : vector<128x32xf32>, vector<32x128xf32>, vector<128x128xf32> -> vector<128x128xf32>
    %c0_160 = arith.constant 0 : index
    %c0_161 = arith.constant 0 : index
    %c0_162 = arith.constant 0 : index
    %728 = vector.load %arg5[%c0_160, %c0_161, %c0_162] : memref<1x128x128xf32, #tpu.memory_space<vmem>>, vector<1x128x128xf32>
    %729 = vector.shape_cast %728 : vector<1x128x128xf32> to vector<128x128xf32>
    %730 = vector.shape_cast %727 : vector<128x128xf32> to vector<1x128x128xf32>
    tpu.vector_store %arg5[%c0_160, %c0_161, %c0_162], %730 {strides = array<i32>} : memref<1x128x128xf32, #tpu.memory_space<vmem>>, vector<1x128x128xf32>,
    %731 = tpu.concatenate %692, %690, %711, %709 in 1 : vector<8x32xf32>, vector<8x32xf32>, vector<8x32xf32>, vector<8x32xf32> -> vector<8x128xf32>
    %c0_163 = arith.constant 0 : index
    %c0_164 = arith.constant 0 : index
    %c0_165 = arith.constant 0 : index
    %732 = vector.load %arg6[%c0_163, %c0_164, %c0_165] : memref<1x8x128xf32, #tpu.memory_space<vmem>>, vector<1x8x128xf32>
    %733 = vector.shape_cast %732 : vector<1x8x128xf32> to vector<8x128xf32>
    %734 = vector.shape_cast %731 : vector<8x128xf32> to vector<1x8x128xf32>
    tpu.vector_store %arg6[%c0_163, %c0_164, %c0_165], %734 {strides = array<i32>} : memref<1x8x128xf32, #tpu.memory_space<vmem>>, vector<1x8x128xf32>,
    return
  }
  func.func @transform_0(%arg0: i32) -> (i32, i32, i32) {
    %c0_i32 = arith.constant 0 : i32
    %c0_i32_0 = arith.constant 0 : i32
    %c0_i32_1 = arith.constant 0 : i32
    return %arg0, %c0_i32, %c0_i32_0 : i32, i32, i32
  }
  func.func @transform_1(%arg0: i32) -> (i32, i32, i32) {
    %c0_i32 = arith.constant 0 : i32
    %c0_i32_0 = arith.constant 0 : i32
    %c0_i32_1 = arith.constant 0 : i32
    return %arg0, %c0_i32, %c0_i32_0 : i32, i32, i32
  }
  func.func @transform_2(%arg0: i32) -> (i32, i32) {
    %c0_i32 = arith.constant 0 : i32
    %c0_i32_0 = arith.constant 0 : i32
    %c0_i32_1 = arith.constant 0 : i32
    return %c0_i32, %c0_i32_0 : i32, i32
  }
  func.func @transform_3(%arg0: i32) -> (i32, i32) {
    %c0_i32 = arith.constant 0 : i32
    %c0_i32_0 = arith.constant 0 : i32
    %c0_i32_1 = arith.constant 0 : i32
    return %c0_i32, %c0_i32_0 : i32, i32
  }
  func.func @transform_4(%arg0: i32) -> (i32, i32, i32) {
    %c0_i32 = arith.constant 0 : i32
    %c0_i32_0 = arith.constant 0 : i32
    %c0_i32_1 = arith.constant 0 : i32
    return %arg0, %c0_i32, %c0_i32_0 : i32, i32, i32
  }
  func.func @transform_5(%arg0: i32) -> (i32, i32, i32) {
    %c0_i32 = arith.constant 0 : i32
    %c0_i32_0 = arith.constant 0 : i32
    %c0_i32_1 = arith.constant 0 : i32
    return %arg0, %c0_i32, %c0_i32_0 : i32, i32, i32
  }
}

</mosaic_0001>

<bundles_post_ra>
// kernel: tpu_custom_call.1
= control target key start
LH: loop header
LB: loop body
LE: loop exit
PB: predicated region body
PF: predicated region fallthrough
CT: control target
= control target key end

     0   :  { %11 = vsyncpa [#allocation5], 0  ;;  %s9600_s0 = inlined_call_operand.vmem [shape: f32[2,128,64], index: 0, kind: input, shape index: {}]   ;;  %s9601_s1 = inlined_call_operand.hbm [shape: f32[2,8,128], index: 1, kind: input, shape index: {}, may-alias: {1,5}]   ;;  %s9602_s2 = inlined_call_operand.vmem [shape: f32[256,128], index: 2, kind: input, shape index: {}]   ;;  %s9603_s3 = inlined_call_operand.vmem [shape: f32[8,128], index: 3, kind: input, shape index: {}]   ;;  %s9604_s4 = inlined_call_operand.hbm [shape: f32[2,128,128], index: 4, kind: output, shape index: {0}]   ;;  %s9605_s5 = inlined_call_operand.hbm [shape: f32[2,8,128], index: 5, kind: output, shape index: {1}, may-alias: {1,5}]  }
   0x1   :  { %13 = vsyncpa [#allocation5 + $0x1], 0 }
   0x2   :  { %14 = vsyncpa [#allocation6], 0 }
   0x3   :  { %16 = vsyncpa [#allocation6 + $0x1], 0 }
   0x4   :  { %17 = vsyncpa [#allocation9], 0 }
   0x5   :  { %19 = vsyncpa [#allocation9 + $0x1], 0  ;;  %s8147_s18 = smov 0   ;;  %s8149_s19 = smov 0  }
   0x6   :  { %s8151_s20 = smov 0   ;;  %s8153_s21 = smov 0  }
   0x7 LB: > { %s8168_s22 = sadd.s32 4294967295, %s8104_s21   ;;  %s6056_s23 = sadd.s32 4294967294, %s8104_s21   ;;  %s8104_s21 = sphi %s8153_s21, %s9620_s21   ;;  %s8100_s20 = sphi %s8151_s20, %s9619_s20   ;;  %s8096_s19 = sphi %s8149_s19, %s9618_s19   ;;  %s8092_s18 = sphi %s8147_s18, %s9617_s18  }
   0x8   : > { %s8172_s24 = sadd.s32 1, %s8104_s21   ;;  %s58_s25 = sadd.s32 1, %s8100_s20 }
   0x9   : > { %s55_s26 = ssub.s32 %s8104_s21, %s8172_s24  ;;  %p65_p0 = scmp.ne.s32.totalorder %s8100_s20, %s8096_s19 }
   0xa   : > { %p56_p1 = scmp.eq.s32.totalorder %s55_s26, 0  ;;  %p66_p2 = scmp.eq.s32.totalorder %s8104_s21, 0 }
   0xb   : > { %p71_p3 = scmp.ne.s32.totalorder %s8096_s19, %s8092_s18  ;;  %p72_p4 = scmp.eq.s32.totalorder %s8168_s22, 0 }
   0xc   : > { %s8184_s27 = scalar_select %p56_p1, %s8100_s20, %s58_s25  }
   0xd   : > { %p8186_p5 = por %p66_p2, %p65_p0  ;;  %p8190_p6 = por %p72_p4, %p71_p3 }
   0xe   : > { %p137_p7 = scmp.eq.s32.totalorder %s8168_s22, 1  ;;  %p143_p8 = scmp.eq.s32.totalorder %s6056_s23, 1 }
   0xf   : > { %p7578_p10 = scmp.lt.s32.totalorder %s8104_s21, 2  ;;  %s203_s7 = sand.u32 1, %s8100_s20  }
  0x10   : > { %p8197_p11 = por %p137_p7, %p65_p0  ;;  %p8201_p12 = por %p143_p8, %p71_p3 }
  0x11   : > { %s6060_s8 = sshll.u32 %s8104_s21, 7  ;;  %s6059_s9 = sshll.u32 %s203_s7, 3 }
  0x12   : > { %s9609_s30 = scalar_select %p8197_p11, 1, 0 }
  0x13   : > { %s9610_s6 = scalar_select %p8201_p12, 1, 0 }
  0x14   : > { %s8210_s12 = scalar_lea.hbm %s9601_s1, %s6060_s8  ;;  %s207_s13 = scalar_lea.vmem [#allocation4], %s6059_s9 }
  0x15   : > { %s214_s14 = sshll.u32 %s207_s13, 4  ;;  %p8214_p13 = pnand %p7578_p10, %p8186_p5  ;;  %s8218_s14 = int_to_ptr.vmem [resolvable:$true] %s214_s14 }
  0x16   : > { %s204_s16 = scalar_lea.sflag [#allocation5], %s203_s7  ;;  %s7976_s17 = scalar_lea.hbm %s8210_s12, 128 }
  0x17   : > { %p7977_p2 = scmp.ne.s32.totalorder %s8210_s12, %s7976_s17  ;;  %p7978_p3 = pneg %p8214_p13 }
  0x18   : > { %s7981_s26 = scalar_lea.hbm %s9601_s1, 256  ;;  %p7982_p5 = scmp.lt.u32.totalorder %s8210_s12, %s9601_s1 }
  0x19   : > { %p7979_p4 = pnand %p7978_p3, %p7977_p2  ;;  %p7983_p8 = scmp.lt.u32.totalorder %s7981_s26, %s7976_s17 }
  0x1a   : > { %p7985_p9 = scmp.lt.u32.totalorder %s7976_s17, %s8210_s12 }
  0x1b   : > { %p7980_p7 = pneg %p7979_p4  ;;  %p7984_p10 = por %p7983_p8, %p7982_p5 }
  0x1d   : > { %p7986_p0 = por %p7985_p9, %p7984_p10 }
  0x1f   : > { %p7987_p1 = pnand %p7986_p0, %p7980_p7 }
  0x21   : > { %7990 = shalt.err (!%p7987_p1)
}
  0x22   : > { %s7991_s7 = scalar_lea.vmem %s8218_s14, 128  ;;  %s8106_s9 = smov [#allocation4]  }
  0x23   : > { %p7992_p2 = scmp.ne.s32.totalorder %s8218_s14, %s7991_s7  ;;  %s7996_s10 = sshll.u32 %s8106_s9, 4  ;;  %s7997_s10 = int_to_ptr.vmem [resolvable:$false] %s7996_s10 }
  0x24   : > { %s7998_s11 = scalar_lea.vmem %s7997_s10, 256  ;;  %p7999_p11 = scmp.lt.s32.totalorder %s8218_s14, %s7997_s10 }
  0x25   : > { %p7994_p4 = pnand %p7992_p2, %p7978_p3  ;;  %p8000_p5 = scmp.lt.s32.totalorder %s7998_s11, %s7991_s7 }
  0x27   : > { %p7995_p12 = pneg %p7994_p4  ;;  %p8001_p8 = por %p8000_p5, %p7999_p11 }
  0x29   : > { %p8002_p9 = pnand %p8001_p8, %p7995_p12 }
  0x2b   : > { %8005 = shalt.err (!%p8002_p9)
}
  0x2c   : > { %7570 = dma.hbm_to_vmem [thread:$0]  (!%p8214_p13), %s8210_s12, 128, %s8218_s14, %s204_s16  }
  0x2d   : > { %p9612_p0 = scmp.lt.s32.totalorder %s8104_s21, 3  ;;  %p9613_p1 = scmp.ge.s32.totalorder %s8104_s21, 1 }
  0x2f   : > { %p220_p3 = pnand %p9613_p1, %p9612_p0 }
  0x30   : > { %s8252_s13 = sand.u32 (!%p220_p3), 1, %s8096_s19  }
  0x31   : > { %223 = sbr.rel (%p220_p3) target bundleno = 13179 (0x337b), region = 36  ;;  %s6062_s17 = sshll.u32 (!%p220_p3), %s8252_s13, 3 }
  0x32   : > { %s226_s23 = scalar_lea.sflag (!%p220_p3), [#allocation5], %s8252_s13  ;;  %s8258_s15 = scalar_lea.vmem (!%p220_p3), [#allocation4], %s6062_s17 }
  0x38   : > { %8079 = dma.done.wait (%p8190_p6), %s226_s23, 128  }
  0x39   : > { %8081 = vsyncadd (%p8190_p6), %s226_s23, 4294967168  ;;  %p266_p11 = scmp.lt.s32.totalorder %s8168_s22, 1  ;;  %v287_v0 = vld [vmem:[%s9602_s2 + $0x80] sm:$0xff]  ;;  %v288_v1 = vld [vmem:[%s9602_s2 + $0x88] sm:$0xff]  ;;  %vm295_vm0 = vcmask 523264   ;;  %vm491_vm1 = vcmask 261120  }
  0x3a   : > { %v289_v2 = vld [vmem:[%s9602_s2 + $0x90] sm:$0xff]  ;;  %v7229_v3 = vpack.c.bf16 %v288_v1, %v287_v0  ;;  %v290_v4 = vld [vmem:[%s9602_s2 + $0x98] sm:$0xff]  ;;  %v291_v6 = vld [vmem:[%s9602_s2 + $0xa0] sm:$0xff]  ;;  %v8107_v29 = vmov 0.0|0.0   ;;  %vm8108_vm2 = vmmov 0   ;;  %v8109_v57 = vmov 0.0  }
  0x3b   : > { %s267_s12 = scalar_select %p266_p11, %s8168_s22, 1  ;;  %v7233_v5 = vpack.c.bf16 %v290_v4, %v289_v2  ;;  %v292_v7 = vld [vmem:[%s9602_s2 + $0xa8] sm:$0xff]  ;;  %v293_v10 = vld [vmem:[%s9602_s2 + $0xb0] sm:$0xff]  ;;  %v294_v11 = vld [vmem:[%s9602_s2 + $0xb8] sm:$0xff]  ;;  %vm5904_vm3 = vcmask 785408  }
  0x3c   : > { %7230 = vmatprep.subr.bf16.mxu0 %v7229_v3  ;;  %v7237_v9 = vpack.c.bf16 %v292_v7, %v291_v6  ;;  %v7241_v12 = vpack.c.bf16 %v294_v11, %v293_v10  ;;  %v959_v28 = vld [vmem:[%s9602_s2 + $0x20] sm:$0xff]  ;;  %v960_v30 = vld [vmem:[%s9602_s2 + $0x28] sm:$0xff]  ;;  %v961_v42 = vld [vmem:[%s9602_s2 + $0x30] sm:$0xff]  ;;  %s8110_s28 = smov 64   ;;  %s8111_s8 = smov 32  }
  0x3d   : > { %s6239_s14 = sshll.u32 %s267_s12, 7  ;;  %7232 = vmatpush3.bf16.msra.mxu0 %v7229_v3  ;;  %v8334_v31 = vpack.c.bf16 %v960_v30, %v959_v28  ;;  %v962_v43 = vld [vmem:[%s9602_s2 + $0x38] sm:$0xff]  ;;  %v741_v44 = vld [vmem:[%s9602_s2] sm:$0xff]  ;;  %v742_v46 = vld [vmem:[%s9602_s2 + $0x8] sm:$0xff]  ;;  %s6063_s12 = sshll.u32 %s8252_s13, 7 }
  0x3e   : > { %s8269_s26 = scalar_lea.vmem %s9600_s0, %s6239_s14  ;;  %7234 = vmatprep.subr.bf16.mxu0 %v7233_v5  ;;  %v8359_v45 = vpack.c.bf16 %v962_v43, %v961_v42  ;;  %v7245_v49 = vpack.c.bf16 %v742_v46, %v741_v44  ;;  %v743_v50 = vld [vmem:[%s9602_s2 + $0x10] sm:$0xff]  ;;  %v744_v51 = vld [vmem:[%s9602_s2 + $0x18] sm:$0xff]  ;;  %v8382_v55 = vld [vmem:[%s8258_s15] sm:$0xff]  ;;  %s9487_s14 = scalar_lea.vmem [#allocation7], %s6063_s12 }
  0x3f   : > { %v271_v8 = vld [vmem:[%s8269_s26] sm:$0xff]  ;;  %v272_v13 = vld [vmem:[%s8269_s26 + $0x8] sm:$0xff]  ;;  %v273_v14 = vld [vmem:[%s8269_s26 + $0x10] sm:$0xff]  ;;  %v7249_v52 = vpack.c.bf16 %v744_v51, %v743_v50  ;;  %s8112_s16 = smov 96   ;;  %s265_s25 = scalar_lea.vmem [#allocation8], %s6062_s17 }
  0x40   : > { %6581 = vmatprep.mubr.msk.f32.mxu0 %vm295_vm0, %v271_v8  ;;  %v274_v15 = vld [vmem:[%s8269_s26 + $0x18] sm:$0xff]  ;;  %v275_v16 = vld [vmem:[%s8269_s26 + $0x20] sm:$0xff]  ;;  %v276_v17 = vld [vmem:[%s8269_s26 + $0x28] sm:$0xff]  ;;  %7246 = vmatprep.subr.bf16.mxu1 %v7245_v49  ;;  %s6236_s17 = sshll.u32 %s8168_s22, 7  ;;  %s5913_s29 = scalar_lea.sflag [#allocation9], %s8252_s13 }
  0x41   : > { %7236 = vmatpush3.bf16.msra.mxu0 %v7233_v5  ;;  %v277_v22 = vld [vmem:[%s8269_s26 + $0x30] sm:$0xff]  ;;  %v278_v23 = vld [vmem:[%s8269_s26 + $0x38] sm:$0xff]  ;;  %v279_v24 = vld [vmem:[%s8269_s26 + $0x40] sm:$0xff]  ;;  %7248 = vmatpush3.bf16.msra.mxu1 %v7245_v49  ;;  %s9527_s9 = scalar_lea.hbm %s9605_s5, %s6236_s17  ;;  %p9614_p12 = scmp.ne.s32.totalorder %s9609_s30, 0 }
  0x42   : > { %7238 = vmatprep.subr.bf16.mxu0 %v7237_v9  ;;  %v280_v25 = vld [vmem:[%s8269_s26 + $0x48] sm:$0xff]  ;;  %v281_v26 = vld [vmem:[%s8269_s26 + $0x50] sm:$0xff]  ;;  %v282_v27 = vld [vmem:[%s8269_s26 + $0x58] sm:$0xff]  ;;  %7250 = vmatprep.subr.bf16.mxu1 %v7249_v52  ;;  %s8113_s11 = smov [#allocation8]  }
  0x43   : > { %v283_v47 = vld [vmem:[%s8269_s26 + $0x60] sm:$0xff]  ;;  %v284_v48 = vld [vmem:[%s8269_s26 + $0x68] sm:$0xff]  ;;  %v285_v53 = vld [vmem:[%s8269_s26 + $0x70] sm:$0xff]  ;;  %s8010_s23 = sshll.u32 %s8113_s11, 4  ;;  %s8011_s23 = int_to_ptr.vmem [resolvable:$false] %s8010_s23 }
  0x44   : > { %v286_v54 = vld [vmem:[%s8269_s26 + $0x78] sm:$0xff]  ;;  %s8012_s15 = scalar_lea.vmem %s8011_s23, 256 }
  0x45   : > { %7240 = vmatpush3.bf16.msra.mxu0 %v7237_v9  ;;  %7252 = vmatpush3.bf16.msra.mxu1 %v7249_v52 }
  0x46   : > { %7242 = vmatprep.subr.bf16.mxu0 %v7241_v12  ;;  %7253 = vmatprep.subr.bf16.mxu1 %v8107_v29 }
  0x49   : > { %7244 = vmatpush3.bf16.msra.mxu0 %v7241_v12 }
  0x4a   : > { %7259 = vmatprep.subr.bf16.mxu0 %v8107_v29 }
  0x4c   : > { %6582 = vmatmul.mubr.msk.f32.vlgmr.msra.gmra.mrb[0].mxu0 %vm295_vm0, %v272_v13 }
  0x4d   : > { %6584 = vmatprep.mubr.msk.f32.mxu0 %vm295_vm0, %v273_v14  ;;  %7261 = vmatpush3.bf16.msra.mxu0 %v8334_v31 }
  0x4e   : > { %7262 = vmatprep.subr.bf16.mxu0 %v8107_v29 }
  0x50   : > { %6585 = vmatmul.mubr.msk.f32.gmra.mrb[2].mxu0 %vm295_vm0, %v274_v15 }
  0x51   : > { %6587 = vmatprep.mubr.msk.f32.mxu0 %vm295_vm0, %v275_v16  ;;  %7264 = vmatpush3.bf16.msra.mxu0 %v8359_v45 }
  0x52   : > { %7271 = vmatprep.subr.bf16.mxu0 %v8107_v29 }
  0x54   : > { %6588 = vmatmul.mubr.msk.f32.gmra.mrb[4].mxu0 %vm295_vm0, %v276_v17 }
  0x55   : > { %6590 = vmatprep.mubr.msk.f32.mxu0 %vm295_vm0, %v277_v22 }
  0x58   : > { %6591 = vmatmul.mubr.msk.f32.gmra.mrb[6].mxu0 %vm295_vm0, %v278_v23  ;;  %v8437_v23 = vld [vmem:[%s9603_s3 + $0x3] ss:$0 sm:$0xff] }
  0x59   : > { %6593 = vmatprep.mubr.msk.f32.mxu0 %vm295_vm0, %v279_v24 }
  0x5c   : > { %6594 = vmatmul.mubr.msk.f32.gmra.mrb[8].mxu0 %vm295_vm0, %v280_v25 }
  0x5d   : > { %6596 = vmatprep.mubr.msk.f32.mxu0 %vm295_vm0, %v281_v26 }
  0x60   : > { %6597 = vmatmul.mubr.msk.f32.gmra.mrb[10].mxu0 %vm295_vm0, %v282_v27 }
  0x61   : > { %6599 = vmatprep.mubr.msk.f32.mxu0 %vm295_vm0, %v283_v47 }
  0x64   : > { %6600 = vmatmul.mubr.msk.f32.gmra.mrb[12].mxu0 %vm295_vm0, %v284_v48 }
  0x65   : > { %6602 = vmatprep.mubr.msk.f32.mxu0 %vm295_vm0, %v285_v53 }
  0x68   : > { %6603 = vmatmul.mubr.msk.f32.gmra.mrb[14].mxu0 %vm295_vm0, %v286_v54 }
  0x69   : > { %6656 = vmatprep.mubr.msk.f32.mxu0 %vm8108_vm2, %v8109_v57 }
  0x6c   : > { %6657 = vmatmul.mubr.msk.f32.vlgmr.msra.gmra.mrb[16].mxu0 %vm491_vm1, %v8382_v55 }
  0x6d   : > { %6678 = vmatprep.mubr.msk.f32.mxu0 %vm8108_vm2, %v8109_v57 }
 0x11f   : > { %v8307_v18 = vpop.f32.mrb[0].mxu0 }
 0x120   : > { %v8309_v19 = vpop.f32.mrb[1].mxu0  ;;  %v495_v21 = vsel %vm491_vm1, %v8307_v18, 0.0 }
 0x121   : > { %v492_v20 = vsel %vm491_vm1, %v8309_v19, 0.0 }
 0x122   : > { %493 = vadd.xlane.f32.xlu0 %v492_v20 }
 0x123   : > { %v8384_v56 = vpop.f32.mrb[2].mxu0 }
 0x124   : > { %v8388_v58 = vpop.f32.mrb[3].mxu0  ;;  %v501_v62 = vsel %vm491_vm1, %v8384_v56, 0.0 }
 0x125   : > { %v498_v59 = vsel %vm491_vm1, %v8388_v58, 0.0 }
 0x126   : > { %496 = vadd.xlane.f32.xlu0 %v495_v21  ;;  %v8431_v21 = vld [vmem:[%s9603_s3 + $0x2] ss:$0 sm:$0xff] }
 0x127   : > { %v8394_v60 = vpop.f32.mrb[4].mxu0 }
 0x128   : > { %v8396_v61 = vpop.f32.mrb[5].mxu0  ;;  %v507_v0 = vsel %vm491_vm1, %v8394_v60, 0.0 }
 0x129   : > { %v504_v63 = vsel %vm491_vm1, %v8396_v61, 0.0 }
 0x12b   : > { %v8406_v1 = vpop.f32.mrb[6].mxu0 }
 0x12c   : > { %v8408_v2 = vpop.f32.mrb[7].mxu0  ;;  %v513_v4 = vsel %vm491_vm1, %v8406_v1, 0.0 }
 0x12d   : > { %v510_v3 = vsel %vm491_vm1, %v8408_v2, 0.0 }
 0x12f   : > { %v8414_v5 = vpop.f32.mrb[8].mxu0 }
 0x130   : > { %v519_v6 = vsel %vm491_vm1, %v8414_v5, 0.0  ;;  %v8418_v7 = vpop.f32.mrb[9].mxu0 }
 0x131   : > { %v516_v47 = vsel %vm491_vm1, %v8418_v7, 0.0 }
 0x133   : > { %v8420_v8 = vpop.f32.mrb[10].mxu0 }
 0x134   : > { %v8422_v9 = vpop.f32.mrb[11].mxu0  ;;  %v525_v11 = vsel %vm491_vm1, %v8420_v8, 0.0 }
 0x135   : > { %v522_v10 = vsel %vm491_vm1, %v8422_v9, 0.0 }
 0x1af   : > { %v494_v32 = vpop.xlane.xlu0 %493 }
 0x1b0   : > { %v541_v33 = vmul.f32 0.03125, %v494_v32  ;;  %v8446_v32 = vpop.f32.mrb[12].mxu0 }
 0x1b2   : > { %v8339_v34 = vsub.f32 %v8309_v19, %v541_v33  ;;  %v8448_v33 = vpop.f32.mrb[13].mxu0 }
 0x1b3   : > { %v497_v35 = vpop.xlane.xlu0 %496  ;;  %v528_v49 = vsel %vm491_vm1, %v8448_v33, 0.0 }
 0x1b4   : > { %v542_v36 = vmul.f32 0.03125, %v497_v35  ;;  %v573_v37 = vmul.f32 %v8339_v34, %v8339_v34 }
 0x1b6   : > { %v8344_v38 = vsub.f32 %v8307_v18, %v542_v36  ;;  %v589_v39 = vsel %vm491_vm1, %v573_v37, 0.0 }
 0x1b7   : > { %590 = vadd.xlane.f32.xlu1 %v589_v39 }
 0x1b8   : > { %v574_v40 = vmul.f32 %v8344_v38, %v8344_v38 }
 0x1ba   : > { %v592_v41 = vsel %vm491_vm1, %v574_v40, 0.0 }
 0x1bb   : > { %593 = vadd.xlane.f32.xlu1 %v592_v41 }
 0x1bf   : > { %499 = vadd.xlane.f32.xlu1 %v498_v59 }
 0x1c3   : > { %502 = vadd.xlane.f32.xlu1 %v501_v62 }
 0x1c7   : > { %505 = vadd.xlane.f32.xlu1 %v504_v63 }
 0x1cb   : > { %508 = vadd.xlane.f32.xlu1 %v507_v0 }
 0x1cf   : > { %511 = vadd.xlane.f32.xlu1 %v510_v3 }
 0x1d3   : > { %514 = vadd.xlane.f32.xlu1 %v513_v4 }
 0x1d7   : > { %520 = vadd.xlane.f32.xlu1 %v519_v6 }
 0x1db   : > { %523 = vadd.xlane.f32.xlu1 %v522_v10 }
 0x1df   : > { %526 = vadd.xlane.f32.xlu1 %v525_v11 }
 0x244   : > { %v591_v12 = vpop.xlane.xlu1 %590 }
 0x245   : > { %v637_v13 = vmul.f32 0.03125, %v591_v12 }
 0x247   : > { %v653_v14 = vadd.f32 1e-07, %v637_v13 }
 0x248   : > { %v594_v15 = vpop.xlane.xlu1 %593 }
 0x249   : > { %7620 = vrsqrt.f32 %v653_v14  ;;  %v638_v16 = vmul.f32 0.03125, %v594_v15 }
 0x24b   : > { %v654_v17 = vadd.f32 1e-07, %v638_v16 }
 0x24c   : > { %v500_v44 = vpop.xlane.xlu1 %499 }
 0x24d   : > { %7622 = vrsqrt.f32 %v654_v17  ;;  %v543_v48 = vmul.f32 0.03125, %v500_v44 }
 0x24f   : > { %v8468_v51 = vsub.f32 %v8388_v58, %v543_v48 }
 0x250   : > { %v503_v46 = vpop.xlane.xlu1 %502 }
 0x251   : > { %v544_v52 = vmul.f32 0.03125, %v503_v46  ;;  %v575_v0 = vmul.f32 %v8468_v51, %v8468_v51 }
 0x253   : > { %v7621_v20 = vpop.eup %7620  ;;  %v8473_v59 = vsub.f32 %v8384_v56, %v544_v52  ;;  %v595_v6 = vsel %vm491_vm1, %v575_v0, 0.0 }
 0x254   : > { %v685_v22 = vmul.f32 %v7621_v20, %v8339_v34  ;;  %v8450_v34 = vpop.f32.mrb[14].mxu0  ;;  %v506_v50 = vpop.xlane.xlu1 %505 }
 0x255   : > { %v8452_v35 = vpop.f32.mrb[15].mxu0  ;;  %v545_v62 = vmul.f32 0.03125, %v506_v50  ;;  %v537_v63 = vsel %vm491_vm1, %v8450_v34, 0.0  ;;  %v576_v10 = vmul.f32 %v8473_v59, %v8473_v59 }
 0x256   : > { %v705_v24 = vmul.f32 %v8431_v21, %v685_v22  ;;  %v1117_v36 = vpop.f32.mrb[16].mxu0  ;;  %v534_v53 = vsel %vm491_vm1, %v8452_v35, 0.0 }
 0x257   : > { %v7623_v25 = vpop.eup %7622  ;;  %v6658_v37 = vpop.f32.mrb[17].mxu0  ;;  %v8480_v3 = vsub.f32 %v8396_v61, %v545_v62  ;;  %v598_v14 = vsel %vm491_vm1, %v576_v10, 0.0 }
 0x258   : > { %v725_v26 = vadd.f32 %v8437_v23, %v705_v24  ;;  %v686_v27 = vmul.f32 %v7623_v25, %v8344_v38  ;;  %v8457_v38 = vld [vmem:[%s9603_s3] ss:$0 sm:$0xff]  ;;  %v509_v54 = vpop.xlane.xlu1 %508 }
 0x259   : > { %v546_v4 = vmul.f32 0.03125, %v509_v54  ;;  %v577_v15 = vmul.f32 %v8480_v3, %v8480_v3 }
 0x25a   : > { %6613 = vmatprep.mubr.msk.f32.mxu1 %vm491_vm1, %v725_v26  ;;  %v706_v28 = vmul.f32 %v8431_v21, %v686_v27 }
 0x25b   : > { %v8486_v12 = vsub.f32 %v8394_v60, %v546_v4  ;;  %v601_v22 = vsel %vm491_vm1, %v577_v15, 0.0 }
 0x25c   : > { %v726_v30 = vadd.f32 %v8437_v23, %v706_v28  ;;  %v512_v11 = vpop.xlane.xlu1 %511 }
 0x25d   : > { %v547_v13 = vmul.f32 0.03125, %v512_v11  ;;  %v578_v24 = vmul.f32 %v8486_v12, %v8486_v12 }
 0x25e   : > { %6614 = vmatmul.mubr.msk.f32.vlgmr.msra.gmra.mrb[0].mxu1 %vm491_vm1, %v726_v30 }
 0x25f   : > { %v8492_v17 = vsub.f32 %v8408_v2, %v547_v13  ;;  %v604_v26 = vsel %vm491_vm1, %v578_v24, 0.0 }
 0x260   : > { %v515_v16 = vpop.xlane.xlu1 %514 }
 0x261   : > { %v548_v20 = vmul.f32 0.03125, %v515_v16  ;;  %v579_v27 = vmul.f32 %v8492_v17, %v8492_v17 }
 0x263   : > { %v8498_v25 = vsub.f32 %v8406_v1, %v548_v20  ;;  %v607_v28 = vsel %vm491_vm1, %v579_v27, 0.0 }
 0x264   : > { %v521_v48 = vpop.xlane.xlu1 %520 }
 0x265   : > { %v580_v30 = vmul.f32 %v8498_v25, %v8498_v25  ;;  %v550_v50 = vmul.f32 0.03125, %v521_v48 }
 0x331   : > { %v8459_v39 = vpop.f32.mrb[0].mxu1 }
 0x332   : > { %v864_v40 = vpop.f32.mrb[1].mxu1 }
 0x333   : > { %v865_v41 = vadd.f32 %v8457_v38, %v864_v40 }
 0x335   : > { %v1121_v42 = vadd.f32 %v1117_v36, %v865_v41  ;;  %v610_v36 = vsel %vm491_vm1, %v580_v30, 0.0 }
 0x337   : > { %7624 = vtanh.f32 %v1121_v42  ;;  %v6104_v37 = vmul.f32 -1.442695, %v1121_v42 }
 0x339   : > { %7626 = vpow2.f32 %v6104_v37 }
 0x341   : > { %v7625_v43 = vpop.eup %7624 }
 0x342   : > { %1131 = vrot.lane.b32.xlu0 %v7625_v43, %s8110_s28 }
 0x343   : > { %v7627_v40 = vpop.eup %7626 }
 0x344   : > { %v1125_v41 = vadd.f32 1.0, %v7627_v40 }
 0x346   : > { %7628 = vrcp.f32 %v1125_v41 }
 0x350   : > { %v8507_v43 = vpop.eup %7628 }
 0x361   : > { %517 = vadd.xlane.f32.xlu0 %v516_v47  ;;  %v531_v47 = vsel %vm491_vm1, %v8446_v32, 0.0 }
 0x365   : > { %529 = vadd.xlane.f32.xlu0 %v528_v49  ;;  %v524_v49 = vpop.xlane.xlu1 %523 }
 0x366   : > { %v551_v54 = vmul.f32 0.03125, %v524_v49 }
 0x369   : > { %535 = vadd.xlane.f32.xlu0 %v534_v53  ;;  %v8514_v53 = vsub.f32 %v8414_v5, %v550_v50 }
 0x36b   : > { %v582_v13 = vmul.f32 %v8514_v53, %v8514_v53 }
 0x36d   : > { %538 = vadd.xlane.f32.xlu0 %v537_v63  ;;  %v527_v63 = vpop.xlane.xlu1 %526  ;;  %v616_v20 = vsel %vm491_vm1, %v582_v13, 0.0 }
 0x36e   : > { %v552_v10 = vmul.f32 0.03125, %v527_v63 }
 0x370   : > { %v8530_v15 = vsub.f32 %v8420_v8, %v552_v10 }
 0x371   : > { %596 = vadd.xlane.f32.xlu0 %v595_v6  ;;  %v8522_v6 = vsub.f32 %v8422_v9, %v551_v54 }
 0x375   : > { %599 = vadd.xlane.f32.xlu0 %v598_v14 }
 0x379   : > { %602 = vadd.xlane.f32.xlu0 %v601_v22  ;;  %v583_v22 = vmul.f32 %v8522_v6, %v8522_v6 }
 0x37b   : > { %v619_v27 = vsel %vm491_vm1, %v583_v22, 0.0 }
 0x37d   : > { %605 = vadd.xlane.f32.xlu0 %v604_v26 }
 0x381   : > { %608 = vadd.xlane.f32.xlu0 %v607_v28  ;;  %v584_v28 = vmul.f32 %v8530_v15, %v8530_v15 }
 0x383   : > { %v622_v40 = vsel %vm491_vm1, %v584_v28, 0.0 }
 0x385   : > { %611 = vadd.xlane.f32.xlu0 %v610_v36 }
 0x3b4   : > { %v1132_v44 = vpop.permute.xlu0 %1131 }
 0x3b5   : > { %v1134_v46 = vmul.f32 %v8507_v43, %v1132_v44 }
 0x3b7   : > { %1136 = vrot.lane.b32.xlu1 %v1134_v46, %s8111_s8 }
 0x3db   : > { %532 = vadd.xlane.f32.xlu1 %v531_v47 }
 0x3ee   : > { %v518_v42 = vpop.xlane.xlu0 %517 }
 0x3ef   : > { %v549_v52 = vmul.f32 0.03125, %v518_v42 }
 0x3f1   : > { %v8517_v62 = vsub.f32 %v8418_v7, %v549_v52 }
 0x3f2   : > { %v530_v0 = vpop.xlane.xlu0 %529 }
 0x3f3   : > { %v581_v4 = vmul.f32 %v8517_v62, %v8517_v62  ;;  %v553_v16 = vmul.f32 0.03125, %v530_v0 }
 0x3f5   : > { %v613_v11 = vsel %vm491_vm1, %v581_v4, 0.0  ;;  %v8538_v26 = vsub.f32 %v8448_v33, %v553_v16 }
 0x3f6   : > { %614 = vadd.xlane.f32.xlu1 %v613_v11  ;;  %v8527_v14 = vpop.xlane.xlu0 %535 }
 0x3f7   : > { %v585_v41 = vmul.f32 %v8538_v26, %v8538_v26 }
 0x3f9   : > { %v625_v48 = vsel %vm491_vm1, %v585_v41, 0.0 }
 0x3fa   : > { %617 = vadd.xlane.f32.xlu1 %v616_v20  ;;  %v8535_v24 = vpop.xlane.xlu0 %538 }
 0x3fe   : > { %620 = vadd.xlane.f32.xlu1 %v619_v27  ;;  %v597_v30 = vpop.xlane.xlu0 %596 }
 0x3ff   : > { %v639_v36 = vmul.f32 0.03125, %v597_v30 }
 0x401   : > { %v655_v37 = vadd.f32 1e-07, %v639_v36 }
 0x402   : > { %623 = vadd.xlane.f32.xlu1 %v622_v40  ;;  %v600_v44 = vpop.xlane.xlu0 %599 }
 0x403   : > { %7630 = vrsqrt.f32 %v655_v37  ;;  %v640_v46 = vmul.f32 0.03125, %v600_v44 }
 0x405   : > { %v656_v47 = vadd.f32 1e-07, %v640_v46 }
 0x406   : > { %626 = vadd.xlane.f32.xlu1 %v625_v48  ;;  %v603_v49 = vpop.xlane.xlu0 %602 }
 0x407   : > { %7632 = vrsqrt.f32 %v656_v47  ;;  %v641_v50 = vmul.f32 0.03125, %v603_v49 }
 0x409   : > { %v657_v42 = vadd.f32 1e-07, %v641_v50 }
 0x40a   : > { %v606_v52 = vpop.xlane.xlu0 %605 }
 0x40b   : > { %7634 = vrsqrt.f32 %v657_v42  ;;  %v642_v54 = vmul.f32 0.03125, %v606_v52 }
 0x40d   : > { %v7631_v63 = vpop.eup %7630  ;;  %v658_v0 = vadd.f32 1e-07, %v642_v54 }
 0x40e   : > { %v609_v4 = vpop.xlane.xlu0 %608  ;;  %v687_v10 = vmul.f32 %v7631_v63, %v8468_v51 }
 0x40f   : > { %7636 = vrsqrt.f32 %v658_v0  ;;  %v643_v11 = vmul.f32 0.03125, %v609_v4 }
 0x410   : > { %v707_v13 = vmul.f32 %v8431_v21, %v687_v10 }
 0x411   : > { %v7633_v16 = vpop.eup %7632  ;;  %v659_v20 = vadd.f32 1e-07, %v643_v11 }
 0x412   : > { %v612_v22 = vpop.xlane.xlu0 %611  ;;  %v727_v27 = vadd.f32 %v8437_v23, %v707_v13  ;;  %v688_v28 = vmul.f32 %v7633_v16, %v8473_v59 }
 0x413   : > { %7638 = vrsqrt.f32 %v659_v20  ;;  %v644_v30 = vmul.f32 0.03125, %v612_v22  ;;  %v556_v22 = vmul.f32 0.03125, %v8535_v24  ;;  %v967_v24 = vld [vmem:[%s9602_s2 + $0x60] sm:$0xff] }
 0x414   : > { %6616 = vmatprep.mubr.msk.f32.mxu1 %vm491_vm1, %v727_v27  ;;  %v708_v36 = vmul.f32 %v8431_v21, %v688_v28 }
 0x415   : > { %v7635_v37 = vpop.eup %7634  ;;  %v660_v40 = vadd.f32 1e-07, %v644_v30  ;;  %v8586_v30 = vsub.f32 %v8450_v34, %v556_v22 }
 0x416   : > { %v728_v51 = vadd.f32 %v8437_v23, %v708_v36  ;;  %v689_v41 = vmul.f32 %v7635_v37, %v8480_v3 }
 0x417   : > { %7640 = vrsqrt.f32 %v660_v40  ;;  %v588_v40 = vmul.f32 %v8586_v30, %v8586_v30 }
 0x418   : > { %6617 = vmatmul.mubr.msk.f32.gmra.mrb[2].mxu1 %vm491_vm1, %v728_v51  ;;  %v709_v44 = vmul.f32 %v8431_v21, %v689_v41  ;;  %v968_v41 = vld [vmem:[%s9602_s2 + $0x68] sm:$0xff] }
 0x419   : > { %v7637_v46 = vpop.eup %7636  ;;  %v634_v51 = vsel %vm491_vm1, %v588_v40, 0.0 }
 0x41a   : > { %v729_v59 = vadd.f32 %v8437_v23, %v709_v44  ;;  %v690_v47 = vmul.f32 %v7637_v46, %v8486_v12  ;;  %v8603_v44 = vpack.c.bf16 %v968_v41, %v967_v24 }
 0x41c   : > { %6619 = vmatprep.mubr.msk.f32.mxu1 %vm491_vm1, %v729_v59  ;;  %v710_v48 = vmul.f32 %v8431_v21, %v690_v47  ;;  %7255 = vmatpush3.bf16.msra.mxu1 %v8603_v44 }
 0x41d   : > { %v7639_v49 = vpop.eup %7638  ;;  %7273 = vmatpush3.bf16.msra.mxu0 %v8603_v44  ;;  %7256 = vmatprep.subr.bf16.mxu1 %v8107_v29 }
 0x41e   : > { %v730_v50 = vadd.f32 %v8437_v23, %v710_v48  ;;  %v691_v42 = vmul.f32 %v7639_v49, %v8492_v17  ;;  %v1129_v17 = vmul.f32 %v8507_v43, %v8382_v55  ;;  %7274 = vmatprep.subr.bf16.mxu0 %v8107_v29  ;;  %v969_v48 = vld [vmem:[%s9602_s2 + $0x70] sm:$0xff]  ;;  %v970_v49 = vld [vmem:[%s9602_s2 + $0x78] sm:$0xff] }
 0x420   : > { %6620 = vmatmul.mubr.msk.f32.gmra.mrb[4].mxu1 %vm491_vm1, %v730_v50  ;;  %v711_v3 = vmul.f32 %v8431_v21, %v691_v42  ;;  %v8617_v42 = vpack.c.bf16 %v970_v49, %v969_v48 }
 0x421   : > { %v7641_v52 = vpop.eup %7640 }
 0x422   : > { %v731_v54 = vadd.f32 %v8437_v23, %v711_v3  ;;  %v692_v63 = vmul.f32 %v7641_v52, %v8498_v25  ;;  %v555_v25 = vmul.f32 0.03125, %v8527_v14  ;;  %7258 = vmatpush3.bf16.msra.mxu1 %v8617_v42  ;;  %7276 = vmatpush3.bf16.msra.mxu0 %v8617_v42 }
 0x423   : > { %7265 = vmatprep.subr.bf16.mxu1 %v8107_v29  ;;  %7283 = vmatprep.subr.bf16.mxu0 %v8107_v29 }
 0x424   : > { %6622 = vmatprep.mubr.msk.f32.mxu1 %vm491_vm1, %v731_v54  ;;  %v712_v12 = vmul.f32 %v8431_v21, %v692_v63  ;;  %v8579_v13 = vsub.f32 %v8452_v35, %v555_v25 }
 0x426   : > { %v732_v0 = vadd.f32 %v8437_v23, %v712_v12  ;;  %v587_v16 = vmul.f32 %v8579_v13, %v8579_v13 }
 0x428   : > { %6623 = vmatmul.mubr.msk.f32.gmra.mrb[6].mxu1 %vm491_vm1, %v732_v0  ;;  %v631_v20 = vsel %vm491_vm1, %v587_v16, 0.0 }
 0x429   : > { %v1137_v4 = vpop.permute.xlu1 %1136 }
 0x42a   : > { %v8573_v10 = vadd.f32 %v1137_v4, %v1129_v17 }
 0x42c   : > { %7642 = vtanh.f32 %v8573_v10 }
 0x436   : > { %v7643_v11 = vpop.eup %7642 }
 0x437   : > { %1142 = vrot.lane.b32.xlu0 %v7643_v11, %s8110_s28 }
 0x456   : > { %632 = vadd.xlane.f32.xlu0 %v631_v20 }
 0x468   : > { %v533_v27 = vpop.xlane.xlu1 %532 }
 0x469   : > { %v554_v28 = vmul.f32 0.03125, %v533_v27 }
 0x46b   : > { %v8589_v36 = vsub.f32 %v8446_v32, %v554_v28 }
 0x46d   : > { %v586_v14 = vmul.f32 %v8589_v36, %v8589_v36 }
 0x46f   : > { %v628_v37 = vsel %vm491_vm1, %v586_v14, 0.0 }
 0x470   : > { %629 = vadd.xlane.f32.xlu1 %v628_v37 }
 0x474   : > { %635 = vadd.xlane.f32.xlu1 %v634_v51 }
 0x483   : > { %v615_v46 = vpop.xlane.xlu1 %614 }
 0x484   : > { %v645_v59 = vmul.f32 0.03125, %v615_v46 }
 0x485   : > { %974 = vrot.lane.b32.xlu1 %v8382_v55, %s8110_s28 }
 0x486   : > { %v661_v47 = vadd.f32 1e-07, %v645_v59 }
 0x487   : > { %v618_v50 = vpop.xlane.xlu1 %617 }
 0x488   : > { %7644 = vrsqrt.f32 %v661_v47  ;;  %v646_v3 = vmul.f32 0.03125, %v618_v50 }
 0x48a   : > { %v662_v52 = vadd.f32 1e-07, %v646_v3 }
 0x48b   : > { %v621_v55 = vpop.xlane.xlu1 %620 }
 0x48c   : > { %7646 = vrsqrt.f32 %v662_v52  ;;  %v647_v54 = vmul.f32 0.03125, %v621_v55 }
 0x48e   : > { %v663_v63 = vadd.f32 1e-07, %v647_v54 }
 0x48f   : > { %v624_v12 = vpop.xlane.xlu1 %623 }
 0x490   : > { %7648 = vrsqrt.f32 %v663_v63  ;;  %v648_v0 = vmul.f32 0.03125, %v624_v12 }
 0x492   : > { %v7645_v17 = vpop.eup %7644  ;;  %v664_v4 = vadd.f32 1e-07, %v648_v0 }
 0x493   : > { %v627_v11 = vpop.xlane.xlu1 %626  ;;  %v693_v25 = vmul.f32 %v7645_v17, %v8517_v62 }
 0x494   : > { %7650 = vrsqrt.f32 %v664_v4  ;;  %v649_v16 = vmul.f32 0.03125, %v627_v11 }
 0x495   : > { %v713_v20 = vmul.f32 %v8431_v21, %v693_v25 }
 0x496   : > { %v7647_v22 = vpop.eup %7646  ;;  %v665_v27 = vadd.f32 1e-07, %v649_v16 }
 0x497   : > { %v733_v28 = vadd.f32 %v8437_v23, %v713_v20  ;;  %v694_v14 = vmul.f32 %v7647_v22, %v8514_v53 }
 0x498   : > { %7652 = vrsqrt.f32 %v665_v27 }
 0x499   : > { %6625 = vmatprep.mubr.msk.f32.mxu1 %vm491_vm1, %v733_v28  ;;  %v714_v37 = vmul.f32 %v8431_v21, %v694_v14 }
 0x49a   : > { %v7649_v40 = vpop.eup %7648 }
 0x49b   : > { %v734_v51 = vadd.f32 %v8437_v23, %v714_v37  ;;  %v695_v62 = vmul.f32 %v7649_v40, %v8522_v6 }
 0x49d   : > { %6626 = vmatmul.mubr.msk.f32.gmra.mrb[8].mxu1 %vm491_vm1, %v734_v51  ;;  %v715_v24 = vmul.f32 %v8431_v21, %v695_v62 }
 0x49e   : > { %v7651_v41 = vpop.eup %7650 }
 0x49f   : > { %v735_v46 = vadd.f32 %v8437_v23, %v715_v24  ;;  %v696_v59 = vmul.f32 %v7651_v41, %v8530_v15 }
 0x4a1   : > { %6628 = vmatprep.mubr.msk.f32.mxu1 %vm491_vm1, %v735_v46  ;;  %v716_v53 = vmul.f32 %v8431_v21, %v696_v59 }
 0x4a2   : > { %v7653_v47 = vpop.eup %7652 }
 0x4a3   : > { %v736_v48 = vadd.f32 %v8437_v23, %v716_v53  ;;  %v697_v49 = vmul.f32 %v7653_v47, %v8538_v26  ;;  %v964_v53 = vld [vmem:[%s9602_s2 + $0x48] sm:$0xff]  ;;  %v966_v47 = vld [vmem:[%s9602_s2 + $0x58] sm:$0xff] }
 0x4a5   : > { %6629 = vmatmul.mubr.msk.f32.gmra.mrb[10].mxu1 %vm491_vm1, %v736_v48  ;;  %v717_v6 = vmul.f32 %v8431_v21, %v697_v49 }
 0x4a7   : > { %v737_v50 = vadd.f32 %v8437_v23, %v717_v6 }
 0x4a9   : > { %6631 = vmatprep.mubr.msk.f32.mxu1 %vm491_vm1, %v737_v50  ;;  %v1143_v3 = vpop.permute.xlu0 %1142 }
 0x4aa   : > { %v1145_v15 = vmul.f32 %v8507_v43, %v1143_v3 }
 0x4ac   : > { %1147 = vrot.lane.b32.xlu1 %v1145_v15, %s8111_s8 }
 0x4e3   : > { %v633_v54 = vpop.xlane.xlu0 %632 }
 0x4e4   : > { %v651_v12 = vmul.f32 0.03125, %v633_v54 }
 0x4e6   : > { %v667_v0 = vadd.f32 1e-07, %v651_v12 }
 0x4e8   : > { %7654 = vrsqrt.f32 %v667_v0 }
 0x4eb   : > { %v8645_v52 = vpop.f32.mrb[2].mxu1 }
 0x4ec   : > { %v8647_v55 = vpop.f32.mrb[3].mxu1 }
 0x4f2   : > { %v7655_v27 = vpop.eup %7654 }
 0x4f3   : > { %v8649_v63 = vpop.f32.mrb[4].mxu1  ;;  %v699_v28 = vmul.f32 %v7655_v27, %v8579_v13 }
 0x4f4   : > { %v8651_v26 = vpop.f32.mrb[5].mxu1 }
 0x4f5   : > { %v719_v40 = vmul.f32 %v8431_v21, %v699_v28 }
 0x4f7   : > { %v739_v46 = vadd.f32 %v8437_v23, %v719_v40 }
 0x4fb   : > { %v8653_v17 = vpop.f32.mrb[6].mxu1 }
 0x4fc   : > { %v8655_v4 = vpop.f32.mrb[7].mxu1 }
 0x4fd   : > { %v630_v11 = vpop.xlane.xlu1 %629 }
 0x4fe   : > { %v650_v43 = vmul.f32 0.03125, %v630_v11 }
 0x500   : > { %v666_v25 = vadd.f32 1e-07, %v650_v43 }
 0x501   : > { %v636_v16 = vpop.xlane.xlu1 %635 }
 0x502   : > { %7656 = vrsqrt.f32 %v666_v25  ;;  %v652_v20 = vmul.f32 0.03125, %v636_v16  ;;  %v8730_v16 = vld [vmem:[%s9603_s3 + $0x1] ss:$0 sm:$0xff] }
 0x504   : > { %v668_v22 = vadd.f32 1e-07, %v652_v20 }
 0x506   : > { %7658 = vrsqrt.f32 %v668_v22 }
 0x50c   : > { %v7657_v14 = vpop.eup %7656 }
 0x50d   : > { %v698_v37 = vmul.f32 %v7657_v14, %v8589_v36  ;;  %v963_v36 = vld [vmem:[%s9602_s2 + $0x40] sm:$0xff]  ;;  %v870_v14 = vadd.f32 %v8459_v39, %v8457_v38 }
 0x50f   : > { %v718_v51 = vmul.f32 %v8431_v21, %v698_v37 }
 0x510   : > { %v7659_v62 = vpop.eup %7658 }
 0x511   : > { %v738_v24 = vadd.f32 %v8437_v23, %v718_v51  ;;  %v700_v41 = vmul.f32 %v7659_v62, %v8586_v30  ;;  %v8675_v30 = vpop.permute.xlu1 %974 }
 0x513   : > { %6632 = vmatmul.mubr.msk.f32.gmra.mrb[12].mxu1 %vm491_vm1, %v738_v24  ;;  %v720_v59 = vmul.f32 %v8431_v21, %v700_v41  ;;  %v8679_v21 = vpack.c.bf16 %v964_v53, %v963_v36 }
 0x514   : > { %6634 = vmatprep.mubr.msk.f32.mxu1 %vm491_vm1, %v739_v46 }
 0x515   : > { %v740_v13 = vadd.f32 %v8437_v23, %v720_v59  ;;  %v965_v23 = vld [vmem:[%s9602_s2 + $0x50] sm:$0xff] }
 0x516   : > { %v8690_v48 = vpack.c.bf16 %v966_v47, %v965_v23 }
 0x517   : > { %6635 = vmatmul.mubr.msk.f32.gmra.mrb[14].mxu1 %vm491_vm1, %v740_v13 }
 0x518   : > { %6645 = vmatprep.mubr.msk.f32.mxu1 %vm8108_vm2, %v8109_v57 }
 0x51b   : > { %6646 = vmatmul.mubr.msk.f32.vlgmr.msra.gmra.mrb[16].mxu1 %vm491_vm1, %v8675_v30 }
 0x51c   : > { %7267 = vmatpush3.bf16.msra.mxu1 %v8679_v21  ;;  %6667 = vmatprep.mubr.msk.f32.mxu1 %vm8108_vm2, %v8109_v57 }
 0x51d   : > { %7268 = vmatprep.subr.bf16.mxu1 %v8107_v29 }
 0x51e   : > { %v1148_v49 = vpop.permute.xlu1 %1147 }
 0x520   : > { %7270 = vmatpush3.bf16.msra.mxu1 %v8690_v48 }
 0x521   : > { %7277 = vmatprep.subr.bf16.mxu1 %v8107_v29 }
 0x523   : > { %6668 = vmatmul.mubr.msk.f32.vlgmr.msra.gmra.mrb[18].mxu1 %vm491_vm1, %v1148_v49 }
 0x524   : > { %7279 = vmatpush3.bf16.msra.mxu1 %v8334_v31  ;;  %6689 = vmatprep.mubr.msk.f32.mxu1 %vm8108_vm2, %v8109_v57 }
 0x525   : > { %7280 = vmatprep.subr.bf16.mxu1 %v8107_v29 }
 0x528   : > { %7282 = vmatpush3.bf16.msra.mxu1 %v8359_v45 }
 0x529   : > { %7289 = vmatprep.subr.bf16.mxu1 %v8107_v29 }
 0x52b   : > { %6690 = vmatmul.mubr.msk.f32.vlgmr.msra.gmra.mrb[20].mxu1 %vm491_vm1, %v1148_v49 }
 0x52c   : > { %7291 = vmatpush3.bf16.msra.mxu1 %v8603_v44  ;;  %6711 = vmatprep.mubr.msk.f32.mxu1 %vm8108_vm2, %v8109_v57 }
 0x52d   : > { %7292 = vmatprep.subr.bf16.mxu1 %v8107_v29 }
 0x530   : > { %7294 = vmatpush3.bf16.msra.mxu1 %v8617_v42 }
 0x531   : > { %7301 = vmatprep.subr.bf16.mxu1 %v8107_v29 }
 0x570   : > { %v8711_v6 = vpop.f32.mrb[8].mxu1 }
 0x571   : > { %v8713_v50 = vpop.f32.mrb[9].mxu1 }
 0x578   : > { %v8715_v3 = vpop.f32.mrb[10].mxu1 }
 0x579   : > { %v8717_v15 = vpop.f32.mrb[11].mxu1 }
 0x5e6   : > { %v8719_v54 = vpop.f32.mrb[12].mxu1 }
 0x5e7   : > { %v8721_v12 = vpop.f32.mrb[13].mxu1 }
 0x5ea   : > { %v8723_v0 = vpop.f32.mrb[14].mxu1 }
 0x5eb   : > { %v8725_v11 = vpop.f32.mrb[15].mxu1 }
 0x5ee   : > { %v1044_v43 = vpop.f32.mrb[16].mxu1 }
 0x5ef   : > { %v6647_v25 = vpop.f32.mrb[17].mxu1 }
 0x5f6   : > { %v1217_v20 = vpop.f32.mrb[18].mxu1 }
 0x5f7   : > { %v1218_v22 = vadd.f32 %v1217_v20, %v1044_v43  ;;  %v6669_v27 = vpop.f32.mrb[19].mxu1 }
 0x5f9   : > { %v1225_v28 = vadd.f32 %v8730_v16, %v1218_v22 }
 0x5fb   : > { %7660 = vtanh.f32 %v1225_v28  ;;  %v6107_v41 = vmul.f32 -1.442695, %v1225_v28 }
 0x5fe   : > { %v1395_v37 = vpop.f32.mrb[20].mxu1 }
 0x5ff   : > { %v1399_v40 = vadd.f32 %v1395_v37, %v870_v14  ;;  %v6691_v51 = vpop.f32.mrb[21].mxu1 }
 0x601   : > { %7662 = vtanh.f32 %v1399_v40  ;;  %v6110_v46 = vmul.f32 -1.442695, %v1399_v40 }
 0x602   : > { %7664 = vpow2.f32 %v6107_v41 }
 0x603   : > { %7666 = vpow2.f32 %v6110_v46 }
 0x605   : > { %v7661_v62 = vpop.eup %7660 }
 0x606   : > { %1236 = vrot.lane.b32.xlu1 %v7661_v62, %s8110_s28 }
 0x60b   : > { %v7663_v24 = vpop.eup %7662 }
 0x60c   : > { %1409 = vrot.lane.b32.xlu0 %v7663_v24, %s8110_s28  ;;  %v7665_v59 = vpop.eup %7664 }
 0x60d   : > { %v1229_v13 = vadd.f32 1.0, %v7665_v59  ;;  %v7667_v36 = vpop.eup %7666 }
 0x60e   : > { %v1403_v53 = vadd.f32 1.0, %v7667_v36 }
 0x60f   : > { %7668 = vrcp.f32 %v1229_v13 }
 0x610   : > { %7670 = vrcp.f32 %v1403_v53 }
 0x619   : > { %v7669_v39 = vpop.eup %7668 }
 0x61a   : > { %v7671_v49 = vpop.eup %7670  ;;  %v1234_v20 = vmul.f32 %v7669_v39, %v8675_v30 }
 0x61b   : > { %v1407_v28 = vmul.f32 %v7671_v49, %v8573_v10 }
 0x678   : > { %v1237_v23 = vpop.permute.xlu1 %1236 }
 0x679   : > { %v1239_v47 = vmul.f32 %v7669_v39, %v1237_v23 }
 0x67b   : > { %1241 = vrot.lane.b32.xlu1 %v1239_v47, %s8111_s8  ;;  %v875_v47 = vadd.f32 %v8457_v38, %v8647_v55 }
 0x67e   : > { %v1410_v43 = vpop.permute.xlu0 %1409 }
 0x67f   : > { %v1412_v25 = vmul.f32 %v7671_v49, %v1410_v43 }
 0x681   : > { %1414 = vrot.lane.b32.xlu1 %v1412_v25, %s8111_s8 }
 0x6ed   : > { %v1242_v22 = vpop.permute.xlu1 %1241 }
 0x6ee   : > { %v8740_v27 = vadd.f32 %v1242_v22, %v1234_v20 }
 0x6f0   : > { %7672 = vtanh.f32 %v8740_v27 }
 0x6f3   : > { %v1415_v14 = vpop.permute.xlu1 %1414 }
 0x6f4   : > { %v8744_v37 = vadd.f32 %v1415_v14, %v1407_v28 }
 0x6f6   : > { %7674 = vtanh.f32 %v8744_v37 }
 0x6fa   : > { %v7673_v40 = vpop.eup %7672 }
 0x6fb   : > { %1247 = vrot.lane.b32.xlu1 %v7673_v40, %s8110_s28 }
 0x700   : > { %v7675_v51 = vpop.eup %7674 }
 0x701   : > { %1420 = vrot.lane.b32.xlu1 %v7675_v51, %s8110_s28 }
 0x76d   : > { %v1248_v62 = vpop.permute.xlu1 %1247 }
 0x76e   : > { %v1250_v30 = vmul.f32 %v7669_v39, %v1248_v62 }
 0x770   : > { %1252 = vrot.lane.b32.xlu1 %v1250_v30, %s8111_s8 }
 0x773   : > { %v1421_v24 = vpop.permute.xlu1 %1420 }
 0x774   : > { %v1423_v41 = vmul.f32 %v7671_v49, %v1421_v24 }
 0x776   : > { %1425 = vrot.lane.b32.xlu1 %v1423_v41, %s8111_s8 }
 0x7e2   : > { %v1253_v10 = vpop.permute.xlu1 %1252 }
 0x7e3   : > { %1255 = vst.msk [vmem:[#allocation3] sm:$0xff] %vm491_vm1, %v1253_v10  ;;  %6679 = vmatmul.mubr.msk.f32.vlgmr.msra.gmra.mrb[18].mxu0 %vm491_vm1, %v1253_v10 }
 0x7e4   : > { %7285 = vmatpush3.bf16.msra.mxu0 %v8679_v21  ;;  %6700 = vmatprep.mubr.msk.f32.mxu0 %vm8108_vm2, %v8109_v57 }
 0x7e5   : > { %7286 = vmatprep.subr.bf16.mxu0 %v8107_v29 }
 0x7e8   : > { %7288 = vmatpush3.bf16.msra.mxu0 %v8690_v48  ;;  %v1426_v46 = vpop.permute.xlu1 %1425 }
 0x7e9   : > { %7295 = vmatprep.subr.bf16.mxu0 %v8107_v29 }
 0x7eb   : > { %6701 = vmatmul.mubr.msk.f32.vlgmr.msra.gmra.mrb[20].mxu0 %vm491_vm1, %v1426_v46 }
 0x7ec   : > { %7297 = vmatpush3.bf16.msra.mxu0 %v8334_v31  ;;  %6722 = vmatprep.mubr.msk.f32.mxu0 %vm8108_vm2, %v8109_v57 }
 0x7ed   : > { %7298 = vmatprep.subr.bf16.mxu0 %v8107_v29 }
 0x7f0   : > { %7300 = vmatpush3.bf16.msra.mxu0 %v8359_v45 }
 0x7f1   : > { %7307 = vmatprep.subr.bf16.mxu0 %v8107_v29 }
 0x7f3   : > { %6723 = vmatmul.mubr.msk.f32.vlgmr.msra.gmra.mrb[22].mxu0 %vm491_vm1, %v1426_v46 }
 0x7f4   : > { %7309 = vmatpush3.bf16.msra.mxu0 %v8603_v44  ;;  %6744 = vmatprep.mubr.msk.f32.mxu0 %vm8108_vm2, %v8109_v57 }
 0x7f5   : > { %7310 = vmatprep.subr.bf16.mxu0 %v8107_v29 }
 0x7f8   : > { %7312 = vmatpush3.bf16.msra.mxu0 %v8617_v42 }
 0x7f9   : > { %7319 = vmatprep.subr.bf16.mxu0 %v8107_v29 }
 0x8b6   : > { %v1324_v59 = vpop.f32.mrb[18].mxu0 }
 0x8b7   : > { %v6680_v13 = vpop.f32.mrb[19].mxu0 }
 0x8be   : > { %v1495_v36 = vpop.f32.mrb[20].mxu0 }
 0x8bf   : > { %v1496_v53 = vadd.f32 %v1495_v36, %v1324_v59  ;;  %v6702_v39 = vpop.f32.mrb[21].mxu0 }
 0x8c1   : > { %v1499_v23 = vadd.f32 %v8730_v16, %v1496_v53 }
 0x8c3   : > { %7676 = vtanh.f32 %v1499_v23  ;;  %v6112_v28 = vmul.f32 -1.442695, %v1499_v23 }
 0x8c6   : > { %v1668_v49 = vpop.f32.mrb[22].mxu0 }
 0x8c7   : > { %v1672_v43 = vadd.f32 %v1668_v49, %v875_v47  ;;  %v6724_v25 = vpop.f32.mrb[23].mxu0 }
 0x8c9   : > { %7678 = vtanh.f32 %v1672_v43  ;;  %v6115_v14 = vmul.f32 -1.442695, %v1672_v43 }
 0x8ca   : > { %7680 = vpow2.f32 %v6112_v28 }
 0x8cb   : > { %7682 = vpow2.f32 %v6115_v14 }
 0x8cd   : > { %v7677_v20 = vpop.eup %7676 }
 0x8ce   : > { %1509 = vrot.lane.b32.xlu0 %v7677_v20, %s8110_s28 }
 0x8d3   : > { %v7679_v22 = vpop.eup %7678 }
 0x8d4   : > { %1682 = vrot.lane.b32.xlu1 %v7679_v22, %s8110_s28  ;;  %v7681_v40 = vpop.eup %7680 }
 0x8d5   : > { %v1503_v51 = vadd.f32 1.0, %v7681_v40  ;;  %v7683_v62 = vpop.eup %7682 }
 0x8d6   : > { %v1676_v30 = vadd.f32 1.0, %v7683_v62 }
 0x8d7   : > { %7684 = vrcp.f32 %v1503_v51 }
 0x8d8   : > { %7686 = vrcp.f32 %v1676_v30 }
 0x8e1   : > { %v7685_v55 = vpop.eup %7684 }
 0x8e2   : > { %v7687_v10 = vpop.eup %7686  ;;  %v1507_v13 = vmul.f32 %v7685_v55, %v8740_v27 }
 0x8e3   : > { %v1680_v39 = vmul.f32 %v7687_v10, %v8744_v37 }
 0x940   : > { %v1510_v24 = vpop.permute.xlu0 %1509 }
 0x941   : > { %v1512_v41 = vmul.f32 %v7685_v55, %v1510_v24  ;;  %v880_v24 = vadd.f32 %v8645_v52, %v8457_v38 }
 0x943   : > { %1514 = vrot.lane.b32.xlu0 %v1512_v41, %s8111_s8 }
 0x946   : > { %v1683_v46 = vpop.permute.xlu1 %1682 }
 0x947   : > { %v1685_v59 = vmul.f32 %v7687_v10, %v1683_v46 }
 0x949   : > { %1687 = vrot.lane.b32.xlu1 %v1685_v59, %s8111_s8 }
 0x9b5   : > { %v1515_v36 = vpop.permute.xlu0 %1514 }
 0x9b6   : > { %v8781_v53 = vadd.f32 %v1515_v36, %v1507_v13 }
 0x9b8   : > { %7688 = vtanh.f32 %v8781_v53 }
 0x9bb   : > { %v1688_v23 = vpop.permute.xlu1 %1687 }
 0x9bc   : > { %v8785_v47 = vadd.f32 %v1688_v23, %v1680_v39 }
 0x9be   : > { %7690 = vtanh.f32 %v8785_v47 }
 0x9c2   : > { %v7689_v49 = vpop.eup %7688 }
 0x9c3   : > { %1520 = vrot.lane.b32.xlu0 %v7689_v49, %s8110_s28 }
 0x9c8   : > { %v7691_v43 = vpop.eup %7690 }
 0x9c9   : > { %1693 = vrot.lane.b32.xlu1 %v7691_v43, %s8110_s28 }
 0xa35   : > { %v1521_v25 = vpop.permute.xlu0 %1520 }
 0xa36   : > { %v1523_v27 = vmul.f32 %v7685_v55, %v1521_v25 }
 0xa38   : > { %1525 = vrot.lane.b32.xlu0 %v1523_v27, %s8111_s8 }
 0xa3b   : > { %v1694_v20 = vpop.permute.xlu1 %1693 }
 0xa3c   : > { %v1696_v22 = vmul.f32 %v7687_v10, %v1694_v20 }
 0xa3e   : > { %1698 = vrot.lane.b32.xlu1 %v1696_v22, %s8111_s8 }
 0xaaa   : > { %v1526_v37 = vpop.permute.xlu0 %1525 }
 0xaab   : > { %1528 = vst.msk [vmem:[#allocation3 + $0x8] sm:$0xff] %vm491_vm1, %v1526_v37  ;;  %6712 = vmatmul.mubr.msk.f32.vlgmr.msra.gmra.mrb[22].mxu1 %vm491_vm1, %v1526_v37 }
 0xaac   : > { %7303 = vmatpush3.bf16.msra.mxu1 %v8679_v21  ;;  %6733 = vmatprep.mubr.msk.f32.mxu1 %vm8108_vm2, %v8109_v57 }
 0xaad   : > { %7304 = vmatprep.subr.bf16.mxu1 %v8107_v29 }
 0xab0   : > { %7306 = vmatpush3.bf16.msra.mxu1 %v8690_v48  ;;  %v1699_v28 = vpop.permute.xlu1 %1698 }
 0xab1   : > { %7313 = vmatprep.subr.bf16.mxu1 %v8107_v29 }
 0xab3   : > { %6734 = vmatmul.mubr.msk.f32.vlgmr.msra.gmra.mrb[24].mxu1 %vm491_vm1, %v1699_v28 }
 0xab4   : > { %7315 = vmatpush3.bf16.msra.mxu1 %v8334_v31  ;;  %6755 = vmatprep.mubr.msk.f32.mxu1 %vm8108_vm2, %v8109_v57 }
 0xab5   : > { %7316 = vmatprep.subr.bf16.mxu1 %v8107_v29 }
 0xab8   : > { %7318 = vmatpush3.bf16.msra.mxu1 %v8359_v45 }
 0xab9   : > { %7325 = vmatprep.subr.bf16.mxu1 %v8107_v29 }
 0xabb   : > { %6756 = vmatmul.mubr.msk.f32.vlgmr.msra.gmra.mrb[26].mxu1 %vm491_vm1, %v1699_v28 }
 0xabc   : > { %7327 = vmatpush3.bf16.msra.mxu1 %v8603_v44  ;;  %6777 = vmatprep.mubr.msk.f32.mxu1 %vm8108_vm2, %v8109_v57 }
 0xabd   : > { %7328 = vmatprep.subr.bf16.mxu1 %v8107_v29 }
 0xac0   : > { %7330 = vmatpush3.bf16.msra.mxu1 %v8617_v42 }
 0xac1   : > { %7337 = vmatprep.subr.bf16.mxu1 %v8107_v29 }
 0xb7e   : > { %v1597_v14 = vpop.f32.mrb[22].mxu1 }
 0xb7f   : > { %v6713_v40 = vpop.f32.mrb[23].mxu1 }
 0xb86   : > { %v1768_v51 = vpop.f32.mrb[24].mxu1 }
 0xb87   : > { %v1769_v62 = vadd.f32 %v1768_v51, %v1597_v14  ;;  %v6735_v30 = vpop.f32.mrb[25].mxu1 }
 0xb89   : > { %v1772_v55 = vadd.f32 %v8730_v16, %v1769_v62 }
 0xb8b   : > { %7692 = vtanh.f32 %v1772_v55  ;;  %v6117_v36 = vmul.f32 -1.442695, %v1772_v55 }
 0xb8e   : > { %v1941_v41 = vpop.f32.mrb[26].mxu1 }
 0xb8f   : > { %v1945_v10 = vadd.f32 %v1941_v41, %v880_v24  ;;  %v6757_v46 = vpop.f32.mrb[27].mxu1 }
 0xb91   : > { %7694 = vtanh.f32 %v1945_v10  ;;  %v6120_v39 = vmul.f32 -1.442695, %v1945_v10 }
 0xb92   : > { %7696 = vpow2.f32 %v6117_v36 }
 0xb93   : > { %7698 = vpow2.f32 %v6120_v39 }
 0xb95   : > { %v7693_v59 = vpop.eup %7692 }
 0xb96   : > { %1782 = vrot.lane.b32.xlu0 %v7693_v59, %s8110_s28 }
 0xb9b   : > { %v7695_v13 = vpop.eup %7694 }
 0xb9c   : > { %1955 = vrot.lane.b32.xlu1 %v7695_v13, %s8110_s28  ;;  %v7697_v23 = vpop.eup %7696 }
 0xb9d   : > { %v1776_v49 = vadd.f32 1.0, %v7697_v23  ;;  %v7699_v43 = vpop.eup %7698 }
 0xb9e   : > { %v1949_v25 = vadd.f32 1.0, %v7699_v43 }
 0xb9f   : > { %7700 = vrcp.f32 %v1776_v49 }
 0xba0   : > { %7702 = vrcp.f32 %v1949_v25  ;;  %v8859_v25 = vld [vmem:[%s9603_s3] ss:$0 sm:$0xff] }
 0xba9   : > { %v7701_v38 = vpop.eup %7700 }
 0xbaa   : > { %v7703_v20 = vpop.eup %7702  ;;  %v1780_v28 = vmul.f32 %v7701_v38, %v8781_v53 }
 0xbab   : > { %v1953_v51 = vmul.f32 %v7703_v20, %v8785_v47 }
 0xc08   : > { %v1783_v52 = vpop.permute.xlu0 %1782 }
 0xc09   : > { %v1785_v27 = vmul.f32 %v7701_v38, %v1783_v52 }
 0xc0b   : > { %1787 = vrot.lane.b32.xlu0 %v1785_v27, %s8111_s8 }
 0xc0e   : > { %v1956_v22 = vpop.permute.xlu1 %1955 }
 0xc0f   : > { %v1958_v37 = vmul.f32 %v7703_v20, %v1956_v22 }
 0xc11   : > { %1960 = vrot.lane.b32.xlu1 %v1958_v37, %s8111_s8 }
 0xc7d   : > { %v1788_v14 = vpop.permute.xlu0 %1787 }
 0xc7e   : > { %v8822_v40 = vadd.f32 %v1788_v14, %v1780_v28 }
 0xc80   : > { %7704 = vtanh.f32 %v8822_v40 }
 0xc83   : > { %v1961_v62 = vpop.permute.xlu1 %1960 }
 0xc84   : > { %v8826_v30 = vadd.f32 %v1961_v62, %v1953_v51 }
 0xc86   : > { %7706 = vtanh.f32 %v8826_v30 }
 0xc8a   : > { %v7705_v55 = vpop.eup %7704 }
 0xc8b   : > { %1793 = vrot.lane.b32.xlu0 %v7705_v55, %s8110_s28 }
 0xc90   : > { %v7707_v24 = vpop.eup %7706 }
 0xc91   : > { %1966 = vrot.lane.b32.xlu1 %v7707_v24, %s8110_s28 }
 0xcfd   : > { %v1794_v41 = vpop.permute.xlu0 %1793 }
 0xcfe   : > { %v1796_v53 = vmul.f32 %v7701_v38, %v1794_v41  ;;  %v885_v38 = vadd.f32 %v8859_v25, %v8651_v26 }
 0xd00   : > { %1798 = vrot.lane.b32.xlu0 %v1796_v53, %s8111_s8 }
 0xd03   : > { %v1967_v10 = vpop.permute.xlu1 %1966 }
 0xd04   : > { %v1969_v46 = vmul.f32 %v7703_v20, %v1967_v10 }
 0xd06   : > { %1971 = vrot.lane.b32.xlu1 %v1969_v46, %s8111_s8 }
 0xd72   : > { %v1799_v47 = vpop.permute.xlu0 %1798 }
 0xd73   : > { %1801 = vst.msk [vmem:[#allocation3 + $0x10] sm:$0xff] %vm491_vm1, %v1799_v47  ;;  %6745 = vmatmul.mubr.msk.f32.vlgmr.msra.gmra.mrb[24].mxu0 %vm491_vm1, %v1799_v47 }
 0xd74   : > { %7321 = vmatpush3.bf16.msra.mxu0 %v8679_v21  ;;  %6766 = vmatprep.mubr.msk.f32.mxu0 %vm8108_vm2, %v8109_v57 }
 0xd75   : > { %7322 = vmatprep.subr.bf16.mxu0 %v8107_v29 }
 0xd78   : > { %7324 = vmatpush3.bf16.msra.mxu0 %v8690_v48  ;;  %v1972_v59 = vpop.permute.xlu1 %1971 }
 0xd79   : > { %7331 = vmatprep.subr.bf16.mxu0 %v8107_v29 }
 0xd7b   : > { %6767 = vmatmul.mubr.msk.f32.vlgmr.msra.gmra.mrb[26].mxu0 %vm491_vm1, %v1972_v59 }
 0xd7c   : > { %7333 = vmatpush3.bf16.msra.mxu0 %v8334_v31  ;;  %6788 = vmatprep.mubr.msk.f32.mxu0 %vm8108_vm2, %v8109_v57 }
 0xd7d   : > { %7334 = vmatprep.subr.bf16.mxu0 %v8107_v29 }
 0xd80   : > { %7336 = vmatpush3.bf16.msra.mxu0 %v8359_v45 }
 0xd81   : > { %7343 = vmatprep.subr.bf16.mxu0 %v8107_v29 }
 0xd83   : > { %6789 = vmatmul.mubr.msk.f32.vlgmr.msra.gmra.mrb[28].mxu0 %vm491_vm1, %v1972_v59 }
 0xd84   : > { %7345 = vmatpush3.bf16.msra.mxu0 %v8603_v44  ;;  %6810 = vmatprep.mubr.msk.f32.mxu0 %vm8108_vm2, %v8109_v57 }
 0xd85   : > { %7346 = vmatprep.subr.bf16.mxu0 %v8107_v29 }
 0xd88   : > { %7348 = vmatpush3.bf16.msra.mxu0 %v8617_v42 }
 0xd89   : > { %7355 = vmatprep.subr.bf16.mxu0 %v8107_v29 }
 0xe46   : > { %v1870_v13 = vpop.f32.mrb[24].mxu0 }
 0xe47   : > { %v6746_v36 = vpop.f32.mrb[25].mxu0 }
 0xe4e   : > { %v2041_v39 = vpop.f32.mrb[26].mxu0 }
 0xe4f   : > { %v2042_v23 = vadd.f32 %v2041_v39, %v1870_v13  ;;  %v6768_v49 = vpop.f32.mrb[27].mxu0 }
 0xe51   : > { %v2045_v43 = vadd.f32 %v8730_v16, %v2042_v23 }
 0xe53   : > { %7708 = vtanh.f32 %v2045_v43  ;;  %v6122_v28 = vmul.f32 -1.442695, %v2045_v43 }
 0xe56   : > { %v2214_v52 = vpop.f32.mrb[28].mxu0 }
 0xe57   : > { %v2218_v27 = vadd.f32 %v2214_v52, %v885_v38  ;;  %v6790_v20 = vpop.f32.mrb[29].mxu0 }
 0xe59   : > { %7710 = vtanh.f32 %v2218_v27  ;;  %v6125_v14 = vmul.f32 -1.442695, %v2218_v27 }
 0xe5a   : > { %7712 = vpow2.f32 %v6122_v28 }
 0xe5b   : > { %7714 = vpow2.f32 %v6125_v14 }
 0xe5d   : > { %v7709_v22 = vpop.eup %7708 }
 0xe5e   : > { %2055 = vrot.lane.b32.xlu0 %v7709_v22, %s8110_s28 }
 0xe63   : > { %v7711_v37 = vpop.eup %7710 }
 0xe64   : > { %2228 = vrot.lane.b32.xlu1 %v7711_v37, %s8110_s28  ;;  %v7713_v51 = vpop.eup %7712 }
 0xe65   : > { %v2049_v62 = vadd.f32 1.0, %v7713_v51  ;;  %v7715_v55 = vpop.eup %7714 }
 0xe66   : > { %v2222_v24 = vadd.f32 1.0, %v7715_v55 }
 0xe67   : > { %7716 = vrcp.f32 %v2049_v62 }
 0xe68   : > { %7718 = vrcp.f32 %v2222_v24  ;;  %v890_v24 = vadd.f32 %v8859_v25, %v8649_v63 }
 0xe71   : > { %v7717_v26 = vpop.eup %7716 }
 0xe72   : > { %v7719_v10 = vpop.eup %7718  ;;  %v2053_v59 = vmul.f32 %v7717_v26, %v8822_v40 }
 0xe73   : > { %v2226_v39 = vmul.f32 %v7719_v10, %v8826_v30 }
 0xed0   : > { %v2056_v41 = vpop.permute.xlu0 %2055 }
 0xed1   : > { %v2058_v53 = vmul.f32 %v7717_v26, %v2056_v41 }
 0xed3   : > { %2060 = vrot.lane.b32.xlu0 %v2058_v53, %s8111_s8 }
 0xed6   : > { %v2229_v46 = vpop.permute.xlu1 %2228 }
 0xed7   : > { %v2231_v47 = vmul.f32 %v7719_v10, %v2229_v46 }
 0xed9   : > { %2233 = vrot.lane.b32.xlu1 %v2231_v47, %s8111_s8 }
 0xf45   : > { %v2061_v13 = vpop.permute.xlu0 %2060 }
 0xf46   : > { %v8868_v36 = vadd.f32 %v2061_v13, %v2053_v59 }
 0xf48   : > { %7720 = vtanh.f32 %v8868_v36 }
 0xf4b   : > { %v2234_v23 = vpop.permute.xlu1 %2233 }
 0xf4c   : > { %v8872_v49 = vadd.f32 %v2234_v23, %v2226_v39 }
 0xf4e   : > { %7722 = vtanh.f32 %v8872_v49 }
 0xf52   : > { %v7721_v43 = vpop.eup %7720 }
 0xf53   : > { %2066 = vrot.lane.b32.xlu0 %v7721_v43, %s8110_s28 }
 0xf58   : > { %v7723_v38 = vpop.eup %7722 }
 0xf59   : > { %2239 = vrot.lane.b32.xlu1 %v7723_v38, %s8110_s28 }
 0xfc5   : > { %v2067_v52 = vpop.permute.xlu0 %2066 }
 0xfc6   : > { %v2069_v40 = vmul.f32 %v7717_v26, %v2067_v52 }
 0xfc8   : > { %2071 = vrot.lane.b32.xlu0 %v2069_v40, %s8111_s8 }
 0xfcb   : > { %v2240_v27 = vpop.permute.xlu1 %2239 }
 0xfcc   : > { %v2242_v20 = vmul.f32 %v7719_v10, %v2240_v27 }
 0xfce   : > { %2244 = vrot.lane.b32.xlu1 %v2242_v20, %s8111_s8 }
0x103a   : > { %v2072_v30 = vpop.permute.xlu0 %2071 }
0x103b   : > { %2074 = vst.msk [vmem:[#allocation3 + $0x18] sm:$0xff] %vm491_vm1, %v2072_v30  ;;  %6778 = vmatmul.mubr.msk.f32.vlgmr.msra.gmra.mrb[28].mxu1 %vm491_vm1, %v2072_v30 }
0x103c   : > { %7339 = vmatpush3.bf16.msra.mxu1 %v8679_v21  ;;  %6799 = vmatprep.mubr.msk.f32.mxu1 %vm8108_vm2, %v8109_v57 }
0x103d   : > { %7340 = vmatprep.subr.bf16.mxu1 %v8107_v29 }
0x1040   : > { %7342 = vmatpush3.bf16.msra.mxu1 %v8690_v48  ;;  %v2245_v22 = vpop.permute.xlu1 %2244 }
0x1041   : > { %7349 = vmatprep.subr.bf16.mxu1 %v8107_v29 }
0x1043   : > { %6800 = vmatmul.mubr.msk.f32.vlgmr.msra.gmra.mrb[30].mxu1 %vm491_vm1, %v2245_v22 }
0x1044   : > { %7351 = vmatpush3.bf16.msra.mxu1 %v8334_v31  ;;  %6821 = vmatprep.mubr.msk.f32.mxu1 %vm8108_vm2, %v8109_v57 }
0x1045   : > { %7352 = vmatprep.subr.bf16.mxu1 %v8107_v29 }
0x1048   : > { %7354 = vmatpush3.bf16.msra.mxu1 %v8359_v45 }
0x1049   : > { %7361 = vmatprep.subr.bf16.mxu1 %v8107_v29 }
0x104b   : > { %6822 = vmatmul.mubr.msk.f32.vlgmr.msra.gmra.mrb[32].mxu1 %vm491_vm1, %v2245_v22 }
0x104c   : > { %7363 = vmatpush3.bf16.msra.mxu1 %v8603_v44  ;;  %6843 = vmatprep.mubr.msk.f32.mxu1 %vm8108_vm2, %v8109_v57 }
0x104d   : > { %7364 = vmatprep.subr.bf16.mxu1 %v8107_v29 }
0x1050   : > { %7366 = vmatpush3.bf16.msra.mxu1 %v8617_v42 }
0x1051   : > { %7373 = vmatprep.subr.bf16.mxu1 %v8107_v29 }
0x110e   : > { %v2143_v37 = vpop.f32.mrb[28].mxu1 }
0x110f   : > { %v6779_v28 = vpop.f32.mrb[29].mxu1 }
0x1116   : > { %v2314_v14 = vpop.f32.mrb[30].mxu1 }
0x1117   : > { %v2315_v51 = vadd.f32 %v2314_v14, %v2143_v37  ;;  %v6801_v62 = vpop.f32.mrb[31].mxu1 }
0x1119   : > { %v2318_v55 = vadd.f32 %v8730_v16, %v2315_v51 }
0x111b   : > { %7724 = vtanh.f32 %v2318_v55  ;;  %v6127_v47 = vmul.f32 -1.442695, %v2318_v55 }
0x111e   : > { %v2487_v26 = vpop.f32.mrb[32].mxu1 }
0x111f   : > { %v2491_v41 = vadd.f32 %v2487_v26, %v890_v24  ;;  %v6823_v53 = vpop.f32.mrb[33].mxu1 }
0x1121   : > { %7726 = vtanh.f32 %v2491_v41  ;;  %v6130_v59 = vmul.f32 -1.442695, %v2491_v41 }
0x1122   : > { %7728 = vpow2.f32 %v6127_v47 }
0x1123   : > { %7730 = vpow2.f32 %v6130_v59 }
0x1125   : > { %v7725_v10 = vpop.eup %7724 }
0x1126   : > { %2328 = vrot.lane.b32.xlu0 %v7725_v10, %s8110_s28 }
0x112b   : > { %v7727_v46 = vpop.eup %7726 }
0x112c   : > { %2501 = vrot.lane.b32.xlu1 %v7727_v46, %s8110_s28  ;;  %v7729_v13 = vpop.eup %7728 }
0x112d   : > { %v2322_v39 = vadd.f32 1.0, %v7729_v13  ;;  %v7731_v23 = vpop.eup %7730 }
0x112e   : > { %v2495_v43 = vadd.f32 1.0, %v7731_v23  ;;  %v895_v23 = vadd.f32 %v8859_v25, %v8655_v4 }
0x112f   : > { %7732 = vrcp.f32 %v2322_v39 }
0x1130   : > { %7734 = vrcp.f32 %v2495_v43 }
0x1139   : > { %v7733_v63 = vpop.eup %7732 }
0x113a   : > { %v7735_v40 = vpop.eup %7734  ;;  %v2326_v30 = vmul.f32 %v7733_v63, %v8868_v36 }
0x113b   : > { %v2499_v28 = vmul.f32 %v7735_v40, %v8872_v49 }
0x1198   : > { %v2329_v38 = vpop.permute.xlu0 %2328 }
0x1199   : > { %v2331_v52 = vmul.f32 %v7733_v63, %v2329_v38 }
0x119b   : > { %2333 = vrot.lane.b32.xlu0 %v2331_v52, %s8111_s8 }
0x119e   : > { %v2502_v27 = vpop.permute.xlu1 %2501 }
0x119f   : > { %v2504_v20 = vmul.f32 %v7735_v40, %v2502_v27 }
0x11a1   : > { %2506 = vrot.lane.b32.xlu1 %v2504_v20, %s8111_s8 }
0x120d   : > { %v2334_v22 = vpop.permute.xlu0 %2333 }
0x120e   : > { %v8909_v37 = vadd.f32 %v2334_v22, %v2326_v30 }
0x1210   : > { %7736 = vtanh.f32 %v8909_v37 }
0x1213   : > { %v2507_v14 = vpop.permute.xlu1 %2506 }
0x1214   : > { %v8913_v51 = vadd.f32 %v2507_v14, %v2499_v28 }
0x1216   : > { %7738 = vtanh.f32 %v8913_v51 }
0x121a   : > { %v7737_v62 = vpop.eup %7736 }
0x121b   : > { %2339 = vrot.lane.b32.xlu0 %v7737_v62, %s8110_s28 }
0x1220   : > { %v7739_v55 = vpop.eup %7738 }
0x1221   : > { %2512 = vrot.lane.b32.xlu1 %v7739_v55, %s8110_s28 }
0x128d   : > { %v2340_v24 = vpop.permute.xlu0 %2339 }
0x128e   : > { %v2342_v36 = vmul.f32 %v7733_v63, %v2340_v24 }
0x1290   : > { %2344 = vrot.lane.b32.xlu0 %v2342_v36, %s8111_s8 }
0x1293   : > { %v2513_v26 = vpop.permute.xlu1 %2512 }
0x1294   : > { %v2515_v41 = vmul.f32 %v7735_v40, %v2513_v26 }
0x1296   : > { %2517 = vrot.lane.b32.xlu1 %v2515_v41, %s8111_s8 }
0x1302   : > { %v2345_v49 = vpop.permute.xlu0 %2344 }
0x1303   : > { %2347 = vst.msk [vmem:[#allocation3 + $0x20] sm:$0xff] %vm491_vm1, %v2345_v49  ;;  %6811 = vmatmul.mubr.msk.f32.vlgmr.msra.gmra.mrb[30].mxu0 %vm491_vm1, %v2345_v49 }
0x1304   : > { %7357 = vmatpush3.bf16.msra.mxu0 %v8679_v21  ;;  %6832 = vmatprep.mubr.msk.f32.mxu0 %vm8108_vm2, %v8109_v57 }
0x1305   : > { %7358 = vmatprep.subr.bf16.mxu0 %v8107_v29 }
0x1308   : > { %7360 = vmatpush3.bf16.msra.mxu0 %v8690_v48  ;;  %v2518_v53 = vpop.permute.xlu1 %2517 }
0x1309   : > { %7367 = vmatprep.subr.bf16.mxu0 %v8107_v29 }
0x130b   : > { %6833 = vmatmul.mubr.msk.f32.vlgmr.msra.gmra.mrb[32].mxu0 %vm491_vm1, %v2518_v53 }
0x130c   : > { %7369 = vmatpush3.bf16.msra.mxu0 %v8334_v31  ;;  %6854 = vmatprep.mubr.msk.f32.mxu0 %vm8108_vm2, %v8109_v57 }
0x130d   : > { %7370 = vmatprep.subr.bf16.mxu0 %v8107_v29 }
0x1310   : > { %7372 = vmatpush3.bf16.msra.mxu0 %v8359_v45 }
0x1311   : > { %7379 = vmatprep.subr.bf16.mxu0 %v8107_v29 }
0x1313   : > { %6855 = vmatmul.mubr.msk.f32.vlgmr.msra.gmra.mrb[34].mxu0 %vm491_vm1, %v2518_v53 }
0x1314   : > { %7381 = vmatpush3.bf16.msra.mxu0 %v8603_v44  ;;  %6876 = vmatprep.mubr.msk.f32.mxu0 %vm8108_vm2, %v8109_v57 }
0x1315   : > { %7382 = vmatprep.subr.bf16.mxu0 %v8107_v29 }
0x1318   : > { %7384 = vmatpush3.bf16.msra.mxu0 %v8617_v42 }
0x1319   : > { %7391 = vmatprep.subr.bf16.mxu0 %v8107_v29 }
0x13d6   : > { %v2416_v10 = vpop.f32.mrb[30].mxu0 }
0x13d7   : > { %v6812_v46 = vpop.f32.mrb[31].mxu0 }
0x13de   : > { %v2587_v47 = vpop.f32.mrb[32].mxu0 }
0x13df   : > { %v2588_v59 = vadd.f32 %v2587_v47, %v2416_v10  ;;  %v6834_v13 = vpop.f32.mrb[33].mxu0 }
0x13e1   : > { %v2591_v39 = vadd.f32 %v8730_v16, %v2588_v59 }
0x13e3   : > { %7740 = vtanh.f32 %v2591_v39  ;;  %v6132_v27 = vmul.f32 -1.442695, %v2591_v39 }
0x13e6   : > { %v2760_v43 = vpop.f32.mrb[34].mxu0 }
0x13e7   : > { %v2764_v63 = vadd.f32 %v2760_v43, %v895_v23  ;;  %v6856_v38 = vpop.f32.mrb[35].mxu0 }
0x13e9   : > { %7742 = vtanh.f32 %v2764_v63  ;;  %v6135_v20 = vmul.f32 -1.442695, %v2764_v63 }
0x13ea   : > { %7744 = vpow2.f32 %v6132_v27 }
0x13eb   : > { %7746 = vpow2.f32 %v6135_v20 }
0x13ed   : > { %v7741_v52 = vpop.eup %7740 }
0x13ee   : > { %2601 = vrot.lane.b32.xlu0 %v7741_v52, %s8110_s28 }
0x13f3   : > { %v7743_v40 = vpop.eup %7742 }
0x13f4   : > { %2774 = vrot.lane.b32.xlu1 %v7743_v40, %s8110_s28  ;;  %v7745_v30 = vpop.eup %7744 }
0x13f5   : > { %v2595_v22 = vadd.f32 1.0, %v7745_v30  ;;  %v7747_v28 = vpop.eup %7746 }
0x13f6   : > { %v2768_v14 = vadd.f32 1.0, %v7747_v28 }
0x13f7   : > { %7748 = vrcp.f32 %v2595_v22  ;;  %v900_v22 = vadd.f32 %v8859_v25, %v8653_v17 }
0x13f8   : > { %7750 = vrcp.f32 %v2768_v14 }
0x1401   : > { %v7749_v4 = vpop.eup %7748 }
0x1402   : > { %v7751_v24 = vpop.eup %7750  ;;  %v2599_v41 = vmul.f32 %v7749_v4, %v8909_v37 }
0x1403   : > { %v2772_v10 = vmul.f32 %v7751_v24, %v8913_v51 }
0x1460   : > { %v2602_v62 = vpop.permute.xlu0 %2601 }
0x1461   : > { %v2604_v55 = vmul.f32 %v7749_v4, %v2602_v62 }
0x1463   : > { %2606 = vrot.lane.b32.xlu0 %v2604_v55, %s8111_s8 }
0x1466   : > { %v2775_v36 = vpop.permute.xlu1 %2774 }
0x1467   : > { %v2777_v26 = vmul.f32 %v7751_v24, %v2775_v36 }
0x1469   : > { %2779 = vrot.lane.b32.xlu1 %v2777_v26, %s8111_s8 }
0x14d5   : > { %v2607_v49 = vpop.permute.xlu0 %2606 }
0x14d6   : > { %v8950_v53 = vadd.f32 %v2607_v49, %v2599_v41 }
0x14d8   : > { %7752 = vtanh.f32 %v8950_v53 }
0x14db   : > { %v2780_v46 = vpop.permute.xlu1 %2779 }
0x14dc   : > { %v8954_v47 = vadd.f32 %v2780_v46, %v2772_v10 }
0x14de   : > { %7754 = vtanh.f32 %v8954_v47 }
0x14e2   : > { %v7753_v59 = vpop.eup %7752 }
0x14e3   : > { %2612 = vrot.lane.b32.xlu0 %v7753_v59, %s8110_s28 }
0x14e8   : > { %v7755_v13 = vpop.eup %7754 }
0x14e9   : > { %2785 = vrot.lane.b32.xlu1 %v7755_v13, %s8110_s28 }
0x1555   : > { %v2613_v39 = vpop.permute.xlu0 %2612 }
0x1556   : > { %v2615_v37 = vmul.f32 %v7749_v4, %v2613_v39 }
0x1558   : > { %2617 = vrot.lane.b32.xlu0 %v2615_v37, %s8111_s8 }
0x155b   : > { %v2786_v23 = vpop.permute.xlu1 %2785 }
0x155c   : > { %v2788_v43 = vmul.f32 %v7751_v24, %v2786_v23 }
0x155e   : > { %2790 = vrot.lane.b32.xlu1 %v2788_v43, %s8111_s8 }
0x15ca   : > { %v2618_v51 = vpop.permute.xlu0 %2617 }
0x15cb   : > { %2620 = vst.msk [vmem:[#allocation3 + $0x28] sm:$0xff] %vm491_vm1, %v2618_v51  ;;  %6844 = vmatmul.mubr.msk.f32.vlgmr.msra.gmra.mrb[34].mxu1 %vm491_vm1, %v2618_v51 }
0x15cc   : > { %7375 = vmatpush3.bf16.msra.mxu1 %v8679_v21  ;;  %6865 = vmatprep.mubr.msk.f32.mxu1 %vm8108_vm2, %v8109_v57 }
0x15cd   : > { %7376 = vmatprep.subr.bf16.mxu1 %v8107_v29 }
0x15d0   : > { %7378 = vmatpush3.bf16.msra.mxu1 %v8690_v48  ;;  %v2791_v63 = vpop.permute.xlu1 %2790 }
0x15d1   : > { %7385 = vmatprep.subr.bf16.mxu1 %v8107_v29 }
0x15d3   : > { %6866 = vmatmul.mubr.msk.f32.vlgmr.msra.gmra.mrb[36].mxu1 %vm491_vm1, %v2791_v63 }
0x15d4   : > { %7387 = vmatpush3.bf16.msra.mxu1 %v8334_v31  ;;  %6887 = vmatprep.mubr.msk.f32.mxu1 %vm8108_vm2, %v8109_v57 }
0x15d5   : > { %7388 = vmatprep.subr.bf16.mxu1 %v8107_v29 }
0x15d8   : > { %7390 = vmatpush3.bf16.msra.mxu1 %v8359_v45 }
0x15d9   : > { %7397 = vmatprep.subr.bf16.mxu1 %v8107_v29 }
0x15db   : > { %6888 = vmatmul.mubr.msk.f32.vlgmr.msra.gmra.mrb[38].mxu1 %vm491_vm1, %v2791_v63 }
0x15dc   : > { %7399 = vmatpush3.bf16.msra.mxu1 %v8603_v44  ;;  %6909 = vmatprep.mubr.msk.f32.mxu1 %vm8108_vm2, %v8109_v57 }
0x15dd   : > { %7400 = vmatprep.subr.bf16.mxu1 %v8107_v29 }
0x15e0   : > { %7402 = vmatpush3.bf16.msra.mxu1 %v8617_v42 }
0x15e1   : > { %7409 = vmatprep.subr.bf16.mxu1 %v8107_v29 }
0x169e   : > { %v2689_v38 = vpop.f32.mrb[34].mxu1 }
0x169f   : > { %v6845_v52 = vpop.f32.mrb[35].mxu1 }
0x16a6   : > { %v2860_v40 = vpop.f32.mrb[36].mxu1 }
0x16a7   : > { %v2861_v27 = vadd.f32 %v2860_v40, %v2689_v38  ;;  %v6867_v20 = vpop.f32.mrb[37].mxu1 }
0x16a9   : > { %v2864_v30 = vadd.f32 %v8730_v16, %v2861_v27 }
0x16ab   : > { %7756 = vtanh.f32 %v2864_v30  ;;  %v6137_v24 = vmul.f32 -1.442695, %v2864_v30 }
0x16ae   : > { %v3033_v28 = vpop.f32.mrb[38].mxu1 }
0x16af   : > { %v3037_v14 = vadd.f32 %v3033_v28, %v900_v22  ;;  %v6889_v4 = vpop.f32.mrb[39].mxu1 }
0x16b1   : > { %7758 = vtanh.f32 %v3037_v14  ;;  %v6140_v36 = vmul.f32 -1.442695, %v3037_v14 }
0x16b2   : > { %7760 = vpow2.f32 %v6137_v24  ;;  %v9027_v24 = vld [vmem:[%s9603_s3 + $0x1] ss:$0 sm:$0xff] }
0x16b3   : > { %7762 = vpow2.f32 %v6140_v36 }
0x16b5   : > { %v7757_v62 = vpop.eup %7756 }
0x16b6   : > { %2874 = vrot.lane.b32.xlu0 %v7757_v62, %s8110_s28 }
0x16bb   : > { %v7759_v55 = vpop.eup %7758 }
0x16bc   : > { %3047 = vrot.lane.b32.xlu1 %v7759_v55, %s8110_s28  ;;  %v7761_v26 = vpop.eup %7760 }
0x16bd   : > { %v2868_v16 = vadd.f32 1.0, %v7761_v26  ;;  %v7763_v41 = vpop.eup %7762  ;;  %v905_v26 = vadd.f32 %v8859_v25, %v8713_v50 }
0x16be   : > { %v3041_v49 = vadd.f32 1.0, %v7763_v41 }
0x16bf   : > { %7764 = vrcp.f32 %v2868_v16 }
0x16c0   : > { %7766 = vrcp.f32 %v3041_v49 }
0x16c9   : > { %v7765_v17 = vpop.eup %7764 }
0x16ca   : > { %v7767_v59 = vpop.eup %7766  ;;  %v2872_v37 = vmul.f32 %v7765_v17, %v8950_v53 }
0x16cb   : > { %v3045_v51 = vmul.f32 %v7767_v59, %v8954_v47 }
0x1728   : > { %v2875_v10 = vpop.permute.xlu0 %2874 }
0x1729   : > { %v2877_v46 = vmul.f32 %v7765_v17, %v2875_v10 }
0x172b   : > { %2879 = vrot.lane.b32.xlu0 %v2877_v46, %s8111_s8 }
0x172e   : > { %v3048_v13 = vpop.permute.xlu1 %3047 }
0x172f   : > { %v3050_v39 = vmul.f32 %v7767_v59, %v3048_v13 }
0x1731   : > { %3052 = vrot.lane.b32.xlu1 %v3050_v39, %s8111_s8 }
0x179d   : > { %v2880_v23 = vpop.permute.xlu0 %2879 }
0x179e   : > { %v8991_v43 = vadd.f32 %v2880_v23, %v2872_v37 }
0x17a0   : > { %7768 = vtanh.f32 %v8991_v43 }
0x17a3   : > { %v3053_v63 = vpop.permute.xlu1 %3052 }
0x17a4   : > { %v8995_v38 = vadd.f32 %v3053_v63, %v3045_v51 }
0x17a6   : > { %7770 = vtanh.f32 %v8995_v38 }
0x17aa   : > { %v7769_v52 = vpop.eup %7768 }
0x17ab   : > { %2885 = vrot.lane.b32.xlu0 %v7769_v52, %s8110_s28 }
0x17b0   : > { %v7771_v40 = vpop.eup %7770 }
0x17b1   : > { %3058 = vrot.lane.b32.xlu1 %v7771_v40, %s8110_s28 }
0x181d   : > { %v2886_v27 = vpop.permute.xlu0 %2885 }
0x181e   : > { %v2888_v53 = vmul.f32 %v7765_v17, %v2886_v27 }
0x1820   : > { %2890 = vrot.lane.b32.xlu0 %v2888_v53, %s8111_s8 }
0x1823   : > { %v3059_v20 = vpop.permute.xlu1 %3058 }
0x1824   : > { %v3061_v30 = vmul.f32 %v7767_v59, %v3059_v20 }
0x1826   : > { %3063 = vrot.lane.b32.xlu1 %v3061_v30, %s8111_s8 }
0x1892   : > { %v2891_v47 = vpop.permute.xlu0 %2890 }
0x1893   : > { %2893 = vst.msk [vmem:[#allocation3 + $0x30] sm:$0xff] %vm491_vm1, %v2891_v47  ;;  %6877 = vmatmul.mubr.msk.f32.vlgmr.msra.gmra.mrb[36].mxu0 %vm491_vm1, %v2891_v47 }
0x1894   : > { %7393 = vmatpush3.bf16.msra.mxu0 %v8679_v21  ;;  %6898 = vmatprep.mubr.msk.f32.mxu0 %vm8108_vm2, %v8109_v57 }
0x1895   : > { %7394 = vmatprep.subr.bf16.mxu0 %v8107_v29 }
0x1898   : > { %7396 = vmatpush3.bf16.msra.mxu0 %v8690_v48  ;;  %v3064_v22 = vpop.permute.xlu1 %3063 }
0x1899   : > { %7403 = vmatprep.subr.bf16.mxu0 %v8107_v29 }
0x189b   : > { %6899 = vmatmul.mubr.msk.f32.vlgmr.msra.gmra.mrb[38].mxu0 %vm491_vm1, %v3064_v22 }
0x189c   : > { %7405 = vmatpush3.bf16.msra.mxu0 %v8334_v31  ;;  %6920 = vmatprep.mubr.msk.f32.mxu0 %vm8108_vm2, %v8109_v57 }
0x189d   : > { %7406 = vmatprep.subr.bf16.mxu0 %v8107_v29 }
0x18a0   : > { %7408 = vmatpush3.bf16.msra.mxu0 %v8359_v45 }
0x18a1   : > { %7415 = vmatprep.subr.bf16.mxu0 %v8107_v29 }
0x18a3   : > { %6921 = vmatmul.mubr.msk.f32.vlgmr.msra.gmra.mrb[40].mxu0 %vm491_vm1, %v3064_v22 }
0x18a4   : > { %7417 = vmatpush3.bf16.msra.mxu0 %v8603_v44  ;;  %6942 = vmatprep.mubr.msk.f32.mxu0 %vm8108_vm2, %v8109_v57 }
0x18a5   : > { %7418 = vmatprep.subr.bf16.mxu0 %v8107_v29 }
0x18a8   : > { %7420 = vmatpush3.bf16.msra.mxu0 %v8617_v42 }
0x18a9   : > { %7427 = vmatprep.subr.bf16.mxu0 %v8107_v29 }
0x1966   : > { %v2962_v28 = vpop.f32.mrb[36].mxu0 }
0x1967   : > { %v6878_v14 = vpop.f32.mrb[37].mxu0 }
0x196e   : > { %v3133_v4 = vpop.f32.mrb[38].mxu0 }
0x196f   : > { %v3134_v62 = vadd.f32 %v3133_v4, %v2962_v28  ;;  %v6900_v55 = vpop.f32.mrb[39].mxu0 }
0x1971   : > { %v3137_v36 = vadd.f32 %v9027_v24, %v3134_v62 }
0x1973   : > { %7772 = vtanh.f32 %v3137_v36  ;;  %v6142_v46 = vmul.f32 -1.442695, %v3137_v36 }
0x1976   : > { %v3306_v16 = vpop.f32.mrb[40].mxu0 }
0x1977   : > { %v3310_v41 = vadd.f32 %v3306_v16, %v905_v26  ;;  %v6922_v49 = vpop.f32.mrb[41].mxu0 }
0x1979   : > { %7774 = vtanh.f32 %v3310_v41  ;;  %v6145_v59 = vmul.f32 -1.442695, %v3310_v41 }
0x197a   : > { %7776 = vpow2.f32 %v6142_v46 }
0x197b   : > { %7778 = vpow2.f32 %v6145_v59  ;;  %v910_v59 = vadd.f32 %v8859_v25, %v8711_v6 }
0x197d   : > { %v7773_v17 = vpop.eup %7772 }
0x197e   : > { %3147 = vrot.lane.b32.xlu0 %v7773_v17, %s8110_s28 }
0x1983   : > { %v7775_v10 = vpop.eup %7774 }
0x1984   : > { %3320 = vrot.lane.b32.xlu1 %v7775_v10, %s8110_s28  ;;  %v7777_v13 = vpop.eup %7776 }
0x1985   : > { %v3141_v39 = vadd.f32 1.0, %v7777_v13  ;;  %v7779_v37 = vpop.eup %7778 }
0x1986   : > { %v3314_v23 = vadd.f32 1.0, %v7779_v37 }
0x1987   : > { %7780 = vrcp.f32 %v3141_v39 }
0x1988   : > { %7782 = vrcp.f32 %v3314_v23 }
0x1991   : > { %v7781_v50 = vpop.eup %7780 }
0x1992   : > { %v7783_v52 = vpop.eup %7782  ;;  %v3145_v53 = vmul.f32 %v7781_v50, %v8991_v43 }
0x1993   : > { %v3318_v47 = vmul.f32 %v7783_v52, %v8995_v38 }
0x19f0   : > { %v3148_v51 = vpop.permute.xlu0 %3147 }
0x19f1   : > { %v3150_v63 = vmul.f32 %v7781_v50, %v3148_v51 }
0x19f3   : > { %3152 = vrot.lane.b32.xlu0 %v3150_v63, %s8111_s8 }
0x19f6   : > { %v3321_v40 = vpop.permute.xlu1 %3320 }
0x19f7   : > { %v3323_v27 = vmul.f32 %v7783_v52, %v3321_v40 }
0x19f9   : > { %3325 = vrot.lane.b32.xlu1 %v3323_v27, %s8111_s8 }
0x1a65   : > { %v3153_v20 = vpop.permute.xlu0 %3152 }
0x1a66   : > { %v9037_v30 = vadd.f32 %v3153_v20, %v3145_v53 }
0x1a68   : > { %7784 = vtanh.f32 %v9037_v30 }
0x1a6b   : > { %v3326_v22 = vpop.permute.xlu1 %3325 }
0x1a6c   : > { %v9041_v28 = vadd.f32 %v3326_v22, %v3318_v47 }
0x1a6e   : > { %7786 = vtanh.f32 %v9041_v28 }
0x1a72   : > { %v7785_v14 = vpop.eup %7784 }
0x1a73   : > { %3158 = vrot.lane.b32.xlu0 %v7785_v14, %s8110_s28 }
0x1a78   : > { %v7787_v4 = vpop.eup %7786 }
0x1a79   : > { %3331 = vrot.lane.b32.xlu1 %v7787_v4, %s8110_s28 }
0x1ae5   : > { %v3159_v62 = vpop.permute.xlu0 %3158 }
0x1ae6   : > { %v3161_v43 = vmul.f32 %v7781_v50, %v3159_v62 }
0x1ae8   : > { %3163 = vrot.lane.b32.xlu0 %v3161_v43, %s8111_s8 }
0x1aeb   : > { %v3332_v55 = vpop.permute.xlu1 %3331 }
0x1aec   : > { %v3334_v36 = vmul.f32 %v7783_v52, %v3332_v55 }
0x1aee   : > { %3336 = vrot.lane.b32.xlu1 %v3334_v36, %s8111_s8 }
0x1b5a   : > { %v3164_v38 = vpop.permute.xlu0 %3163 }
0x1b5b   : > { %3166 = vst.msk [vmem:[#allocation3 + $0x38] sm:$0xff] %vm491_vm1, %v3164_v38  ;;  %6910 = vmatmul.mubr.msk.f32.vlgmr.msra.gmra.mrb[40].mxu1 %vm491_vm1, %v3164_v38 }
0x1b5c   : > { %7411 = vmatpush3.bf16.msra.mxu1 %v8679_v21  ;;  %6931 = vmatprep.mubr.msk.f32.mxu1 %vm8108_vm2, %v8109_v57 }
0x1b5d   : > { %7412 = vmatprep.subr.bf16.mxu1 %v8107_v29 }
0x1b60   : > { %7414 = vmatpush3.bf16.msra.mxu1 %v8690_v48  ;;  %v3337_v26 = vpop.permute.xlu1 %3336 }
0x1b61   : > { %7421 = vmatprep.subr.bf16.mxu1 %v8107_v29 }
0x1b63   : > { %6932 = vmatmul.mubr.msk.f32.vlgmr.msra.gmra.mrb[42].mxu1 %vm491_vm1, %v3337_v26 }
0x1b64   : > { %7423 = vmatpush3.bf16.msra.mxu1 %v8334_v31  ;;  %6953 = vmatprep.mubr.msk.f32.mxu1 %vm8108_vm2, %v8109_v57 }
0x1b65   : > { %7424 = vmatprep.subr.bf16.mxu1 %v8107_v29 }
0x1b68   : > { %7426 = vmatpush3.bf16.msra.mxu1 %v8359_v45 }
0x1b69   : > { %7433 = vmatprep.subr.bf16.mxu1 %v8107_v29 }
0x1b6b   : > { %6954 = vmatmul.mubr.msk.f32.vlgmr.msra.gmra.mrb[44].mxu1 %vm491_vm1, %v3337_v26 }
0x1b6c   : > { %7435 = vmatpush3.bf16.msra.mxu1 %v8603_v44  ;;  %6975 = vmatprep.mubr.msk.f32.mxu1 %vm8108_vm2, %v8109_v57 }
0x1b6d   : > { %7436 = vmatprep.subr.bf16.mxu1 %v8107_v29 }
0x1b70   : > { %7438 = vmatpush3.bf16.msra.mxu1 %v8617_v42 }
0x1b71   : > { %7445 = vmatprep.subr.bf16.mxu1 %v8107_v29 }
0x1c2e   : > { %v3235_v16 = vpop.f32.mrb[40].mxu1 }
0x1c2f   : > { %v6911_v41 = vpop.f32.mrb[41].mxu1 }
0x1c36   : > { %v3406_v49 = vpop.f32.mrb[42].mxu1 }
0x1c37   : > { %v3407_v17 = vadd.f32 %v3406_v49, %v3235_v16  ;;  %v6933_v10 = vpop.f32.mrb[43].mxu1 }
0x1c39   : > { %v3410_v46 = vadd.f32 %v9027_v24, %v3407_v17 }
0x1c3b   : > { %7788 = vtanh.f32 %v3410_v46  ;;  %v6147_v51 = vmul.f32 -1.442695, %v3410_v46 }
0x1c3e   : > { %v3579_v13 = vpop.f32.mrb[44].mxu1 }
0x1c3f   : > { %v3583_v39 = vadd.f32 %v3579_v13, %v910_v59  ;;  %v6955_v37 = vpop.f32.mrb[45].mxu1 }
0x1c41   : > { %7790 = vtanh.f32 %v3583_v39  ;;  %v6150_v63 = vmul.f32 -1.442695, %v3583_v39 }
0x1c42   : > { %7792 = vpow2.f32 %v6147_v51  ;;  %v915_v51 = vadd.f32 %v8859_v25, %v8717_v15 }
0x1c43   : > { %7794 = vpow2.f32 %v6150_v63 }
0x1c45   : > { %v7789_v23 = vpop.eup %7788 }
0x1c46   : > { %3420 = vrot.lane.b32.xlu0 %v7789_v23, %s8110_s28 }
0x1c4b   : > { %v7791_v50 = vpop.eup %7790 }
0x1c4c   : > { %3593 = vrot.lane.b32.xlu1 %v7791_v50, %s8110_s28  ;;  %v7793_v52 = vpop.eup %7792 }
0x1c4d   : > { %v3414_v40 = vadd.f32 1.0, %v7793_v52  ;;  %v7795_v27 = vpop.eup %7794 }
0x1c4e   : > { %v3587_v53 = vadd.f32 1.0, %v7795_v27 }
0x1c4f   : > { %7796 = vrcp.f32 %v3414_v40 }
0x1c50   : > { %7798 = vrcp.f32 %v3587_v53 }
0x1c59   : > { %v7797_v6 = vpop.eup %7796 }
0x1c5a   : > { %v7799_v22 = vpop.eup %7798  ;;  %v3418_v62 = vmul.f32 %v7797_v6, %v9037_v30 }
0x1c5b   : > { %v3591_v36 = vmul.f32 %v7799_v22, %v9041_v28 }
0x1cb8   : > { %v3421_v20 = vpop.permute.xlu0 %3420 }
0x1cb9   : > { %v3423_v47 = vmul.f32 %v7797_v6, %v3421_v20 }
0x1cbb   : > { %3425 = vrot.lane.b32.xlu0 %v3423_v47, %s8111_s8 }
0x1cbe   : > { %v3594_v14 = vpop.permute.xlu1 %3593 }
0x1cbf   : > { %v3596_v4 = vmul.f32 %v7799_v22, %v3594_v14 }
0x1cc1   : > { %3598 = vrot.lane.b32.xlu1 %v3596_v4, %s8111_s8 }
0x1d2d   : > { %v3426_v43 = vpop.permute.xlu0 %3425 }
0x1d2e   : > { %v9078_v55 = vadd.f32 %v3426_v43, %v3418_v62 }
0x1d30   : > { %7800 = vtanh.f32 %v9078_v55 }
0x1d33   : > { %v3599_v38 = vpop.permute.xlu1 %3598 }
0x1d34   : > { %v9082_v26 = vadd.f32 %v3599_v38, %v3591_v36 }
0x1d36   : > { %7802 = vtanh.f32 %v9082_v26 }
0x1d3a   : > { %v7801_v16 = vpop.eup %7800 }
0x1d3b   : > { %3431 = vrot.lane.b32.xlu0 %v7801_v16, %s8110_s28 }
0x1d40   : > { %v7803_v41 = vpop.eup %7802 }
0x1d41   : > { %3604 = vrot.lane.b32.xlu1 %v7803_v41, %s8110_s28 }
0x1dad   : > { %v3432_v49 = vpop.permute.xlu0 %3431 }
0x1dae   : > { %v3434_v30 = vmul.f32 %v7797_v6, %v3432_v49 }
0x1db0   : > { %3436 = vrot.lane.b32.xlu0 %v3434_v30, %s8111_s8 }
0x1db3   : > { %v3605_v17 = vpop.permute.xlu1 %3604 }
0x1db4   : > { %v3607_v10 = vmul.f32 %v7799_v22, %v3605_v17 }
0x1db6   : > { %3609 = vrot.lane.b32.xlu1 %v3607_v10, %s8111_s8 }
0x1e22   : > { %v3437_v28 = vpop.permute.xlu0 %3436 }
0x1e23   : > { %3439 = vst.msk [vmem:[#allocation3 + $0x40] sm:$0xff] %vm491_vm1, %v3437_v28  ;;  %6943 = vmatmul.mubr.msk.f32.vlgmr.msra.gmra.mrb[42].mxu0 %vm491_vm1, %v3437_v28 }
0x1e24   : > { %7429 = vmatpush3.bf16.msra.mxu0 %v8679_v21  ;;  %6964 = vmatprep.mubr.msk.f32.mxu0 %vm8108_vm2, %v8109_v57 }
0x1e25   : > { %7430 = vmatprep.subr.bf16.mxu0 %v8107_v29 }
0x1e28   : > { %7432 = vmatpush3.bf16.msra.mxu0 %v8690_v48  ;;  %v3610_v46 = vpop.permute.xlu1 %3609 }
0x1e29   : > { %7439 = vmatprep.subr.bf16.mxu0 %v8107_v29 }
0x1e2b   : > { %6965 = vmatmul.mubr.msk.f32.vlgmr.msra.gmra.mrb[44].mxu0 %vm491_vm1, %v3610_v46 }
0x1e2c   : > { %7441 = vmatpush3.bf16.msra.mxu0 %v8334_v31  ;;  %6986 = vmatprep.mubr.msk.f32.mxu0 %vm8108_vm2, %v8109_v57 }
0x1e2d   : > { %7442 = vmatprep.subr.bf16.mxu0 %v8107_v29 }
0x1e30   : > { %7444 = vmatpush3.bf16.msra.mxu0 %v8359_v45 }
0x1e31   : > { %7451 = vmatprep.subr.bf16.mxu0 %v8107_v29 }
0x1e33   : > { %6987 = vmatmul.mubr.msk.f32.vlgmr.msra.gmra.mrb[46].mxu0 %vm491_vm1, %v3610_v46 }
0x1e34   : > { %7453 = vmatpush3.bf16.msra.mxu0 %v8603_v44  ;;  %7008 = vmatprep.mubr.msk.f32.mxu0 %vm8108_vm2, %v8109_v57 }
0x1e35   : > { %7454 = vmatprep.subr.bf16.mxu0 %v8107_v29 }
0x1e38   : > { %7456 = vmatpush3.bf16.msra.mxu0 %v8617_v42 }
0x1e39   : > { %7463 = vmatprep.subr.bf16.mxu0 %v8107_v29 }
0x1ef6   : > { %v3508_v59 = vpop.f32.mrb[42].mxu0 }
0x1ef7   : > { %v6944_v13 = vpop.f32.mrb[43].mxu0 }
0x1efe   : > { %v3679_v39 = vpop.f32.mrb[44].mxu0 }
0x1eff   : > { %v3680_v37 = vadd.f32 %v3679_v39, %v3508_v59  ;;  %v6966_v23 = vpop.f32.mrb[45].mxu0 }
0x1f01   : > { %v3683_v50 = vadd.f32 %v9027_v24, %v3680_v37 }
0x1f03   : > { %7804 = vtanh.f32 %v3683_v50  ;;  %v6152_v6 = vmul.f32 -1.442695, %v3683_v50 }
0x1f06   : > { %v3852_v63 = vpop.f32.mrb[46].mxu0 }
0x1f07   : > { %v3856_v52 = vadd.f32 %v3852_v63, %v915_v51  ;;  %v6988_v40 = vpop.f32.mrb[47].mxu0 }
0x1f09   : > { %7806 = vtanh.f32 %v3856_v52  ;;  %v6155_v20 = vmul.f32 -1.442695, %v3856_v52 }
0x1f0a   : > { %7808 = vpow2.f32 %v6152_v6 }
0x1f0b   : > { %7810 = vpow2.f32 %v6155_v20 }
0x1f0d   : > { %v7805_v27 = vpop.eup %7804 }
0x1f0e   : > { %3693 = vrot.lane.b32.xlu0 %v7805_v27, %s8110_s28 }
0x1f13   : > { %v7807_v53 = vpop.eup %7806 }
0x1f14   : > { %3866 = vrot.lane.b32.xlu1 %v7807_v53, %s8110_s28  ;;  %v7809_v47 = vpop.eup %7808  ;;  %v920_v53 = vadd.f32 %v8859_v25, %v8715_v3 }
0x1f15   : > { %v3687_v22 = vadd.f32 1.0, %v7809_v47  ;;  %v7811_v14 = vpop.eup %7810 }
0x1f16   : > { %v3860_v4 = vadd.f32 1.0, %v7811_v14 }
0x1f17   : > { %7812 = vrcp.f32 %v3687_v22 }
0x1f18   : > { %7814 = vrcp.f32 %v3860_v4 }
0x1f21   : > { %v7813_v15 = vpop.eup %7812 }
0x1f22   : > { %v7815_v36 = vpop.eup %7814  ;;  %v3691_v41 = vmul.f32 %v7813_v15, %v9078_v55 }
0x1f23   : > { %v3864_v17 = vmul.f32 %v7815_v36, %v9082_v26 }
0x1f80   : > { %v3694_v62 = vpop.permute.xlu0 %3693 }
0x1f81   : > { %v3696_v43 = vmul.f32 %v7813_v15, %v3694_v62 }
0x1f83   : > { %3698 = vrot.lane.b32.xlu0 %v3696_v43, %s8111_s8 }
0x1f86   : > { %v3867_v38 = vpop.permute.xlu1 %3866 }
0x1f87   : > { %v3869_v16 = vmul.f32 %v7815_v36, %v3867_v38 }
0x1f89   : > { %3871 = vrot.lane.b32.xlu1 %v3869_v16, %s8111_s8 }
0x1ff5   : > { %v3699_v49 = vpop.permute.xlu0 %3698 }
0x1ff6   : > { %v9119_v30 = vadd.f32 %v3699_v49, %v3691_v41 }
0x1ff8   : > { %7816 = vtanh.f32 %v9119_v30 }
0x1ffb   : > { %v3872_v10 = vpop.permute.xlu1 %3871 }
0x1ffc   : > { %v9123_v28 = vadd.f32 %v3872_v10, %v3864_v17 }
0x1ffe   : > { %7818 = vtanh.f32 %v9123_v28 }
0x2002   : > { %v7817_v46 = vpop.eup %7816 }
0x2003   : > { %3704 = vrot.lane.b32.xlu0 %v7817_v46, %s8110_s28 }
0x2008   : > { %v7819_v59 = vpop.eup %7818 }
0x2009   : > { %3877 = vrot.lane.b32.xlu1 %v7819_v59, %s8110_s28 }
0x2075   : > { %v3705_v13 = vpop.permute.xlu0 %3704 }
0x2076   : > { %v3707_v55 = vmul.f32 %v7813_v15, %v3705_v13 }
0x2078   : > { %3709 = vrot.lane.b32.xlu0 %v3707_v55, %s8111_s8 }
0x207b   : > { %v3878_v39 = vpop.permute.xlu1 %3877 }
0x207c   : > { %v3880_v37 = vmul.f32 %v7815_v36, %v3878_v39 }
0x207e   : > { %3882 = vrot.lane.b32.xlu1 %v3880_v37, %s8111_s8 }
0x20ea   : > { %v3710_v26 = vpop.permute.xlu0 %3709 }
0x20eb   : > { %3712 = vst.msk [vmem:[#allocation3 + $0x48] sm:$0xff] %vm491_vm1, %v3710_v26  ;;  %6976 = vmatmul.mubr.msk.f32.vlgmr.msra.gmra.mrb[46].mxu1 %vm491_vm1, %v3710_v26 }
0x20ec   : > { %7447 = vmatpush3.bf16.msra.mxu1 %v8679_v21  ;;  %6997 = vmatprep.mubr.msk.f32.mxu1 %vm8108_vm2, %v8109_v57 }
0x20ed   : > { %7448 = vmatprep.subr.bf16.mxu1 %v8107_v29 }
0x20f0   : > { %7450 = vmatpush3.bf16.msra.mxu1 %v8690_v48  ;;  %v3883_v23 = vpop.permute.xlu1 %3882 }
0x20f1   : > { %7457 = vmatprep.subr.bf16.mxu1 %v8107_v29 }
0x20f3   : > { %6998 = vmatmul.mubr.msk.f32.vlgmr.msra.gmra.mrb[48].mxu1 %vm491_vm1, %v3883_v23 }
0x20f4   : > { %7459 = vmatpush3.bf16.msra.mxu1 %v8334_v31  ;;  %7019 = vmatprep.mubr.msk.f32.mxu1 %vm8108_vm2, %v8109_v57 }
0x20f5   : > { %7460 = vmatprep.subr.bf16.mxu1 %v8107_v29 }
0x20f8   : > { %7462 = vmatpush3.bf16.msra.mxu1 %v8359_v45 }
0x20f9   : > { %7469 = vmatprep.subr.bf16.mxu1 %v8107_v29 }
0x20fb   : > { %7020 = vmatmul.mubr.msk.f32.vlgmr.msra.gmra.mrb[50].mxu1 %vm491_vm1, %v3883_v23 }
0x20fc   : > { %7471 = vmatpush3.bf16.msra.mxu1 %v8603_v44  ;;  %7041 = vmatprep.mubr.msk.f32.mxu1 %vm8108_vm2, %v8109_v57 }
0x20fd   : > { %7472 = vmatprep.subr.bf16.mxu1 %v8107_v29 }
0x2100   : > { %7474 = vmatpush3.bf16.msra.mxu1 %v8617_v42 }
0x2101   : > { %7481 = vmatprep.subr.bf16.mxu1 %v8107_v29 }
0x21be   : > { %v3781_v50 = vpop.f32.mrb[46].mxu1 }
0x21bf   : > { %v6977_v51 = vpop.f32.mrb[47].mxu1 }
0x21c6   : > { %v3952_v63 = vpop.f32.mrb[48].mxu1 }
0x21c7   : > { %v3953_v52 = vadd.f32 %v3952_v63, %v3781_v50  ;;  %v6999_v40 = vpop.f32.mrb[49].mxu1 }
0x21c9   : > { %v3956_v27 = vadd.f32 %v9027_v24, %v3953_v52 }
0x21cb   : > { %7820 = vtanh.f32 %v3956_v27  ;;  %v6157_v4 = vmul.f32 -1.442695, %v3956_v27 }
0x21ce   : > { %v4125_v6 = vpop.f32.mrb[50].mxu1 }
0x21cf   : > { %v4129_v20 = vadd.f32 %v4125_v6, %v920_v53  ;;  %v7021_v47 = vpop.f32.mrb[51].mxu1 }
0x21d0   : > { %v9197_v47 = vld [vmem:[%s9603_s3] ss:$0 sm:$0xff] }
0x21d1   : > { %7822 = vtanh.f32 %v4129_v20  ;;  %v6160_v15 = vmul.f32 -1.442695, %v4129_v20 }
0x21d2   : > { %7824 = vpow2.f32 %v6157_v4 }
0x21d3   : > { %7826 = vpow2.f32 %v6160_v15 }
0x21d5   : > { %v7821_v22 = vpop.eup %7820 }
0x21d6   : > { %3966 = vrot.lane.b32.xlu0 %v7821_v22, %s8110_s28  ;;  %v925_v22 = vadd.f32 %v9197_v47, %v8721_v12 }
0x21db   : > { %v7823_v14 = vpop.eup %7822 }
0x21dc   : > { %4139 = vrot.lane.b32.xlu1 %v7823_v14, %s8110_s28  ;;  %v7825_v62 = vpop.eup %7824 }
0x21dd   : > { %v3960_v43 = vadd.f32 1.0, %v7825_v62  ;;  %v7827_v36 = vpop.eup %7826 }
0x21de   : > { %v4133_v38 = vadd.f32 1.0, %v7827_v36 }
0x21df   : > { %7828 = vrcp.f32 %v3960_v43 }
0x21e0   : > { %7830 = vrcp.f32 %v4133_v38 }
0x21e9   : > { %v7829_v3 = vpop.eup %7828 }
0x21ea   : > { %v7831_v41 = vpop.eup %7830  ;;  %v3964_v10 = vmul.f32 %v7829_v3, %v9119_v30 }
0x21eb   : > { %v4137_v13 = vmul.f32 %v7831_v41, %v9123_v28 }
0x2248   : > { %v3967_v25 = vpop.permute.xlu0 %3966 }
0x2249   : > { %v3969_v16 = vmul.f32 %v7829_v3, %v3967_v25 }
0x224b   : > { %3971 = vrot.lane.b32.xlu0 %v3969_v16, %s8111_s8 }
0x224e   : > { %v4140_v49 = vpop.permute.xlu1 %4139 }
0x224f   : > { %v4142_v17 = vmul.f32 %v7831_v41, %v4140_v49 }
0x2251   : > { %4144 = vrot.lane.b32.xlu1 %v4142_v17, %s8111_s8 }
0x22bd   : > { %v3972_v46 = vpop.permute.xlu0 %3971 }
0x22be   : > { %v9160_v59 = vadd.f32 %v3972_v46, %v3964_v10 }
0x22c0   : > { %7832 = vtanh.f32 %v9160_v59 }
0x22c3   : > { %v4145_v55 = vpop.permute.xlu1 %4144 }
0x22c4   : > { %v9164_v39 = vadd.f32 %v4145_v55, %v4137_v13 }
0x22c6   : > { %7834 = vtanh.f32 %v9164_v39 }
0x22ca   : > { %v7833_v37 = vpop.eup %7832 }
0x22cb   : > { %3977 = vrot.lane.b32.xlu0 %v7833_v37, %s8110_s28 }
0x22d0   : > { %v7835_v26 = vpop.eup %7834 }
0x22d1   : > { %4150 = vrot.lane.b32.xlu1 %v7835_v26, %s8110_s28 }
0x233d   : > { %v3978_v23 = vpop.permute.xlu0 %3977 }
0x233e   : > { %v3980_v30 = vmul.f32 %v7829_v3, %v3978_v23 }
0x2340   : > { %3982 = vrot.lane.b32.xlu0 %v3980_v30, %s8111_s8 }
0x2343   : > { %v4151_v50 = vpop.permute.xlu1 %4150 }
0x2344   : > { %v4153_v51 = vmul.f32 %v7831_v41, %v4151_v50 }
0x2346   : > { %4155 = vrot.lane.b32.xlu1 %v4153_v51, %s8111_s8 }
0x23b2   : > { %v3983_v28 = vpop.permute.xlu0 %3982 }
0x23b3   : > { %3985 = vst.msk [vmem:[#allocation3 + $0x50] sm:$0xff] %vm491_vm1, %v3983_v28  ;;  %7009 = vmatmul.mubr.msk.f32.vlgmr.msra.gmra.mrb[48].mxu0 %vm491_vm1, %v3983_v28 }
0x23b4   : > { %7465 = vmatpush3.bf16.msra.mxu0 %v8679_v21  ;;  %7030 = vmatprep.mubr.msk.f32.mxu0 %vm8108_vm2, %v8109_v57 }
0x23b5   : > { %7466 = vmatprep.subr.bf16.mxu0 %v8107_v29 }
0x23b8   : > { %7468 = vmatpush3.bf16.msra.mxu0 %v8690_v48  ;;  %v4156_v63 = vpop.permute.xlu1 %4155 }
0x23b9   : > { %7475 = vmatprep.subr.bf16.mxu0 %v8107_v29 }
0x23bb   : > { %7031 = vmatmul.mubr.msk.f32.vlgmr.msra.gmra.mrb[50].mxu0 %vm491_vm1, %v4156_v63 }
0x23bc   : > { %7477 = vmatpush3.bf16.msra.mxu0 %v8334_v31  ;;  %7052 = vmatprep.mubr.msk.f32.mxu0 %vm8108_vm2, %v8109_v57 }
0x23bd   : > { %7478 = vmatprep.subr.bf16.mxu0 %v8107_v29 }
0x23c0   : > { %7480 = vmatpush3.bf16.msra.mxu0 %v8359_v45 }
0x23c1   : > { %7487 = vmatprep.subr.bf16.mxu0 %v8107_v29 }
0x23c3   : > { %7053 = vmatmul.mubr.msk.f32.vlgmr.msra.gmra.mrb[52].mxu0 %vm491_vm1, %v4156_v63 }
0x23c4   : > { %7489 = vmatpush3.bf16.msra.mxu0 %v8603_v44  ;;  %7074 = vmatprep.mubr.msk.f32.mxu0 %vm8108_vm2, %v8109_v57 }
0x23c5   : > { %7490 = vmatprep.subr.bf16.mxu0 %v8107_v29 }
0x23c8   : > { %7492 = vmatpush3.bf16.msra.mxu0 %v8617_v42 }
0x23c9   : > { %7499 = vmatprep.subr.bf16.mxu0 %v8107_v29 }
0x2486   : > { %v4054_v52 = vpop.f32.mrb[48].mxu0 }
0x2487   : > { %v7010_v40 = vpop.f32.mrb[49].mxu0 }
0x248e   : > { %v4225_v27 = vpop.f32.mrb[50].mxu0 }
0x248f   : > { %v4226_v53 = vadd.f32 %v4225_v27, %v4054_v52  ;;  %v7032_v6 = vpop.f32.mrb[51].mxu0 }
0x2491   : > { %v4229_v20 = vadd.f32 %v9027_v24, %v4226_v53 }
0x2493   : > { %7836 = vtanh.f32 %v4229_v20  ;;  %v6162_v36 = vmul.f32 -1.442695, %v4229_v20 }
0x2496   : > { %v4398_v14 = vpop.f32.mrb[52].mxu0 }
0x2497   : > { %v4402_v4 = vadd.f32 %v4398_v14, %v925_v22  ;;  %v7054_v15 = vpop.f32.mrb[53].mxu0 }
0x2498   : > { %v930_v15 = vadd.f32 %v9197_v47, %v8719_v54 }
0x2499   : > { %7838 = vtanh.f32 %v4402_v4  ;;  %v6165_v38 = vmul.f32 -1.442695, %v4402_v4 }
0x249a   : > { %7840 = vpow2.f32 %v6162_v36 }
0x249b   : > { %7842 = vpow2.f32 %v6165_v38 }
0x249d   : > { %v7837_v62 = vpop.eup %7836 }
0x249e   : > { %4239 = vrot.lane.b32.xlu0 %v7837_v62, %s8110_s28 }
0x24a3   : > { %v7839_v43 = vpop.eup %7838 }
0x24a4   : > { %4412 = vrot.lane.b32.xlu1 %v7839_v43, %s8110_s28  ;;  %v7841_v3 = vpop.eup %7840 }
0x24a5   : > { %v4233_v25 = vadd.f32 1.0, %v7841_v3  ;;  %v7843_v16 = vpop.eup %7842 }
0x24a6   : > { %v4406_v41 = vadd.f32 1.0, %v7843_v16 }
0x24a7   : > { %7844 = vrcp.f32 %v4233_v25 }
0x24a8   : > { %7846 = vrcp.f32 %v4406_v41 }
0x24b1   : > { %v7845_v12 = vpop.eup %7844 }
0x24b2   : > { %v7847_v10 = vpop.eup %7846  ;;  %v4237_v55 = vmul.f32 %v7845_v12, %v9160_v59 }
0x24b3   : > { %v4410_v23 = vmul.f32 %v7847_v10, %v9164_v39 }
0x2510   : > { %v4240_v49 = vpop.permute.xlu0 %4239 }
0x2511   : > { %v4242_v17 = vmul.f32 %v7845_v12, %v4240_v49 }
0x2513   : > { %4244 = vrot.lane.b32.xlu0 %v4242_v17, %s8111_s8 }
0x2516   : > { %v4413_v46 = vpop.permute.xlu1 %4412 }
0x2517   : > { %v4415_v13 = vmul.f32 %v7847_v10, %v4413_v46 }
0x2519   : > { %4417 = vrot.lane.b32.xlu1 %v4415_v13, %s8111_s8 }
0x2585   : > { %v4245_v37 = vpop.permute.xlu0 %4244 }
0x2586   : > { %v9206_v26 = vadd.f32 %v4245_v37, %v4237_v55 }
0x2588   : > { %7848 = vtanh.f32 %v9206_v26 }
0x258b   : > { %v4418_v30 = vpop.permute.xlu1 %4417 }
0x258c   : > { %v9210_v50 = vadd.f32 %v4418_v30, %v4410_v23 }
0x258e   : > { %7850 = vtanh.f32 %v9210_v50 }
0x2592   : > { %v7849_v51 = vpop.eup %7848 }
0x2593   : > { %4250 = vrot.lane.b32.xlu0 %v7849_v51, %s8110_s28 }
0x2598   : > { %v7851_v28 = vpop.eup %7850 }
0x2599   : > { %4423 = vrot.lane.b32.xlu1 %v7851_v28, %s8110_s28 }
0x2605   : > { %v4251_v63 = vpop.permute.xlu0 %4250 }
0x2606   : > { %v4253_v59 = vmul.f32 %v7845_v12, %v4251_v63 }
0x2608   : > { %4255 = vrot.lane.b32.xlu0 %v4253_v59, %s8111_s8 }
0x260b   : > { %v4424_v52 = vpop.permute.xlu1 %4423 }
0x260c   : > { %v4426_v40 = vmul.f32 %v7847_v10, %v4424_v52 }
0x260e   : > { %4428 = vrot.lane.b32.xlu1 %v4426_v40, %s8111_s8 }
0x267a   : > { %v4256_v39 = vpop.permute.xlu0 %4255 }
0x267b   : > { %4258 = vst.msk [vmem:[#allocation3 + $0x58] sm:$0xff] %vm491_vm1, %v4256_v39  ;;  %7042 = vmatmul.mubr.msk.f32.vlgmr.msra.gmra.mrb[52].mxu1 %vm491_vm1, %v4256_v39 }
0x267c   : > { %7483 = vmatpush3.bf16.msra.mxu1 %v8679_v21  ;;  %7063 = vmatprep.mubr.msk.f32.mxu1 %vm8108_vm2, %v8109_v57 }
0x267d   : > { %7484 = vmatprep.subr.bf16.mxu1 %v8107_v29 }
0x2680   : > { %7486 = vmatpush3.bf16.msra.mxu1 %v8690_v48  ;;  %v4429_v27 = vpop.permute.xlu1 %4428 }
0x2681   : > { %7493 = vmatprep.subr.bf16.mxu1 %v8107_v29 }
0x2683   : > { %7064 = vmatmul.mubr.msk.f32.vlgmr.msra.gmra.mrb[54].mxu1 %vm491_vm1, %v4429_v27 }
0x2684   : > { %7495 = vmatpush3.bf16.msra.mxu1 %v8334_v31  ;;  %7085 = vmatprep.mubr.msk.f32.mxu1 %vm8108_vm2, %v8109_v57 }
0x2685   : > { %7496 = vmatprep.subr.bf16.mxu1 %v8107_v29 }
0x2688   : > { %7498 = vmatpush3.bf16.msra.mxu1 %v8359_v45 }
0x2689   : > { %7505 = vmatprep.subr.bf16.mxu1 %v8107_v29 }
0x268b   : > { %7086 = vmatmul.mubr.msk.f32.vlgmr.msra.gmra.mrb[56].mxu1 %vm491_vm1, %v4429_v27 }
0x268c   : > { %7507 = vmatpush3.bf16.msra.mxu1 %v8603_v44  ;;  %7107 = vmatprep.mubr.msk.f32.mxu1 %vm8108_vm2, %v8109_v57 }
0x268d   : > { %7508 = vmatprep.subr.bf16.mxu1 %v8107_v29 }
0x2690   : > { %7510 = vmatpush3.bf16.msra.mxu1 %v8617_v42 }
0x2691   : > { %7517 = vmatprep.subr.bf16.mxu1 %v8107_v29 }
0x274e   : > { %v4327_v53 = vpop.f32.mrb[52].mxu1 }
0x274f   : > { %v7043_v6 = vpop.f32.mrb[53].mxu1 }
0x2756   : > { %v4498_v20 = vpop.f32.mrb[54].mxu1 }
0x2757   : > { %v4499_v22 = vadd.f32 %v4498_v20, %v4327_v53  ;;  %v7065_v14 = vpop.f32.mrb[55].mxu1 }
0x2759   : > { %v4502_v4 = vadd.f32 %v9027_v24, %v4499_v22 }
0x275b   : > { %7852 = vtanh.f32 %v4502_v4  ;;  %v6167_v25 = vmul.f32 -1.442695, %v4502_v4 }
0x275e   : > { %v4671_v62 = vpop.f32.mrb[56].mxu1 }
0x275f   : > { %v4675_v43 = vadd.f32 %v4671_v62, %v930_v15  ;;  %v7087_v36 = vpop.f32.mrb[57].mxu1 }
0x2761   : > { %7854 = vtanh.f32 %v4675_v43  ;;  %v6170_v16 = vmul.f32 -1.442695, %v4675_v43 }
0x2762   : > { %7856 = vpow2.f32 %v6167_v25 }
0x2763   : > { %7858 = vpow2.f32 %v6170_v16 }
0x2765   : > { %v7853_v38 = vpop.eup %7852 }
0x2766   : > { %4512 = vrot.lane.b32.xlu0 %v7853_v38, %s8110_s28 }
0x276b   : > { %v7855_v3 = vpop.eup %7854 }
0x276c   : > { %4685 = vrot.lane.b32.xlu1 %v7855_v3, %s8110_s28  ;;  %v7857_v41 = vpop.eup %7856 }
0x276d   : > { %v4506_v12 = vadd.f32 1.0, %v7857_v41  ;;  %v7859_v49 = vpop.eup %7858 }
0x276e   : > { %v4679_v17 = vadd.f32 1.0, %v7859_v49 }
0x276f   : > { %7860 = vrcp.f32 %v4506_v12 }
0x2770   : > { %7862 = vrcp.f32 %v4679_v17 }
0x2779   : > { %v7861_v54 = vpop.eup %7860 }
0x277a   : > { %v7863_v13 = vpop.eup %7862  ;;  %v4510_v23 = vmul.f32 %v7861_v54, %v9206_v26 }
0x277b   : > { %v4683_v28 = vmul.f32 %v7863_v13, %v9210_v50 }
0x27d8   : > { %v4513_v10 = vpop.permute.xlu0 %4512 }
0x27d9   : > { %v4515_v46 = vmul.f32 %v7861_v54, %v4513_v10 }
0x27db   : > { %4517 = vrot.lane.b32.xlu0 %v4515_v46, %s8111_s8 }
0x27de   : > { %v4686_v55 = vpop.permute.xlu1 %4685 }
0x27df   : > { %v4688_v37 = vmul.f32 %v7863_v13, %v4686_v55 }
0x27e1   : > { %4690 = vrot.lane.b32.xlu1 %v4688_v37, %s8111_s8 }
0x284d   : > { %v4518_v30 = vpop.permute.xlu0 %4517 }
0x284e   : > { %v9247_v51 = vadd.f32 %v4518_v30, %v4510_v23 }
0x2850   : > { %7864 = vtanh.f32 %v9247_v51 }
0x2853   : > { %v4691_v63 = vpop.permute.xlu1 %4690 }
0x2854   : > { %v9251_v59 = vadd.f32 %v4691_v63, %v4683_v28 }
0x2856   : > { %7866 = vtanh.f32 %v9251_v59 }
0x285a   : > { %v7865_v52 = vpop.eup %7864 }
0x285b   : > { %4523 = vrot.lane.b32.xlu0 %v7865_v52, %s8110_s28 }
0x2860   : > { %v7867_v40 = vpop.eup %7866 }
0x2861   : > { %4696 = vrot.lane.b32.xlu1 %v7867_v40, %s8110_s28 }
0x28cd   : > { %v4524_v39 = vpop.permute.xlu0 %4523 }
0x28ce   : > { %v4526_v26 = vmul.f32 %v7861_v54, %v4524_v39 }
0x28d0   : > { %4528 = vrot.lane.b32.xlu0 %v4526_v26, %s8111_s8 }
0x28d3   : > { %v4697_v27 = vpop.permute.xlu1 %4696 }
0x28d4   : > { %v4699_v53 = vmul.f32 %v7863_v13, %v4697_v27 }
0x28d6   : > { %4701 = vrot.lane.b32.xlu1 %v4699_v53, %s8111_s8 }
0x2942   : > { %v4529_v50 = vpop.permute.xlu0 %4528 }
0x2943   : > { %4531 = vst.msk [vmem:[#allocation3 + $0x60] sm:$0xff] %vm491_vm1, %v4529_v50  ;;  %7075 = vmatmul.mubr.msk.f32.vlgmr.msra.gmra.mrb[54].mxu0 %vm491_vm1, %v4529_v50  ;;  %v5351_v50 = vld [vmem:[%s9602_s2 + $0xc0] sm:$0xff] }
0x2944   : > { %7501 = vmatpush3.bf16.msra.mxu0 %v8679_v21  ;;  %7096 = vmatprep.mubr.msk.f32.mxu0 %vm8108_vm2, %v8109_v57 }
0x2945   : > { %7502 = vmatprep.subr.bf16.mxu0 %v8107_v29 }
0x2948   : > { %7504 = vmatpush3.bf16.msra.mxu0 %v8690_v48  ;;  %v4702_v6 = vpop.permute.xlu1 %4701 }
0x2949   : > { %7511 = vmatprep.subr.bf16.mxu0 %v8107_v29 }
0x294b   : > { %7097 = vmatmul.mubr.msk.f32.vlgmr.msra.gmra.mrb[56].mxu0 %vm491_vm1, %v4702_v6 }
0x294c   : > { %7513 = vmatpush3.bf16.msra.mxu0 %v8334_v31  ;;  %7118 = vmatprep.mubr.msk.f32.mxu0 %vm8108_vm2, %v8109_v57 }
0x294d   : > { %7514 = vmatprep.subr.bf16.mxu0 %v8107_v29 }
0x2950   : > { %7516 = vmatpush3.bf16.msra.mxu0 %v8359_v45 }
0x2951   : > { %7523 = vmatprep.subr.bf16.mxu0 %v8107_v29 }
0x2953   : > { %7119 = vmatmul.mubr.msk.f32.vlgmr.msra.gmra.mrb[58].mxu0 %vm491_vm1, %v4702_v6  ;;  %v5352_v6 = vld [vmem:[%s9602_s2 + $0xc8] sm:$0xff] }
0x2954   : > { %7525 = vmatpush3.bf16.msra.mxu0 %v8603_v44  ;;  %7140 = vmatprep.mubr.msk.f32.mxu0 %vm8108_vm2, %v8109_v57  ;;  %v935_v44 = vadd.f32 %v9197_v47, %v8725_v11 }
0x2955   : > { %7526 = vmatprep.subr.bf16.mxu0 %v8107_v29 }
0x2958   : > { %7528 = vmatpush3.bf16.msra.mxu0 %v8617_v42 }
0x2959   : > { %7535 = vmatprep.subr.bf16.mxu0 %v8107_v29 }
0x2a16   : > { %v4600_v20 = vpop.f32.mrb[54].mxu0 }
0x2a17   : > { %v7076_v22 = vpop.f32.mrb[55].mxu0 }
0x2a18   : > { %v5353_v22 = vld [vmem:[%s9602_s2 + $0xd0] sm:$0xff] }
0x2a1e   : > { %v4771_v14 = vpop.f32.mrb[56].mxu0 }
0x2a1f   : > { %v4772_v4 = vadd.f32 %v4771_v14, %v4600_v20  ;;  %v7098_v15 = vpop.f32.mrb[57].mxu0  ;;  %v7541_v20 = vpack.c.bf16 %v5352_v6, %v5351_v50  ;;  %v5354_v14 = vld [vmem:[%s9602_s2 + $0xd8] sm:$0xff] }
0x2a20   : > { %v5357_v15 = vld [vmem:[#allocation3 + $0x8] sm:$0xff] }
0x2a21   : > { %v4775_v62 = vadd.f32 %v9027_v24, %v4772_v4  ;;  %v7545_v4 = vpack.c.bf16 %v5354_v14, %v5353_v22 }
0x2a23   : > { %7868 = vtanh.f32 %v4775_v62  ;;  %v6172_v25 = vmul.f32 -1.442695, %v4775_v62  ;;  %v5358_v62 = vld [vmem:[#allocation3 + $0x10] sm:$0xff] }
0x2a26   : > { %v4944_v43 = vpop.f32.mrb[58].mxu0 }
0x2a27   : > { %v4948_v36 = vadd.f32 %v4944_v43, %v935_v44  ;;  %v7120_v38 = vpop.f32.mrb[59].mxu0  ;;  %v5359_v44 = vld [vmem:[#allocation3 + $0x18] sm:$0xff]  ;;  %v5361_v43 = vld [vmem:[#allocation3 + $0x28] sm:$0xff] }
0x2a28   : > { %v5363_v38 = vld [vmem:[#allocation3 + $0x38] sm:$0xff] }
0x2a29   : > { %7870 = vtanh.f32 %v4948_v36  ;;  %v6175_v16 = vmul.f32 -1.442695, %v4948_v36  ;;  %v5362_v36 = vld [vmem:[#allocation3 + $0x30] sm:$0xff] }
0x2a2a   : > { %7872 = vpow2.f32 %v6172_v25  ;;  %v5366_v25 = vld [vmem:[#allocation3 + $0x50] sm:$0xff] }
0x2a2b   : > { %7874 = vpow2.f32 %v6175_v16  ;;  %v5367_v16 = vld [vmem:[#allocation3 + $0x58] sm:$0xff] }
0x2a2d   : > { %v7869_v3 = vpop.eup %7868 }
0x2a2e   : > { %4785 = vrot.lane.b32.xlu0 %v7869_v3, %s8110_s28  ;;  %v5364_v3 = vld [vmem:[#allocation3 + $0x40] sm:$0xff] }
0x2a33   : > { %v7871_v42 = vpop.eup %7870 }
0x2a34   : > { %4958 = vrot.lane.b32.xlu1 %v7871_v42, %s8110_s28  ;;  %v7873_v41 = vpop.eup %7872  ;;  %v5365_v42 = vld [vmem:[#allocation3 + $0x48] sm:$0xff] }
0x2a35   : > { %v4779_v24 = vadd.f32 1.0, %v7873_v41  ;;  %v7875_v12 = vpop.eup %7874  ;;  %v5368_v41 = vld [vmem:[#allocation3 + $0x60] sm:$0xff] }
0x2a36   : > { %v4952_v49 = vadd.f32 1.0, %v7875_v12 }
0x2a37   : > { %7876 = vrcp.f32 %v4779_v24 }
0x2a38   : > { %7878 = vrcp.f32 %v4952_v49 }
0x2a41   : > { %v7877_v11 = vpop.eup %7876 }
0x2a42   : > { %v7879_v10 = vpop.eup %7878  ;;  %v4783_v55 = vmul.f32 %v7877_v11, %v9247_v51 }
0x2a43   : > { %v4956_v30 = vmul.f32 %v7879_v10, %v9251_v59 }
0x2aa0   : > { %v4786_v17 = vpop.permute.xlu0 %4785 }
0x2aa1   : > { %v4788_v54 = vmul.f32 %v7877_v11, %v4786_v17 }
0x2aa3   : > { %4790 = vrot.lane.b32.xlu0 %v4788_v54, %s8111_s8 }
0x2aa6   : > { %v4959_v46 = vpop.permute.xlu1 %4958 }
0x2aa7   : > { %v4961_v13 = vmul.f32 %v7879_v10, %v4959_v46 }
0x2aa9   : > { %4963 = vrot.lane.b32.xlu1 %v4961_v13, %s8111_s8  ;;  %v940_v13 = vadd.f32 %v9197_v47, %v8723_v0 }
0x2b15   : > { %v4791_v37 = vpop.permute.xlu0 %4790 }
0x2b16   : > { %v9288_v23 = vadd.f32 %v4791_v37, %v4783_v55 }
0x2b18   : > { %7880 = vtanh.f32 %v9288_v23 }
0x2b1b   : > { %v4964_v28 = vpop.permute.xlu1 %4963 }
0x2b1c   : > { %v9292_v63 = vadd.f32 %v4964_v28, %v4956_v30  ;;  %v9357_v28 = vld [vmem:[%s9603_s3 + $0x4] ss:$0 sm:$0xff] }
0x2b1e   : > { %7882 = vtanh.f32 %v9292_v63 }
0x2b22   : > { %v7881_v52 = vpop.eup %7880 }
0x2b23   : > { %4796 = vrot.lane.b32.xlu0 %v7881_v52, %s8110_s28 }
0x2b28   : > { %v7883_v40 = vpop.eup %7882 }
0x2b29   : > { %4969 = vrot.lane.b32.xlu1 %v7883_v40, %s8110_s28 }
0x2b95   : > { %v4797_v39 = vpop.permute.xlu0 %4796 }
0x2b96   : > { %v4799_v51 = vmul.f32 %v7877_v11, %v4797_v39 }
0x2b98   : > { %4801 = vrot.lane.b32.xlu0 %v4799_v51, %s8111_s8 }
0x2b9b   : > { %v4970_v26 = vpop.permute.xlu1 %4969 }
0x2b9c   : > { %v4972_v27 = vmul.f32 %v7879_v10, %v4970_v26  ;;  %v9343_v10 = vld [vmem:[%s9603_s3 + $0x1] ss:$0 sm:$0xff] }
0x2b9e   : > { %4974 = vrot.lane.b32.xlu1 %v4972_v27, %s8111_s8 }
0x2c0a   : > { %v4802_v59 = vpop.permute.xlu0 %4801 }
0x2c0b   : > { %4804 = vst.msk [vmem:[#allocation3 + $0x68] sm:$0xff] %vm491_vm1, %v4802_v59  ;;  %7108 = vmatmul.mubr.msk.f32.vlgmr.msra.gmra.mrb[58].mxu1 %vm491_vm1, %v4802_v59 }
0x2c0c   : > { %7519 = vmatpush3.bf16.msra.mxu1 %v8679_v21  ;;  %7129 = vmatprep.mubr.msk.f32.mxu1 %vm8108_vm2, %v8109_v57 }
0x2c0d   : > { %7520 = vmatprep.subr.bf16.mxu1 %v8107_v29 }
0x2c10   : > { %7522 = vmatpush3.bf16.msra.mxu1 %v8690_v48  ;;  %v4975_v53 = vpop.permute.xlu1 %4974 }
0x2c11   : > { %7529 = vmatprep.subr.bf16.mxu1 %v8107_v29 }
0x2c12   : > { %v5369_v24 = vld [vmem:[#allocation3 + $0x68] sm:$0xff] }
0x2c13   : > { %7130 = vmatmul.mubr.msk.f32.vlgmr.msra.gmra.mrb[60].mxu1 %vm491_vm1, %v4975_v53 }
0x2c14   : > { %7531 = vmatpush3.bf16.msra.mxu1 %v8334_v31  ;;  %7151 = vmatprep.mubr.msk.f32.mxu1 %vm8108_vm2, %v8109_v57  ;;  %v5356_v31 = vld [vmem:[#allocation3] sm:$0xff] }
0x2c15   : > { %7532 = vmatprep.subr.bf16.mxu1 %v8107_v29 }
0x2c18   : > { %7534 = vmatpush3.bf16.msra.mxu1 %v8359_v45  ;;  %v5360_v45 = vld [vmem:[#allocation3 + $0x20] sm:$0xff] }
0x2c19   : > { %7542 = vmatprep.subr.bf16.mxu1 %v7541_v20 }
0x2c1b   : > { %7152 = vmatmul.mubr.msk.f32.vlgmr.msra.gmra.mrb[62].mxu1 %vm491_vm1, %v4975_v53 }
0x2c1c   : > { %7544 = vmatpush3.bf16.msra.mxu1 %v7541_v20  ;;  %7173 = vmatprep.mubr.msk.f32.mxu1 %vm491_vm1, %v5356_v31 }
0x2c1d   : > { %7546 = vmatprep.subr.bf16.mxu1 %v7545_v4 }
0x2c20   : > { %7548 = vmatpush3.bf16.msra.mxu1 %v7545_v4 }
0x2c23   : > { %7174 = vmatmul.mubr.msk.f32.vlgmr.msra.gmra.mrb[64].mxu1 %vm491_vm1, %v5357_v15 }
0x2c24   : > { %7176 = vmatprep.mubr.msk.f32.mxu1 %vm491_vm1, %v5358_v62 }
0x2c27   : > { %7177 = vmatmul.mubr.msk.f32.gmra.mrb[66].mxu1 %vm491_vm1, %v5359_v44 }
0x2c28   : > { %7179 = vmatprep.mubr.msk.f32.mxu1 %vm491_vm1, %v5360_v45 }
0x2c2b   : > { %7180 = vmatmul.mubr.msk.f32.gmra.mrb[68].mxu1 %vm491_vm1, %v5361_v43 }
0x2c2c   : > { %7182 = vmatprep.mubr.msk.f32.mxu1 %vm491_vm1, %v5362_v36 }
0x2c2f   : > { %7183 = vmatmul.mubr.msk.f32.gmra.mrb[70].mxu1 %vm491_vm1, %v5363_v38 }
0x2c30   : > { %7185 = vmatprep.mubr.msk.f32.mxu1 %vm491_vm1, %v5364_v3 }
0x2c33   : > { %7186 = vmatmul.mubr.msk.f32.gmra.mrb[72].mxu1 %vm491_vm1, %v5365_v42 }
0x2c34   : > { %7188 = vmatprep.mubr.msk.f32.mxu1 %vm491_vm1, %v5366_v25 }
0x2c37   : > { %7189 = vmatmul.mubr.msk.f32.gmra.mrb[74].mxu1 %vm491_vm1, %v5367_v16 }
0x2c38   : > { %7191 = vmatprep.mubr.msk.f32.mxu1 %vm491_vm1, %v5368_v41 }
0x2c3b   : > { %7192 = vmatmul.mubr.msk.f32.gmra.mrb[76].mxu1 %vm491_vm1, %v5369_v24 }
0x2cde   : > { %v4873_v12 = vpop.f32.mrb[58].mxu1 }
0x2cdf   : > { %v7109_v49 = vpop.f32.mrb[59].mxu1 }
0x2ce6   : > { %v5044_v11 = vpop.f32.mrb[60].mxu1 }
0x2ce7   : > { %v5045_v17 = vadd.f32 %v5044_v11, %v4873_v12  ;;  %v7131_v54 = vpop.f32.mrb[61].mxu1 }
0x2ce9   : > { %v9346_v46 = vadd.f32 %v9343_v10, %v5045_v17 }
0x2ceb   : > { %7884 = vtanh.f32 %v9346_v46 }
0x2cee   : > { %v5217_v55 = vpop.f32.mrb[62].mxu1 }
0x2cef   : > { %v9351_v37 = vadd.f32 %v5217_v55, %v940_v13  ;;  %v7153_v30 = vpop.f32.mrb[63].mxu1 }
0x2cf1   : > { %7886 = vtanh.f32 %v9351_v37 }
0x2cf5   : > { %v7885_v52 = vpop.eup %7884 }
0x2cf6   : > { %5058 = vrot.lane.b32.xlu0 %v7885_v52, %s8110_s28  ;;  %v7175_v40 = vpop.f32.mrb[64].mxu1 }
0x2cf7   : > { %v5496_v39 = vadd.f32 %v7175_v40, %v9357_v28  ;;  %v5490_v51 = vpop.f32.mrb[65].mxu1 }
0x2cf8   : > { %v5491_v0 = vadd.f32 %v9357_v28, %v5490_v51 }
0x2cf9   : > { %v6201_v47 = vmul.f32 -1.442695, %v5496_v39 }
0x2cfa   : > { %v6200_v26 = vmul.f32 -1.442695, %v5491_v0  ;;  %v7178_v27 = vpop.f32.mrb[66].mxu1 }
0x2cfb   : > { %v7887_v59 = vpop.eup %7886  ;;  %7888 = vpow2.f32 %v6201_v47  ;;  %v5506_v53 = vadd.f32 %v7178_v27, %v9357_v28  ;;  %v5500_v50 = vpop.f32.mrb[67].mxu1 }
0x2cfc   : > { %7890 = vpow2.f32 %v6200_v26  ;;  %v5501_v6 = vadd.f32 %v9357_v28, %v5500_v50  ;;  %5231 = vrot.lane.b32.xlu1 %v7887_v59, %s8110_s28 }
0x2cfd   : > { %v6203_v20 = vmul.f32 -1.442695, %v5506_v53 }
0x2cfe   : > { %v6202_v22 = vmul.f32 -1.442695, %v5501_v6  ;;  %v7181_v14 = vpop.f32.mrb[68].mxu1 }
0x2cff   : > { %7892 = vpow2.f32 %v6203_v20  ;;  %v5516_v4 = vadd.f32 %v7181_v14, %v9357_v28  ;;  %v5510_v31 = vpop.f32.mrb[69].mxu1 }
0x2d00   : > { %v5511_v15 = vadd.f32 %v9357_v28, %v5510_v31  ;;  %7894 = vpow2.f32 %v6202_v22 }
0x2d01   : > { %v6205_v62 = vmul.f32 -1.442695, %v5516_v4 }
0x2d02   : > { %v6204_v44 = vmul.f32 -1.442695, %v5511_v15  ;;  %v7184_v45 = vpop.f32.mrb[70].mxu1 }
0x2d03   : > { %7896 = vpow2.f32 %v6205_v62  ;;  %v5526_v43 = vadd.f32 %v7184_v45, %v9357_v28  ;;  %v5520_v36 = vpop.f32.mrb[71].mxu1 }
0x2d04   : > { %7898 = vpow2.f32 %v6204_v44  ;;  %v5521_v38 = vadd.f32 %v9357_v28, %v5520_v36 }
0x2d05   : > { %v7889_v3 = vpop.eup %7888  ;;  %v6207_v42 = vmul.f32 -1.442695, %v5526_v43 }
0x2d06   : > { %v7891_v25 = vpop.eup %7890  ;;  %v5618_v16 = vadd.f32 1.0, %v7889_v3  ;;  %v6206_v41 = vmul.f32 -1.442695, %v5521_v38  ;;  %v7187_v24 = vpop.f32.mrb[72].mxu1 }
0x2d07   : > { %v5617_v12 = vadd.f32 1.0, %v7891_v25  ;;  %7900 = vpow2.f32 %v6207_v42  ;;  %v5536_v49 = vadd.f32 %v7187_v24, %v9357_v28  ;;  %v5530_v11 = vpop.f32.mrb[73].mxu1 }
0x2d08   : > { %7902 = vrcp.f32 %v5618_v16  ;;  %v5531_v17 = vadd.f32 %v9357_v28, %v5530_v11 }
0x2d09   : > { %v7893_v54 = vpop.eup %7892  ;;  %7904 = vrcp.f32 %v5617_v12  ;;  %v6209_v13 = vmul.f32 -1.442695, %v5536_v49 }
0x2d0a   : > { %v5620_v55 = vadd.f32 1.0, %v7893_v54  ;;  %7906 = vpow2.f32 %v6206_v41  ;;  %v6208_v30 = vmul.f32 -1.442695, %v5531_v17  ;;  %v7190_v52 = vpop.f32.mrb[74].mxu1  ;;  %v7895_v40 = vpop.eup %7894 }
0x2d0b   : > { %7908 = vpow2.f32 %v6209_v13  ;;  %v5546_v39 = vadd.f32 %v7190_v52, %v9357_v28  ;;  %v5540_v51 = vpop.f32.mrb[75].mxu1  ;;  %v5619_v0 = vadd.f32 1.0, %v7895_v40 }
0x2d0c   : > { %7910 = vrcp.f32 %v5620_v55  ;;  %v5541_v47 = vadd.f32 %v9357_v28, %v5540_v51 }
0x2d0d   : > { %v7897_v26 = vpop.eup %7896  ;;  %7912 = vpow2.f32 %v6208_v30  ;;  %v6211_v27 = vmul.f32 -1.442695, %v5546_v39 }
0x2d0e   : > { %v7899_v59 = vpop.eup %7898  ;;  %7914 = vrcp.f32 %v5619_v0  ;;  %v5622_v53 = vadd.f32 1.0, %v7897_v26  ;;  %v6210_v50 = vmul.f32 -1.442695, %v5541_v47  ;;  %v7193_v6 = vpop.f32.mrb[76].mxu1 }
0x2d0f   : > { %v5621_v20 = vadd.f32 1.0, %v7899_v59  ;;  %7916 = vpow2.f32 %v6211_v27  ;;  %v5556_v22 = vadd.f32 %v7193_v6, %v9357_v28  ;;  %v5550_v14 = vpop.f32.mrb[77].mxu1 }
0x2d10   : > { %7918 = vrcp.f32 %v5622_v53  ;;  %v5551_v4 = vadd.f32 %v9357_v28, %v5550_v14 }
0x2d11   : > { %v7901_v31 = vpop.eup %7900  ;;  %7920 = vrcp.f32 %v5621_v20  ;;  %v6213_v15 = vmul.f32 -1.442695, %v5556_v22 }
0x2d12   : > { %v7903_v62 = vpop.eup %7902  ;;  %v5624_v44 = vadd.f32 1.0, %v7901_v31  ;;  %7922 = vpow2.f32 %v6210_v50  ;;  %v6212_v45 = vmul.f32 -1.442695, %v5551_v4  ;;  %v6177_v4 = vmul.f32 -1.442695, %v9346_v46 }
0x2d13   : > { %v7905_v43 = vpop.eup %7904  ;;  %7924 = vpow2.f32 %v6213_v15  ;;  %v9376_v36 = vmul.f32 %v7903_v62, %v8307_v18 }
0x2d14   : > { %v7907_v38 = vpop.eup %7906  ;;  %7926 = vrcp.f32 %v5624_v44  ;;  %v9379_v3 = vmul.f32 %v7905_v43, %v8309_v19 }
0x2d15   : > { %v7909_v42 = vpop.eup %7908  ;;  %v5623_v25 = vadd.f32 1.0, %v7907_v38  ;;  %7928 = vpow2.f32 %v6212_v45 }
0x2d16   : > { %v7911_v16 = vpop.eup %7910  ;;  %v5626_v41 = vadd.f32 1.0, %v7909_v42 }
0x2d17   : > { %v7913_v24 = vpop.eup %7912  ;;  %7930 = vrcp.f32 %v5623_v25  ;;  %v9382_v12 = vmul.f32 %v7911_v16, %v8384_v56 }
0x2d18   : > { %v7915_v49 = vpop.eup %7914  ;;  %7932 = vrcp.f32 %v5626_v41  ;;  %v5625_v11 = vadd.f32 1.0, %v7913_v24 }
0x2d19   : > { %v7917_v18 = vpop.eup %7916  ;;  %v9385_v17 = vmul.f32 %v7915_v49, %v8388_v58  ;;  %v5682_v49 = vld [vmem:[%s9602_s2 + $0xe8] sm:$0xff] }
0x2d1a   : > { %v7919_v54 = vpop.eup %7918  ;;  %7934 = vrcp.f32 %v5625_v11  ;;  %v5628_v19 = vadd.f32 1.0, %v7917_v18  ;;  %v5683_v11 = vld [vmem:[%s9602_s2 + $0xf0] sm:$0xff]  ;;  %v5684_v18 = vld [vmem:[%s9602_s2 + $0xf8] sm:$0xff] }
0x2d1b   : > { %v7921_v13 = vpop.eup %7920  ;;  %v9388_v55 = vmul.f32 %v7919_v54, %v8394_v60 }
0x2d1c   : > { %v7923_v30 = vpop.eup %7922  ;;  %7936 = vrcp.f32 %v5628_v19  ;;  %v9391_v52 = vmul.f32 %v7921_v13, %v8396_v61  ;;  %v7553_v19 = vpack.c.bf16 %v5684_v18, %v5683_v11 }
0x2d1d   : > { %v7925_v56 = vpop.eup %7924  ;;  %v5627_v40 = vadd.f32 1.0, %v7923_v30 }
0x2d1e   : > { %v7927_v39 = vpop.eup %7926  ;;  %v5630_v51 = vadd.f32 1.0, %v7925_v56 }
0x2d1f   : > { %v7929_v0 = vpop.eup %7928  ;;  %7938 = vrcp.f32 %v5627_v40  ;;  %v9394_v58 = vmul.f32 %v7927_v39, %v8406_v1 }
0x2d20   : > { %7940 = vrcp.f32 %v5630_v51  ;;  %v5629_v47 = vadd.f32 1.0, %v7929_v0 }
0x2d21   : > { %v7931_v26 = vpop.eup %7930 }
0x2d22   : > { %v7933_v27 = vpop.eup %7932  ;;  %7942 = vrcp.f32 %v5629_v47  ;;  %v9397_v60 = vmul.f32 %v7931_v26, %v8408_v2 }
0x2d23   : > { %v9400_v61 = vmul.f32 %v7933_v27, %v8414_v5  ;;  %7944 = vpow2.f32 %v6177_v4 }
0x2d24   : > { %v7935_v59 = vpop.eup %7934 }
0x2d25   : > { %v9403_v53 = vmul.f32 %v7935_v59, %v8418_v7  ;;  %v6180_v7 = vmul.f32 -1.442695, %v9351_v37 }
0x2d26   : > { %v7937_v50 = vpop.eup %7936 }
0x2d27   : > { %v9406_v6 = vmul.f32 %v7937_v50, %v8420_v8  ;;  %7946 = vpow2.f32 %v6180_v7 }
0x2d29   : > { %v7939_v1 = vpop.eup %7938 }
0x2d2a   : > { %v7941_v20 = vpop.eup %7940  ;;  %v9409_v22 = vmul.f32 %v7939_v1, %v8422_v9 }
0x2d2b   : > { %v9412_v14 = vmul.f32 %v7941_v20, %v8446_v32 }
0x2d2c   : > { %v7943_v2 = vpop.eup %7942 }
0x2d2d   : > { %v9415_v5 = vmul.f32 %v7943_v2, %v8448_v33  ;;  %v7945_v8 = vpop.eup %7944 }
0x2d2e   : > { %v5052_v31 = vadd.f32 1.0, %v7945_v8 }
0x2d30   : > { %7948 = vrcp.f32 %v5052_v31 }
0x2d31   : > { %v7947_v15 = vpop.eup %7946 }
0x2d32   : > { %v5225_v62 = vadd.f32 1.0, %v7947_v15 }
0x2d34   : > { %7950 = vrcp.f32 %v5225_v62 }
0x2d3a   : > { %v7949_v9 = vpop.eup %7948 }
0x2d3b   : > { %v5056_v46 = vmul.f32 %v7949_v9, %v9288_v23  ;;  %v5681_v23 = vld [vmem:[%s9602_s2 + $0xe0] sm:$0xff] }
0x2d3e   : > { %v7951_v45 = vpop.eup %7950 }
0x2d3f   : > { %v5229_v42 = vmul.f32 %v7951_v45, %v9292_v63  ;;  %v7549_v63 = vpack.c.bf16 %v5682_v49, %v5681_v23 }
0x2d41   : > { %7557 = vmatprep.subr.bf16.mxu1 %v7549_v63 }
0x2d42   : > { %7559 = vmatpush3.bf16.msra.mxu1 %v7549_v63 }
0x2d43   : > { %7558 = vmatprep.subr.bf16.mxu1 %v7553_v19 }
0x2d46   : > { %7560 = vmatpush3.bf16.msra.mxu1 %v7553_v19 }
0x2d68   : > { %v5059_v44 = vpop.permute.xlu0 %5058 }
0x2d69   : > { %v5061_v32 = vmul.f32 %v7949_v9, %v5059_v44 }
0x2d6b   : > { %5063 = vrot.lane.b32.xlu0 %v5061_v32, %s8111_s8 }
0x2d6e   : > { %v5232_v33 = vpop.permute.xlu1 %5231 }
0x2d6f   : > { %v5234_v43 = vmul.f32 %v7951_v45, %v5232_v33 }
0x2d71   : > { %5236 = vrot.lane.b32.xlu1 %v5234_v43, %s8111_s8 }
0x2ddd   : > { %v5064_v37 = vpop.permute.xlu0 %5063 }
0x2dde   : > { %v9422_v38 = vadd.f32 %v5064_v37, %v5056_v46 }
0x2de0   : > { %7952 = vtanh.f32 %v9422_v38 }
0x2de3   : > { %v5237_v25 = vpop.permute.xlu1 %5236 }
0x2de4   : > { %v9426_v16 = vadd.f32 %v5237_v25, %v5229_v42 }
0x2de6   : > { %7954 = vtanh.f32 %v9426_v16 }
0x2dea   : > { %v7953_v41 = vpop.eup %7952 }
0x2deb   : > { %5069 = vrot.lane.b32.xlu0 %v7953_v41, %s8110_s28 }
0x2df0   : > { %v7955_v24 = vpop.eup %7954 }
0x2df1   : > { %5242 = vrot.lane.b32.xlu1 %v7955_v24, %s8110_s28 }
0x2e5d   : > { %v5070_v54 = vpop.permute.xlu0 %5069 }
0x2e5e   : > { %v5072_v13 = vmul.f32 %v7949_v9, %v5070_v54 }
0x2e60   : > { %5074 = vrot.lane.b32.xlu0 %v5072_v13, %s8111_s8 }
0x2e63   : > { %v5243_v30 = vpop.permute.xlu1 %5242 }
0x2e64   : > { %v5245_v56 = vmul.f32 %v7951_v45, %v5243_v30 }
0x2e66   : > { %5247 = vrot.lane.b32.xlu1 %v5245_v56, %s8111_s8 }
0x2ed2   : > { %v5075_v40 = vpop.permute.xlu0 %5074 }
0x2ed3   : > { %5077 = vst.msk [vmem:[#allocation3 + $0x70] sm:$0xff] %vm491_vm1, %v5075_v40  ;;  %7141 = vmatmul.mubr.msk.f32.vlgmr.msra.gmra.mrb[60].mxu0 %vm491_vm1, %v5075_v40 }
0x2ed4   : > { %7537 = vmatpush3.bf16.msra.mxu0 %v8679_v21  ;;  %7162 = vmatprep.mubr.msk.f32.mxu0 %vm8108_vm2, %v8109_v57 }
0x2ed5   : > { %7538 = vmatprep.subr.bf16.mxu0 %v8107_v29 }
0x2ed8   : > { %7540 = vmatpush3.bf16.msra.mxu0 %v8690_v48  ;;  %v9452_v39 = vpop.permute.xlu1 %5247 }
0x2ed9   : > { %7550 = vmatprep.subr.bf16.mxu0 %v7549_v63  ;;  %v5902_v44 = vsel %vm491_vm1, %v9452_v39, %v9426_v16 }
0x2eda   : > { %v5370_v51 = vld [vmem:[#allocation3 + $0x70] sm:$0xff] }
0x2edb   : > { %7163 = vmatmul.mubr.msk.f32.vlgmr.msra.gmra.mrb[62].mxu0 %vm491_vm1, %v9452_v39  ;;  %7194 = vmatprep.mubr.msk.f32.mxu1 %vm491_vm1, %v5370_v51 }
0x2edc   : > { %7552 = vmatpush3.bf16.msra.mxu0 %v7549_v63  ;;  %7205 = vmatprep.mubr.msk.f32.mxu0 %vm491_vm1, %v9379_v3 }
0x2edd   : > { %7554 = vmatprep.subr.bf16.mxu0 %v7553_v19 }
0x2ee0   : > { %7556 = vmatpush3.bf16.msra.mxu0 %v7553_v19 }
0x2ee3   : > { %7206 = vmatmul.mubr.msk.f32.vlgmr.msra.gmra.mrb[64].mxu0 %vm491_vm1, %v9376_v36 }
0x2ee4   : > { %7208 = vmatprep.mubr.msk.f32.mxu0 %vm491_vm1, %v9385_v17 }
0x2ee7   : > { %7209 = vmatmul.mubr.msk.f32.gmra.mrb[66].mxu0 %vm491_vm1, %v9382_v12 }
0x2ee8   : > { %7211 = vmatprep.mubr.msk.f32.mxu0 %vm491_vm1, %v9391_v52 }
0x2eeb   : > { %7212 = vmatmul.mubr.msk.f32.gmra.mrb[68].mxu0 %vm491_vm1, %v9388_v55 }
0x2eec   : > { %7214 = vmatprep.mubr.msk.f32.mxu0 %vm491_vm1, %v9397_v60 }
0x2eef   : > { %7215 = vmatmul.mubr.msk.f32.gmra.mrb[70].mxu0 %vm491_vm1, %v9394_v58 }
0x2ef0   : > { %7217 = vmatprep.mubr.msk.f32.mxu0 %vm491_vm1, %v9403_v53 }
0x2ef3   : > { %7218 = vmatmul.mubr.msk.f32.gmra.mrb[72].mxu0 %vm491_vm1, %v9400_v61 }
0x2ef4   : > { %7220 = vmatprep.mubr.msk.f32.mxu0 %vm491_vm1, %v9409_v22 }
0x2ef7   : > { %7221 = vmatmul.mubr.msk.f32.gmra.mrb[74].mxu0 %vm491_vm1, %v9406_v6 }
0x2ef8   : > { %7223 = vmatprep.mubr.msk.f32.mxu0 %vm491_vm1, %v9415_v5 }
0x2efb   : > { %7224 = vmatmul.mubr.msk.f32.gmra.mrb[76].mxu0 %vm491_vm1, %v9412_v14 }
0x2fa6   : > { %v5146_v29 = vpop.f32.mrb[60].mxu0 }
0x2fa7   : > { %v7142_v57 = vpop.f32.mrb[61].mxu0 }
0x2fae   : > { %v5317_v21 = vpop.f32.mrb[62].mxu0 }
0x2faf   : > { %v5318_v48 = vadd.f32 %v5317_v21, %v5146_v29  ;;  %v7164_v36 = vpop.f32.mrb[63].mxu0 }
0x2fb1   : > { %v5321_v3 = vadd.f32 %v9343_v10, %v5318_v48 }
0x2fb3   : > { %7956 = vtanh.f32 %v5321_v3  ;;  %v6182_v6 = vmul.f32 -1.442695, %v5321_v3 }
0x2fb5   : > { %7958 = vpow2.f32 %v6182_v6 }
0x2fb6   : > { %v7207_v12 = vpop.f32.mrb[64].mxu0 }
0x2fb7   : > { %5879 = vst [vmem:[%s9487_s14 + $0x8] sm:$0xff] %v7207_v12  ;;  %v5799_v17 = vpop.f32.mrb[65].mxu0 }
0x2fb8   : > { %5878 = vst [vmem:[%s9487_s14] sm:$0xff] %v5799_v17 }
0x2fba   : > { %v7210_v55 = vpop.f32.mrb[66].mxu0 }
0x2fbb   : > { %5881 = vst [vmem:[%s9487_s14 + $0x18] sm:$0xff] %v7210_v55  ;;  %v5809_v10 = vpop.f32.mrb[67].mxu0 }
0x2fbc   : > { %5880 = vst [vmem:[%s9487_s14 + $0x10] sm:$0xff] %v5809_v10 }
0x2fbd   : > { %v7957_v52 = vpop.eup %7956 }
0x2fbe   : > { %5331 = vrot.lane.b32.xlu0 %v7957_v52, %s8110_s28  ;;  %v7213_v0 = vpop.f32.mrb[68].mxu0 }
0x2fbf   : > { %5883 = vst [vmem:[%s9487_s14 + $0x28] sm:$0xff] %v7213_v0  ;;  %v5819_v58 = vpop.f32.mrb[69].mxu0  ;;  %v7959_v1 = vpop.eup %7958 }
0x2fc0   : > { %5882 = vst [vmem:[%s9487_s14 + $0x20] sm:$0xff] %v5819_v58  ;;  %v5325_v20 = vadd.f32 1.0, %v7959_v1 }
0x2fc2   : > { %v7216_v47 = vpop.f32.mrb[70].mxu0  ;;  %7960 = vrcp.f32 %v5325_v20 }
0x2fc3   : > { %5885 = vst [vmem:[%s9487_s14 + $0x38] sm:$0xff] %v7216_v47  ;;  %v5829_v26 = vpop.f32.mrb[71].mxu0 }
0x2fc4   : > { %5884 = vst [vmem:[%s9487_s14 + $0x30] sm:$0xff] %v5829_v26 }
0x2fc6   : > { %v7219_v27 = vpop.f32.mrb[72].mxu0 }
0x2fc7   : > { %5887 = vst [vmem:[%s9487_s14 + $0x48] sm:$0xff] %v7219_v27  ;;  %v5839_v60 = vpop.f32.mrb[73].mxu0 }
0x2fc8   : > { %5886 = vst [vmem:[%s9487_s14 + $0x40] sm:$0xff] %v5839_v60 }
0x2fca   : > { %v7222_v61 = vpop.f32.mrb[74].mxu0 }
0x2fcb   : > { %5889 = vst [vmem:[%s9487_s14 + $0x58] sm:$0xff] %v7222_v61  ;;  %v5849_v59 = vpop.f32.mrb[75].mxu0 }
0x2fcc   : > { %5888 = vst [vmem:[%s9487_s14 + $0x50] sm:$0xff] %v5849_v59  ;;  %v7961_v22 = vpop.eup %7960 }
0x2fcd   : > { %v5329_v5 = vmul.f32 %v7961_v22, %v9422_v38 }
0x2fce   : > { %v7225_v53 = vpop.f32.mrb[76].mxu0 }
0x2fcf   : > { %5891 = vst [vmem:[%s9487_s14 + $0x68] sm:$0xff] %v7225_v53  ;;  %v5859_v50 = vpop.f32.mrb[77].mxu0 }
0x2fd0   : > { %5890 = vst [vmem:[%s9487_s14 + $0x60] sm:$0xff] %v5859_v50 }
0x3030   : > { %v5332_v14 = vpop.permute.xlu0 %5331 }
0x3031   : > { %v5334_v2 = vmul.f32 %v7961_v22, %v5332_v14 }
0x3033   : > { %5336 = vrot.lane.b32.xlu1 %v5334_v2, %s8111_s8 }
0x30a5   : > { %v5337_v4 = vpop.permute.xlu1 %5336 }
0x30a6   : > { %v5339_v7 = vadd.f32 %v5337_v4, %v5329_v5 }
0x30a8   : > { %7962 = vtanh.f32 %v5339_v7 }
0x30b2   : > { %v7963_v8 = vpop.eup %7962 }
0x30b3   : > { %5342 = vrot.lane.b32.xlu0 %v7963_v8, %s8110_s28 }
0x3125   : > { %v5343_v31 = vpop.permute.xlu0 %5342 }
0x3126   : > { %v5345_v15 = vmul.f32 %v7961_v22, %v5343_v31 }
0x3128   : > { %5895 = vrot.lane.b32.xlu0 %v5345_v15, %s8112_s16  ;;  %5347 = vrot.lane.b32.xlu1 %v5345_v15, %s8111_s8 }
0x312c   : > { %5899 = vrot.lane.b32.xlu1 %v5339_v7, %s8110_s28  ;;  %s5942_s28 = sshll.u32 %s265_s25, 4  ;;  %s5943_s28 = int_to_ptr.vmem [resolvable:$true] %s5942_s28 }
0x312d   : > { %s8006_s10 = scalar_lea.vmem %s5943_s28, 128  ;;  %p8013_p10 = scmp.lt.s32.totalorder %s5943_s28, %s8011_s23 }
0x312e   : > { %p8007_p6 = scmp.ne.s32.totalorder %s5943_s28, %s8006_s10  ;;  %p8014_p2 = scmp.lt.s32.totalorder %s8012_s15, %s8006_s10 }
0x3130   : > { %p8008_p13 = pnand %p8007_p6, %p9614_p12  ;;  %p8015_p4 = por %p8014_p2, %p8013_p10 }
0x3132   : > { %p8009_p7 = pneg %p8008_p13 }
0x3134   : > { %p8016_p5 = pnand %p8015_p4, %p8009_p7 }
0x319a   : > { %v5348_v62 = vpop.permute.xlu1 %5347  ;;  %v5896_v9 = vpop.permute.xlu0 %5895 }
0x319b   : > { %5350 = vst.msk [vmem:[#allocation3 + $0x78] sm:$0xff] %vm491_vm1, %v5348_v62  ;;  %v5903_v32 = vsel %vm295_vm0, %v5902_v44, %v5896_v9 }
0x319e   : > { %v5900_v45 = vpop.permute.xlu1 %5899 }
0x319f   : > { %v5905_v33 = vsel %vm5904_vm3, %v5903_v32, %v5900_v45 }
0x31a0   : > { %5906 = vst [vmem:[%s265_s25] sm:$0xff] %v5905_v33 }
0x31a2   : > { %v5371_v43 = vld [vmem:[#allocation3 + $0x78] sm:$0xff] }
0x31a3   : > { %7195 = vmatmul.mubr.msk.f32.gmra.mrb[78].mxu1 %vm491_vm1, %v5371_v43 }
0x3276   : > { %v7196_v46 = vpop.f32.mrb[78].mxu1 }
0x3277   : > { %v5566_v37 = vadd.f32 %v7196_v46, %v9357_v28  ;;  %v5560_v38 = vpop.f32.mrb[79].mxu1 }
0x3278   : > { %v5561_v42 = vadd.f32 %v9357_v28, %v5560_v38 }
0x3279   : > { %v6215_v25 = vmul.f32 -1.442695, %v5566_v37 }
0x327a   : > { %v6214_v41 = vmul.f32 -1.442695, %v5561_v42 }
0x327b   : > { %7964 = vpow2.f32 %v6215_v25 }
0x327c   : > { %7966 = vpow2.f32 %v6214_v41 }
0x3285   : > { %v7965_v16 = vpop.eup %7964 }
0x3286   : > { %v7967_v24 = vpop.eup %7966  ;;  %v5632_v23 = vadd.f32 1.0, %v7965_v16 }
0x3287   : > { %v5631_v49 = vadd.f32 1.0, %v7967_v24 }
0x3288   : > { %7968 = vrcp.f32 %v5632_v23 }
0x3289   : > { %7970 = vrcp.f32 %v5631_v49 }
0x3292   : > { %v7969_v63 = vpop.eup %7968 }
0x3293   : > { %v7971_v11 = vpop.eup %7970  ;;  %v5680_v18 = vmul.f32 %v7969_v63, %v8450_v34 }
0x3294   : > { %v5679_v54 = vmul.f32 %v7971_v11, %v8452_v35 }
0x3296   : > { %7226 = vmatprep.mubr.msk.f32.mxu1 %vm491_vm1, %v5679_v54 }
0x3297   : > { %7227 = vmatmul.mubr.msk.f32.vlgmr.msra.gmra.mrb[80].mxu1 %vm491_vm1, %v5680_v18 }
0x3298   : > { %8019 = shalt.err (!%p8016_p5)
}
0x3299   : > { %s8020_s26 = scalar_lea.hbm %s9527_s9, 128  ;;  %s8024_s25 = scalar_lea.hbm %s9605_s5, 256 }
0x329a   : > { %p8021_p8 = scmp.ne.s32.totalorder %s9527_s9, %s8020_s26  ;;  %p8025_p1 = scmp.lt.u32.totalorder %s9527_s9, %s9605_s5 }
0x329b   : > { %p8026_p3 = scmp.lt.u32.totalorder %s8024_s25, %s8020_s26  ;;  %p8028_p6 = scmp.lt.u32.totalorder %s8020_s26, %s9527_s9 }
0x329c   : > { %p8022_p9 = pnand %p8021_p8, %p9614_p12 }
0x329d   : > { %p8027_p11 = por %p8026_p3, %p8025_p1 }
0x329e   : > { %p8023_p0 = pneg %p8022_p9 }
0x329f   : > { %p8029_p13 = por %p8028_p6, %p8027_p11 }
0x32a1   : > { %p8030_p7 = pnand %p8029_p13, %p8023_p0 }
0x32a3   : > { %8033 = shalt.err (!%p8030_p7)
}
0x32a4   : > { %7564 = dma.vmem_to_hbm [thread:$0]  (%p9614_p12), %s5943_s28, 128, %s9527_s9, %s5913_s29  }
0x32a5   : > { %s6240_s7 = sshll.u32 %s8168_s22, 11  ;;  %s5926_s10 = sshll.u32 %s9487_s14, 4  ;;  %s9554_s10 = int_to_ptr.vmem [resolvable:$true] %s5926_s10 }
0x32a6   : > { %s9552_s15 = scalar_lea.hbm %s9604_s4, %s6240_s7  ;;  %s5908_s26 = scalar_lea.sflag [#allocation6], %s8252_s13 }
0x32a7   : > { %s8034_s12 = scalar_lea.vmem %s9554_s10, 2048  ;;  %s8114_s22 = smov [#allocation7]  }
0x32a8   : > { %p8035_p10 = scmp.ne.s32.totalorder %s9554_s10, %s8034_s12  ;;  %s8038_s28 = sshll.u32 %s8114_s22, 4  ;;  %s8039_s28 = int_to_ptr.vmem [resolvable:$false] %s8038_s28 }
0x32a9   : > { %s8040_s9 = scalar_lea.vmem %s8039_s28, 4096  ;;  %p8041_p5 = scmp.lt.s32.totalorder %s9554_s10, %s8039_s28 }
0x32aa   : > { %p8036_p2 = pnand %p8035_p10, %p9614_p12  ;;  %p8042_p8 = scmp.lt.s32.totalorder %s8040_s9, %s8034_s12 }
0x32ac   : > { %p8037_p4 = pneg %p8036_p2  ;;  %p8043_p9 = por %p8042_p8, %p8041_p5 }
0x32ae   : > { %p8044_p0 = pnand %p8043_p9, %p8037_p4 }
0x336a   : > { %v7228_v34 = vpop.f32.mrb[80].mxu1 }
0x336b   : > { %5893 = vst [vmem:[%s9487_s14 + $0x78] sm:$0xff] %v7228_v34  ;;  %v5869_v35 = vpop.f32.mrb[81].mxu1 }
0x336c   : > { %5892 = vst [vmem:[%s9487_s14 + $0x70] sm:$0xff] %v5869_v35 }
0x336d   : > { %8047 = shalt.err (!%p8044_p0)
}
0x336e   : > { %s8048_s14 = scalar_lea.hbm %s9552_s15, 2048  ;;  %s8052_s25 = scalar_lea.hbm %s9604_s4, 4096 }
0x336f   : > { %p8049_p1 = scmp.ne.s32.totalorder %s9552_s15, %s8048_s14  ;;  %p8053_p6 = scmp.lt.u32.totalorder %s9552_s15, %s9604_s4 }
0x3370   : > { %p8054_p13 = scmp.lt.u32.totalorder %s8052_s25, %s8048_s14  ;;  %p8056_p10 = scmp.lt.u32.totalorder %s8048_s14, %s9552_s15 }
0x3371   : > { %p8050_p3 = pnand %p8049_p1, %p9614_p12 }
0x3372   : > { %p8055_p7 = por %p8054_p13, %p8053_p6 }
0x3373   : > { %p8051_p11 = pneg %p8050_p3 }
0x3374   : > { %p8057_p2 = por %p8056_p10, %p8055_p7 }
0x3376   : > { %p8058_p4 = pnand %p8057_p2, %p8051_p11 }
0x3378   : > { %8061 = shalt.err (!%p8058_p4)
}
0x3379   : > { %s8115_s7 = smov 128   ;;  %s8116_s11 = smov 8  }
0x337a   : > { %7563 = dma.vmem_to_hbm [thread:$0]  (%p9614_p12), %s9554_s10, 2048, %s9552_s15, %s5908_s26, %s8115_s7, %s8115_s7, %s8116_s11  }
0x337b PF: > { %s5954_s23 = sand.u32 1, %s8092_s18   ;;  %p9615_p5 = scmp.ne.s32.totalorder %s9610_s6, 0 }
0x337c   : > { %p9616_p8 = scmp.ge.s32.totalorder %s8104_s21, 2  ;;  %s5955_s12 = scalar_lea.sflag [#allocation6], %s5954_s23 }
0x337e   : > { %p7572_p9 = pnand %p9616_p8, %p9615_p5 }
0x3380   : > { %8083 = dma.done.wait (!%p7572_p9), %s5955_s12, 2048  }
0x3381   : > { %8085 = vsyncadd (!%p7572_p9), %s5955_s12, 4294965248  ;;  %s5964_s22 = scalar_lea.sflag [#allocation9], %s5954_s23 }
0x3382   : > { %8087 = dma.done.wait (!%p7572_p9), %s5964_s22, 128  }
0x3383   : > { %8089 = vsyncadd (!%p7572_p9), %s5964_s22, 4294967168  ;;  %p22_p12 = scmp.ge.s32.totalorder %s8172_s24, 4   ;;  %s9617_s18 = smov %s8096_s19 }
0x3384   : > { %s9618_s19 = smov %s8100_s20  ;;  %s9619_s20 = smov %s8184_s27 }
0x3385   : > { %s9620_s21 = smov %s8172_s24  ;;  %24 = sbr.rel (!%p22_p12) target bundleno = 7 (0x7), region = 101 }
0x338c   :  { %5969 = vsyncpa [#allocation5], 1 }
0x338d   :  { %5971 = vsyncpa [#allocation5 + $0x1], 1 }
0x338e   :  { %5972 = vsyncpa [#allocation6], 1 }
0x338f   :  { %5974 = vsyncpa [#allocation6 + $0x1], 1 }
0x3390   :  { %5975 = vsyncpa [#allocation9], 1 }
0x3391   :  { %5977 = vsyncpa [#allocation9 + $0x1], 1 }

</bundles_post_ra>
